<compile_context>
chip_gen: v7x
topology: tpu7x:2x2x1
jax: 0.10.0
libtpu: 0.0.40
codegen_flags: <defaults>
</compile_context>

<pallas_src>
import numpy as np
import jax
import jax.numpy as jnp
from jax.experimental import pallas as pl
from jax.experimental.pallas import tpu as pltpu

EPS = 1e-5
MXU_DTYPE = jnp.bfloat16   # MXU operand dtype (f32 accumulation everywhere)
CPAD = 128                 # lane-dense channel padding for every feature map
K0PAD = 256                # padded contraction dim for the conv0 im2col matmul
K2PAD = 2 * CPAD           # padded contraction dim for the fused 9-tap 3x3 conv

# ------------------------------ configuration ------------------------------
NUM_CLASSES = 10
IN_CHANNELS = 4
GROWTH_RATE = 8
BLOCK_CONFIG = (2, 2)
NUM_INIT_FEATURES = 16
BN_SIZE = 2
CMID = BN_SIZE * GROWTH_RATE   # bottleneck width (16)
DROP_RATE = 0.0  # TODO(synk): dropout path (drop_rate>0, training) not implemented

_TAPS = tuple((dy, dx) for dy in (-1, 0, 1) for dx in (-1, 0, 1))  # k=(dy+1)*3+(dx+1)


def _conv_out(size, k, s, p):
    return (size + 2 * p - k) // s + 1


def _out_rows(n):
    return max(8, -(-n // 8) * 8)


# --------------------- tiny precomputed helper matrices ---------------------
def _tap_masks(N, H, W):
    """(N*H*W, 9) f32: mask[row(n,h,w), k] = 1 iff (h+dy, w+dx) is in-bounds."""
    P = N * H * W
    M = np.zeros((P, 9), np.float32)
    for n in range(N):
        for h in range(H):
            for w in range(W):
                r = (n * H + h) * W + w
                for dy in (-1, 0, 1):
                    for dx in (-1, 0, 1):
                        if 0 <= h + dy < H and 0 <= w + dx < W:
                            M[r, (dy + 1) * 3 + (dx + 1)] = 1.0
    return M


def _stride2_select(N, H, W, Ho, Wo):
    """(N*Ho*Wo, N*H*W) 0/1: out pixel (n,ho,wo) <- full-res pixel (n,2ho,2wo)."""
    S = np.zeros((N * Ho * Wo, N * H * W), np.float32)
    for n in range(N):
        for ho in range(Ho):
            for wo in range(Wo):
                S[(n * Ho + ho) * Wo + wo, (n * H + 2 * ho) * W + 2 * wo] = 1.0
    return S


def _avg2x2_matrix(N, H, W):
    """(N*H/2*W/2, N*H*W) exact-bin AdaptiveAvgPool(2) matrix."""
    Ho, Wo = H // 2, W // 2
    A = np.zeros((N * Ho * Wo, N * H * W), np.float32)
    for n in range(N):
        for ho in range(Ho):
            for wo in range(Wo):
                for dy in range(2):
                    for dx in range(2):
                        A[(n * Ho + ho) * Wo + wo,
                          (n * H + 2 * ho + dy) * W + 2 * wo + dx] = 0.25
    return A


def _global_avg_matrix(N, H, W, rows):
    A = np.zeros((rows, N * H * W), np.float32)
    for n in range(N):
        A[n, n * H * W:(n + 1) * H * W] = 1.0 / (H * W)
    return A


# ------------------------------ the fused kernel -----------------------------
def _make_kernel(N, H, W):
    H0, W0 = _conv_out(H, 7, 2, 3), _conv_out(W, 7, 2, 3)
    H1, W1 = _conv_out(H0, 3, 2, 1), _conv_out(W0, 3, 2, 1)
    P0 = N * H0 * W0
    assert 8 * CMID <= CPAD and CPAD + CMID <= K2PAD

    block_dims = []
    Hs, Ws = H1, W1
    for bi, num_layers in enumerate(BLOCK_CONFIG):
        block_dims.append((Hs, Ws, N * Hs * Ws, num_layers))
        if bi != len(BLOCK_CONFIG) - 1:
            Hs, Ws = Hs // 2, Ws // 2

    def kernel(*refs):
        out_ref = refs[-1]
        it = iter(refs[:-1])
        nxt = lambda: next(it)[...]

        def mm(a, b):
            # Single hoisted cast per operand (no-op if already bf16), f32 acc.
            return jnp.dot(a.astype(MXU_DTYPE), b.astype(MXU_DTYPE),
                           preferred_element_type=jnp.float32)

        def bn_relu(x, gamma, beta):
            # Training-mode BN folded to one scale/shift (single-pass batch
            # stats over the pixel axis), then ReLU.  All f32 on the VPU.
            mean = jnp.mean(x, axis=0, keepdims=True)
            msq = jnp.mean(x * x, axis=0, keepdims=True)
            scale = gamma * jax.lax.rsqrt(msq - mean * mean + EPS)
            shift = beta - mean * scale
            return jnp.maximum(x * scale + shift, 0.0)

        def rowshift(x, d, P):
            # out[i] = x[(i + d) % P]; wrapped rows are zeroed by the caller's mask.
            return x if d % P == 0 else pltpu.roll(x, shift=(-d) % P, axis=0)

        # ---- stem: conv0 (im2col matmul) -> norm0/relu -> maxpool 3x3 s2 p1 ----
        patches0 = nxt()                       # (P0, K0PAD) bf16
        x = mm(patches0, nxt())                # (P0, CPAD) f32
        x = bn_relu(x, nxt(), nxt())
        mask0 = nxt()                          # (P0, 9) f32 boundary masks
        # maxpool = VPU max over rolled+masked copies (exact because x >= 0
        # post-ReLU) followed by ONE stride-2 center-tap selection matmul.
        maxed = x
        for k, (dy, dx) in enumerate(_TAPS):
            if dy == 0 and dx == 0:
                continue
            maxed = jnp.maximum(
                maxed, rowshift(x, dy * W0 + dx, P0) * mask0[:, k:k + 1])
        x = mm(nxt(), maxed)                   # (P1, CPAD) f32

        # ---- dense blocks (+ transitions) ----
        for bi, (Hs_, Ws_, P, num_layers) in enumerate(block_dims):
            maskB = nxt()                      # (P, 9) f32 boundary masks
            for _ in range(num_layers):
                g1, b1 = nxt(), nxt()
                w1 = nxt()                     # (CPAD, CPAD) 1x1 bottleneck
                g2, b2 = nxt(), nxt()
                w2f = nxt()                    # (K2PAD, CPAD) fused 3x3 weight
                y = bn_relu(x, g1, b1)
                mid = mm(y, w1)                # 1x1 conv; lanes [0,CMID) live
                y2 = bn_relu(mid, g2, b2)      # f32, padded lanes exactly 0
                # Build the (P, K2PAD) fused 3x3 patch slab: tap k's row-shifted
                # copy is lane-rolled to lanes [CMID*k, CMID*(k+1)) (tap 8 goes
                # to the high 128 lanes).  Rolls on the XLU, masks/adds on the
                # VPU; only ONE K=256 MXU matmul per dense layer.
                lo, hi = None, None
                for k, (dy, dx) in enumerate(_TAPS):
                    r = rowshift(y2, dy * Ws_ + dx, P)
                    if dy != 0 or dx != 0:
                        r = r * maskB[:, k:k + 1]
                    if k < 8:
                        if k:
                            r = pltpu.roll(r, shift=CMID * k, axis=1)
                        lo = r if lo is None else lo + r
                    else:
                        hi = r
                slab = jnp.concatenate([lo, hi], axis=1)   # (P, K2PAD) f32
                new = mm(slab, w2f)            # new features at this layer's offset
                x = x + new                    # dense concat == add (disjoint lanes)
            if bi != len(block_dims) - 1:      # transition: BN+ReLU+1x1, avgpool->2
                y = bn_relu(x, nxt(), nxt())
                y = mm(y, nxt())
                x = mm(nxt(), y)

        # ---- norm5 + relu, global avg pool, classifier ----
        x = bn_relu(x, nxt(), nxt())
        x = mm(nxt(), x)                       # (OUT_ROWS, CPAD) pooled features
        out_ref[...] = mm(x, nxt()) + nxt()    # classifier + bias, full (8,128) store

        leftover = object()
        assert next(it, leftover) is leftover, "param packing / kernel mismatch"

    return kernel


# ------------------------------ parameter packing ----------------------------
def _pack_norm(gb):
    g, b = gb
    c = g.shape[0]
    gp = np.zeros((1, CPAD), np.float32); gp[0, :c] = np.asarray(g)
    bp = np.zeros((1, CPAD), np.float32); bp[0, :c] = np.asarray(b)
    return [jnp.asarray(gp), jnp.asarray(bp)]


def _pack_mat_1x1(w):  # (cout, cin, 1, 1) -> (CPAD, CPAD) bf16
    w = np.asarray(w, np.float32)
    cout, cin = w.shape[0], w.shape[1]
    assert cin <= CPAD and cout <= CPAD
    m = np.zeros((CPAD, CPAD), np.float32)
    m[:cin, :cout] = w.reshape(cout, cin).T
    return jnp.asarray(m, MXU_DTYPE)


def _pack_conv3x3_fused(w, out_offset):
    """(cout, cin, 3, 3) -> (K2PAD, CPAD) bf16: tap k's cin rows live at
    cin*k (k<8) / CPAD (k=8); outputs land at columns [out_offset, out_offset+cout)."""
    w = np.asarray(w, np.float32)
    cout, cin = w.shape[0], w.shape[1]
    assert 8 * cin <= CPAD and CPAD + cin <= K2PAD
    assert out_offset + cout <= CPAD, "dense concat-as-add must fit in 128 lanes"
    m = np.zeros((K2PAD, CPAD), np.float32)
    for ky in range(3):
        for kx in range(3):
            k = ky * 3 + kx
            row0 = cin * k if k < 8 else CPAD
            m[row0:row0 + cin, out_offset:out_offset + cout] = w[:, :, ky, kx].T
    return jnp.asarray(m, MXU_DTYPE)


def pack_params(params, N, H, W):
    """Pack weights into lane-dense, 128-padded bf16 MXU operands plus the tiny
    precomputed masks / pooling matrices.  Order must mirror the kernel."""
    packed = []
    H0, W0 = _conv_out(H, 7, 2, 3), _conv_out(W, 7, 2, 3)
    H1, W1 = _conv_out(H0, 3, 2, 1), _conv_out(W0, 3, 2, 1)
    assert N <= _out_rows(N)

    # conv0 weight as (K0PAD, CPAD); rows flattened as (cin, kh, kw) like torch
    w0 = np.asarray(params["conv0"], np.float32)
    cout0, cin0, kh, kw = w0.shape
    k0 = cin0 * kh * kw
    assert k0 <= K0PAD and cout0 <= CPAD
    w0m = np.zeros((K0PAD, CPAD), np.float32)
    w0m[:k0, :cout0] = w0.reshape(cout0, k0).T
    packed.append(jnp.asarray(w0m, MXU_DTYPE))
    packed += _pack_norm(params["norm0"])
    packed.append(jnp.asarray(_tap_masks(N, H0, W0), jnp.float32))
    packed.append(jnp.asarray(_stride2_select(N, H0, W0, H1, W1), MXU_DTYPE))

    num_features = NUM_INIT_FEATURES
    Hs, Ws = H1, W1
    for bi, num_layers in enumerate(BLOCK_CONFIG):
        packed.append(jnp.asarray(_tap_masks(N, Hs, Ws), jnp.float32))
        for li in range(num_layers):
            lp = params["blocks"][bi]["layers"][li]
            cin = num_features + li * GROWTH_RATE
            assert cin + GROWTH_RATE <= CPAD
            packed += _pack_norm(lp["norm1"])
            packed.append(_pack_mat_1x1(lp["conv1"]))
            packed += _pack_norm(lp["norm2"])
            packed.append(_pack_conv3x3_fused(lp["conv2"], out_offset=cin))
        num_features += num_layers * GROWTH_RATE
        if bi != len(BLOCK_CONFIG) - 1:
            tp = params["blocks"][bi]["transition"]
            packed += _pack_norm(tp["norm"])
            packed.append(_pack_mat_1x1(tp["conv"]))
            packed.append(jnp.asarray(_avg2x2_matrix(N, Hs, Ws), MXU_DTYPE))
            num_features //= 2
            Hs, Ws = Hs // 2, Ws // 2
    packed += _pack_norm(params["norm5"])
    packed.append(jnp.asarray(_global_avg_matrix(N, Hs, Ws, _out_rows(N)), MXU_DTYPE))

    fcw = np.asarray(params["fc_w"], np.float32)
    fcb = np.asarray(params["fc_b"], np.float32)
    wc = np.zeros((CPAD, CPAD), np.float32); wc[:fcw.shape[1], :fcw.shape[0]] = fcw.T
    bc = np.zeros((1, CPAD), np.float32); bc[0, :fcb.shape[0]] = fcb
    packed += [jnp.asarray(wc, MXU_DTYPE), jnp.asarray(bc)]
    return packed


# ------------------------------ wrapper --------------------------------------
def _im2col(x_nhwc, kh, kw, stride, pad):
    N, H, W, C = x_nhwc.shape
    xp = jnp.pad(x_nhwc, ((0, 0), (pad, pad), (pad, pad), (0, 0)))
    Ho = (H + 2 * pad - kh) // stride + 1
    Wo = (W + 2 * pad - kw) // stride + 1
    patches = [xp[:, dy:dy + stride * Ho:stride, dx:dx + stride * Wo:stride, :]
               for dy in range(kh) for dx in range(kw)]
    p = jnp.stack(patches, axis=0).reshape(kh, kw, N, Ho, Wo, C)
    p = p.transpose(2, 3, 4, 5, 0, 1)            # (N,Ho,Wo,C,kh,kw)
    return p.reshape(N * Ho * Wo, C * kh * kw)


def densenet_forward(x_nchw, packed):
    N, _, H, W = x_nchw.shape
    x = jnp.transpose(x_nchw, (0, 2, 3, 1)).astype(jnp.float32)  # NCHW -> NHWC
    # conv0 im2col patch matrix is built once from the raw input, before the
    # single fused kernel (no inter-kernel HBM round trips).
    patches = _im2col(x, 7, 7, 2, 3)
    patches = jnp.pad(patches, ((0, 0), (0, K0PAD - patches.shape[1])))
    inputs = [patches.astype(MXU_DTYPE)] + list(packed)

    kernel = _make_kernel(N, H, W)
    vmem = pl.BlockSpec(memory_space=pltpu.MemorySpace.VMEM)
    out = pl.pallas_call(
        kernel,
        out_shape=jax.ShapeDtypeStruct((_out_rows(N), CPAD), jnp.float32),
        in_specs=[vmem] * len(inputs),
        out_specs=vmem,
    )(*inputs)
    return out[:N, :NUM_CLASSES]


# ------------------------------ parameter init --------------------------------
def init_params(key):
    keys = iter(jax.random.split(key, 128))

    def conv_w(cout, cin, kh, kw):
        fan_in = cin * kh * kw
        std = (2.0 / fan_in) ** 0.5  # kaiming_normal_
        return jax.random.normal(next(keys), (cout, cin, kh, kw), jnp.float32) * std

    def norm_p(c):
        return (jnp.ones((c,), jnp.float32), jnp.zeros((c,), jnp.float32))

    params = {
        "conv0": conv_w(NUM_INIT_FEATURES, IN_CHANNELS, 7, 7),
        "norm0": norm_p(NUM_INIT_FEATURES),
    }
    num_features = NUM_INIT_FEATURES
    blocks = []
    for i, num_layers in enumerate(BLOCK_CONFIG):
        layers = []
        for l in range(num_layers):
            cin = num_features + l * GROWTH_RATE
            layers.append({
                "norm1": norm_p(cin),
                "conv1": conv_w(CMID, cin, 1, 1),
                "norm2": norm_p(CMID),
                "conv2": conv_w(GROWTH_RATE, CMID, 3, 3),
            })
        num_features += num_layers * GROWTH_RATE
        block = {"layers": layers}
        if i != len(BLOCK_CONFIG) - 1:
            block["transition"] = {
                "norm": norm_p(num_features),
                "conv": conv_w(num_features // 2, num_features, 1, 1),
            }
            num_features //= 2
        blocks.append(block)
    params["blocks"] = blocks
    params["norm5"] = norm_p(num_features)
    bound = 1.0 / (num_features ** 0.5)
    params["fc_w"] = jax.random.uniform(
        next(keys), (NUM_CLASSES, num_features), jnp.float32, -bound, bound)
    params["fc_b"] = jnp.zeros((NUM_CLASSES,), jnp.float32)
    return params


# ------------------------------ main ------------------------------------------
if __name__ == "__main__":
    key = jax.random.PRNGKey(0)
    pkey, xkey = jax.random.split(key)
    params = init_params(pkey)

    N, H, W = 2, 16, 16
    packed = pack_params(params, N=N, H=H, W=W)   # packed once, outside jit
    x = jax.random.normal(xkey, (N, IN_CHANNELS, H, W), jnp.float32)  # NCHW

    fwd = jax.jit(lambda inp: densenet_forward(inp, packed))
    out = fwd(x)
    jax.block_until_ready(out)
    assert out.shape == (N, NUM_CLASSES), out.shape
    assert bool(jnp.all(jnp.isfinite(out)))
    print("KERNEL_OK")
</pallas_src>

<mosaic_0001>
module attributes {stable_mosaic.version = 11 : i64} {
  func.func @kernel(%arg0: memref<128x256xbf16, #tpu.memory_space<vmem>>, %arg1: memref<256x128xbf16, #tpu.memory_space<vmem>>, %arg2: memref<1x128xf32, #tpu.memory_space<vmem>>, %arg3: memref<1x128xf32, #tpu.memory_space<vmem>>, %arg4: memref<128x9xf32, #tpu.memory_space<vmem>>, %arg5: memref<32x128xbf16, #tpu.memory_space<vmem>>, %arg6: memref<32x9xf32, #tpu.memory_space<vmem>>, %arg7: memref<1x128xf32, #tpu.memory_space<vmem>>, %arg8: memref<1x128xf32, #tpu.memory_space<vmem>>, %arg9: memref<128x128xbf16, #tpu.memory_space<vmem>>, %arg10: memref<1x128xf32, #tpu.memory_space<vmem>>, %arg11: memref<1x128xf32, #tpu.memory_space<vmem>>, %arg12: memref<256x128xbf16, #tpu.memory_space<vmem>>, %arg13: memref<1x128xf32, #tpu.memory_space<vmem>>, %arg14: memref<1x128xf32, #tpu.memory_space<vmem>>, %arg15: memref<128x128xbf16, #tpu.memory_space<vmem>>, %arg16: memref<1x128xf32, #tpu.memory_space<vmem>>, %arg17: memref<1x128xf32, #tpu.memory_space<vmem>>, %arg18: memref<256x128xbf16, #tpu.memory_space<vmem>>, %arg19: memref<1x128xf32, #tpu.memory_space<vmem>>, %arg20: memref<1x128xf32, #tpu.memory_space<vmem>>, %arg21: memref<128x128xbf16, #tpu.memory_space<vmem>>, %arg22: memref<8x32xbf16, #tpu.memory_space<vmem>>, %arg23: memref<8x9xf32, #tpu.memory_space<vmem>>, %arg24: memref<1x128xf32, #tpu.memory_space<vmem>>, %arg25: memref<1x128xf32, #tpu.memory_space<vmem>>, %arg26: memref<128x128xbf16, #tpu.memory_space<vmem>>, %arg27: memref<1x128xf32, #tpu.memory_space<vmem>>, %arg28: memref<1x128xf32, #tpu.memory_space<vmem>>, %arg29: memref<256x128xbf16, #tpu.memory_space<vmem>>, %arg30: memref<1x128xf32, #tpu.memory_space<vmem>>, %arg31: memref<1x128xf32, #tpu.memory_space<vmem>>, %arg32: memref<128x128xbf16, #tpu.memory_space<vmem>>, %arg33: memref<1x128xf32, #tpu.memory_space<vmem>>, %arg34: memref<1x128xf32, #tpu.memory_space<vmem>>, %arg35: memref<256x128xbf16, #tpu.memory_space<vmem>>, %arg36: memref<1x128xf32, #tpu.memory_space<vmem>>, %arg37: memref<1x128xf32, #tpu.memory_space<vmem>>, %arg38: memref<8x8xbf16, #tpu.memory_space<vmem>>, %arg39: memref<128x128xbf16, #tpu.memory_space<vmem>>, %arg40: memref<1x128xf32, #tpu.memory_space<vmem>>, %arg41: memref<8x128xf32, #tpu.memory_space<vmem>>) attributes {dimension_semantics = [], scalar_prefetch = 0 : i64, scratch_operands = 0 : i64, tpu.core_type = #tpu.core_type<tc>} {
    %c0 = arith.constant 0 : index
    %c0_0 = arith.constant 0 : index
    %0 = vector.load %arg0[%c0, %c0_0] : memref<128x256xbf16, #tpu.memory_space<vmem>>, vector<128x256xbf16>
    %c0_1 = arith.constant 0 : index
    %c0_2 = arith.constant 0 : index
    %1 = vector.load %arg1[%c0_1, %c0_2] : memref<256x128xbf16, #tpu.memory_space<vmem>>, vector<256x128xbf16>
    %cst = arith.constant dense<0.000000e+00> : vector<128x128xf32>
    %2 = tpu.matmul %0, %1, %cst {dimension_numbers = #tpu.dot_dimension_numbers<[1], [0], [0], [1], [0, 0, 1, 1], [], []>} : vector<128x256xbf16>, vector<256x128xbf16>, vector<128x128xf32> -> vector<128x128xf32>
    %c0_3 = arith.constant 0 : index
    %c0_4 = arith.constant 0 : index
    %3 = vector.load %arg2[%c0_3, %c0_4] : memref<1x128xf32, #tpu.memory_space<vmem>>, vector<1x128xf32>
    %c0_5 = arith.constant 0 : index
    %c0_6 = arith.constant 0 : index
    %4 = vector.load %arg3[%c0_5, %c0_6] : memref<1x128xf32, #tpu.memory_space<vmem>>, vector<1x128xf32>
    %cst_7 = arith.constant dense<0.000000e+00> : vector<128xf32>
    %5 = vector.multi_reduction <add>, %2, %cst_7 [0] : vector<128x128xf32> to vector<128xf32>
    %6 = vector.shape_cast %5 : vector<128xf32> to vector<1x128xf32>
    %cst_8 = arith.constant 1.280000e+02 : f32
    %7 = vector.broadcast %cst_8 : f32 to vector<1x128xf32>
    %8 = arith.divf %6, %7 : vector<1x128xf32>
    %9 = arith.mulf %2, %2 : vector<128x128xf32>
    %cst_9 = arith.constant dense<0.000000e+00> : vector<128xf32>
    %10 = vector.multi_reduction <add>, %9, %cst_9 [0] : vector<128x128xf32> to vector<128xf32>
    %11 = vector.shape_cast %10 : vector<128xf32> to vector<1x128xf32>
    %cst_10 = arith.constant 1.280000e+02 : f32
    %12 = vector.broadcast %cst_10 : f32 to vector<1x128xf32>
    %13 = arith.divf %11, %12 : vector<1x128xf32>
    %14 = arith.mulf %8, %8 : vector<1x128xf32>
    %15 = arith.subf %13, %14 : vector<1x128xf32>
    %cst_11 = arith.constant 9.99999974E-6 : f32
    %16 = vector.broadcast %cst_11 : f32 to vector<1x128xf32>
    %17 = arith.addf %15, %16 : vector<1x128xf32>
    %18 = math.rsqrt %17 : vector<1x128xf32>
    %19 = arith.mulf %3, %18 : vector<1x128xf32>
    %20 = arith.mulf %8, %19 : vector<1x128xf32>
    %21 = arith.subf %4, %20 : vector<1x128xf32>
    %22 = vector.broadcast %19 : vector<1x128xf32> to vector<128x128xf32>
    %23 = arith.mulf %2, %22 : vector<128x128xf32>
    %24 = vector.broadcast %21 : vector<1x128xf32> to vector<128x128xf32>
    %25 = arith.addf %23, %24 : vector<128x128xf32>
    %cst_12 = arith.constant 0.000000e+00 : f32
    %26 = vector.broadcast %cst_12 : f32 to vector<128x128xf32>
    %27 = arith.maximumf %25, %26 : vector<128x128xf32>
    %c0_13 = arith.constant 0 : index
    %c0_14 = arith.constant 0 : index
    %28 = vector.load %arg4[%c0_13, %c0_14] : memref<128x9xf32, #tpu.memory_space<vmem>>, vector<128x9xf32>
    %c9_i32 = arith.constant 9 : i32
    %29 = tpu.dynamic_rotate %27 by %c9_i32 dim 0 : vector<128x128xf32>, i32 -> vector<128x128xf32>
    %30 = vector.extract_strided_slice %28 {offsets = [0, 0], sizes = [128, 1], strides = [1, 1]} : vector<128x9xf32> to vector<128x1xf32>
    %31 = vector.broadcast %30 : vector<128x1xf32> to vector<128x128xf32>
    %32 = arith.mulf %29, %31 : vector<128x128xf32>
    %33 = arith.maximumf %27, %32 : vector<128x128xf32>
    %c8_i32 = arith.constant 8 : i32
    %34 = tpu.dynamic_rotate %27 by %c8_i32 dim 0 : vector<128x128xf32>, i32 -> vector<128x128xf32>
    %35 = vector.extract_strided_slice %28 {offsets = [0, 1], sizes = [128, 1], strides = [1, 1]} : vector<128x9xf32> to vector<128x1xf32>
    %36 = vector.broadcast %35 : vector<128x1xf32> to vector<128x128xf32>
    %37 = arith.mulf %34, %36 : vector<128x128xf32>
    %38 = arith.maximumf %33, %37 : vector<128x128xf32>
    %c7_i32 = arith.constant 7 : i32
    %39 = tpu.dynamic_rotate %27 by %c7_i32 dim 0 : vector<128x128xf32>, i32 -> vector<128x128xf32>
    %40 = vector.extract_strided_slice %28 {offsets = [0, 2], sizes = [128, 1], strides = [1, 1]} : vector<128x9xf32> to vector<128x1xf32>
    %41 = vector.broadcast %40 : vector<128x1xf32> to vector<128x128xf32>
    %42 = arith.mulf %39, %41 : vector<128x128xf32>
    %43 = arith.maximumf %38, %42 : vector<128x128xf32>
    %c1_i32 = arith.constant 1 : i32
    %44 = tpu.dynamic_rotate %27 by %c1_i32 dim 0 : vector<128x128xf32>, i32 -> vector<128x128xf32>
    %45 = vector.extract_strided_slice %28 {offsets = [0, 3], sizes = [128, 1], strides = [1, 1]} : vector<128x9xf32> to vector<128x1xf32>
    %46 = vector.broadcast %45 : vector<128x1xf32> to vector<128x128xf32>
    %47 = arith.mulf %44, %46 : vector<128x128xf32>
    %48 = arith.maximumf %43, %47 : vector<128x128xf32>
    %c127_i32 = arith.constant 127 : i32
    %49 = tpu.dynamic_rotate %27 by %c127_i32 dim 0 : vector<128x128xf32>, i32 -> vector<128x128xf32>
    %50 = vector.extract_strided_slice %28 {offsets = [0, 5], sizes = [128, 1], strides = [1, 1]} : vector<128x9xf32> to vector<128x1xf32>
    %51 = vector.broadcast %50 : vector<128x1xf32> to vector<128x128xf32>
    %52 = arith.mulf %49, %51 : vector<128x128xf32>
    %53 = arith.maximumf %48, %52 : vector<128x128xf32>
    %c121_i32 = arith.constant 121 : i32
    %54 = tpu.dynamic_rotate %27 by %c121_i32 dim 0 : vector<128x128xf32>, i32 -> vector<128x128xf32>
    %55 = vector.extract_strided_slice %28 {offsets = [0, 6], sizes = [128, 1], strides = [1, 1]} : vector<128x9xf32> to vector<128x1xf32>
    %56 = vector.broadcast %55 : vector<128x1xf32> to vector<128x128xf32>
    %57 = arith.mulf %54, %56 : vector<128x128xf32>
    %58 = arith.maximumf %53, %57 : vector<128x128xf32>
    %c120_i32 = arith.constant 120 : i32
    %59 = tpu.dynamic_rotate %27 by %c120_i32 dim 0 : vector<128x128xf32>, i32 -> vector<128x128xf32>
    %60 = vector.extract_strided_slice %28 {offsets = [0, 7], sizes = [128, 1], strides = [1, 1]} : vector<128x9xf32> to vector<128x1xf32>
    %61 = vector.broadcast %60 : vector<128x1xf32> to vector<128x128xf32>
    %62 = arith.mulf %59, %61 : vector<128x128xf32>
    %63 = arith.maximumf %58, %62 : vector<128x128xf32>
    %c119_i32 = arith.constant 119 : i32
    %64 = tpu.dynamic_rotate %27 by %c119_i32 dim 0 : vector<128x128xf32>, i32 -> vector<128x128xf32>
    %65 = vector.extract_strided_slice %28 {offsets = [0, 8], sizes = [128, 1], strides = [1, 1]} : vector<128x9xf32> to vector<128x1xf32>
    %66 = vector.broadcast %65 : vector<128x1xf32> to vector<128x128xf32>
    %67 = arith.mulf %64, %66 : vector<128x128xf32>
    %68 = arith.maximumf %63, %67 : vector<128x128xf32>
    %c0_15 = arith.constant 0 : index
    %c0_16 = arith.constant 0 : index
    %69 = vector.load %arg5[%c0_15, %c0_16] : memref<32x128xbf16, #tpu.memory_space<vmem>>, vector<32x128xbf16>
    %70 = arith.truncf %68 : vector<128x128xf32> to vector<128x128xbf16>
    %cst_17 = arith.constant dense<0.000000e+00> : vector<32x128xf32>
    %71 = tpu.matmul %69, %70, %cst_17 {dimension_numbers = #tpu.dot_dimension_numbers<[1], [0], [0], [1], [0, 0, 1, 1], [], []>} : vector<32x128xbf16>, vector<128x128xbf16>, vector<32x128xf32> -> vector<32x128xf32>
    %c0_18 = arith.constant 0 : index
    %c0_19 = arith.constant 0 : index
    %72 = vector.load %arg6[%c0_18, %c0_19] : memref<32x9xf32, #tpu.memory_space<vmem>>, vector<32x9xf32>
    %c0_20 = arith.constant 0 : index
    %c0_21 = arith.constant 0 : index
    %73 = vector.load %arg7[%c0_20, %c0_21] : memref<1x128xf32, #tpu.memory_space<vmem>>, vector<1x128xf32>
    %c0_22 = arith.constant 0 : index
    %c0_23 = arith.constant 0 : index
    %74 = vector.load %arg8[%c0_22, %c0_23] : memref<1x128xf32, #tpu.memory_space<vmem>>, vector<1x128xf32>
    %c0_24 = arith.constant 0 : index
    %c0_25 = arith.constant 0 : index
    %75 = vector.load %arg9[%c0_24, %c0_25] : memref<128x128xbf16, #tpu.memory_space<vmem>>, vector<128x128xbf16>
    %c0_26 = arith.constant 0 : index
    %c0_27 = arith.constant 0 : index
    %76 = vector.load %arg10[%c0_26, %c0_27] : memref<1x128xf32, #tpu.memory_space<vmem>>, vector<1x128xf32>
    %c0_28 = arith.constant 0 : index
    %c0_29 = arith.constant 0 : index
    %77 = vector.load %arg11[%c0_28, %c0_29] : memref<1x128xf32, #tpu.memory_space<vmem>>, vector<1x128xf32>
    %c0_30 = arith.constant 0 : index
    %c0_31 = arith.constant 0 : index
    %78 = vector.load %arg12[%c0_30, %c0_31] : memref<256x128xbf16, #tpu.memory_space<vmem>>, vector<256x128xbf16>
    %cst_32 = arith.constant dense<0.000000e+00> : vector<128xf32>
    %79 = vector.multi_reduction <add>, %71, %cst_32 [0] : vector<32x128xf32> to vector<128xf32>
    %80 = vector.shape_cast %79 : vector<128xf32> to vector<1x128xf32>
    %cst_33 = arith.constant 3.200000e+01 : f32
    %81 = vector.broadcast %cst_33 : f32 to vector<1x128xf32>
    %82 = arith.divf %80, %81 : vector<1x128xf32>
    %83 = arith.mulf %71, %71 : vector<32x128xf32>
    %cst_34 = arith.constant dense<0.000000e+00> : vector<128xf32>
    %84 = vector.multi_reduction <add>, %83, %cst_34 [0] : vector<32x128xf32> to vector<128xf32>
    %85 = vector.shape_cast %84 : vector<128xf32> to vector<1x128xf32>
    %cst_35 = arith.constant 3.200000e+01 : f32
    %86 = vector.broadcast %cst_35 : f32 to vector<1x128xf32>
    %87 = arith.divf %85, %86 : vector<1x128xf32>
    %88 = arith.mulf %82, %82 : vector<1x128xf32>
    %89 = arith.subf %87, %88 : vector<1x128xf32>
    %cst_36 = arith.constant 9.99999974E-6 : f32
    %90 = vector.broadcast %cst_36 : f32 to vector<1x128xf32>
    %91 = arith.addf %89, %90 : vector<1x128xf32>
    %92 = math.rsqrt %91 : vector<1x128xf32>
    %93 = arith.mulf %73, %92 : vector<1x128xf32>
    %94 = arith.mulf %82, %93 : vector<1x128xf32>
    %95 = arith.subf %74, %94 : vector<1x128xf32>
    %96 = vector.broadcast %93 : vector<1x128xf32> to vector<32x128xf32>
    %97 = arith.mulf %71, %96 : vector<32x128xf32>
    %98 = vector.broadcast %95 : vector<1x128xf32> to vector<32x128xf32>
    %99 = arith.addf %97, %98 : vector<32x128xf32>
    %cst_37 = arith.constant 0.000000e+00 : f32
    %100 = vector.broadcast %cst_37 : f32 to vector<32x128xf32>
    %101 = arith.maximumf %99, %100 : vector<32x128xf32>
    %102 = arith.truncf %101 : vector<32x128xf32> to vector<32x128xbf16>
    %cst_38 = arith.constant dense<0.000000e+00> : vector<32x128xf32>
    %103 = tpu.matmul %102, %75, %cst_38 {dimension_numbers = #tpu.dot_dimension_numbers<[1], [0], [0], [1], [0, 0, 1, 1], [], []>} : vector<32x128xbf16>, vector<128x128xbf16>, vector<32x128xf32> -> vector<32x128xf32>
    %cst_39 = arith.constant dense<0.000000e+00> : vector<128xf32>
    %104 = vector.multi_reduction <add>, %103, %cst_39 [0] : vector<32x128xf32> to vector<128xf32>
    %105 = vector.shape_cast %104 : vector<128xf32> to vector<1x128xf32>
    %cst_40 = arith.constant 3.200000e+01 : f32
    %106 = vector.broadcast %cst_40 : f32 to vector<1x128xf32>
    %107 = arith.divf %105, %106 : vector<1x128xf32>
    %108 = arith.mulf %103, %103 : vector<32x128xf32>
    %cst_41 = arith.constant dense<0.000000e+00> : vector<128xf32>
    %109 = vector.multi_reduction <add>, %108, %cst_41 [0] : vector<32x128xf32> to vector<128xf32>
    %110 = vector.shape_cast %109 : vector<128xf32> to vector<1x128xf32>
    %cst_42 = arith.constant 3.200000e+01 : f32
    %111 = vector.broadcast %cst_42 : f32 to vector<1x128xf32>
    %112 = arith.divf %110, %111 : vector<1x128xf32>
    %113 = arith.mulf %107, %107 : vector<1x128xf32>
    %114 = arith.subf %112, %113 : vector<1x128xf32>
    %cst_43 = arith.constant 9.99999974E-6 : f32
    %115 = vector.broadcast %cst_43 : f32 to vector<1x128xf32>
    %116 = arith.addf %114, %115 : vector<1x128xf32>
    %117 = math.rsqrt %116 : vector<1x128xf32>
    %118 = arith.mulf %76, %117 : vector<1x128xf32>
    %119 = arith.mulf %107, %118 : vector<1x128xf32>
    %120 = arith.subf %77, %119 : vector<1x128xf32>
    %121 = vector.broadcast %118 : vector<1x128xf32> to vector<32x128xf32>
    %122 = arith.mulf %103, %121 : vector<32x128xf32>
    %123 = vector.broadcast %120 : vector<1x128xf32> to vector<32x128xf32>
    %124 = arith.addf %122, %123 : vector<32x128xf32>
    %cst_44 = arith.constant 0.000000e+00 : f32
    %125 = vector.broadcast %cst_44 : f32 to vector<32x128xf32>
    %126 = arith.maximumf %124, %125 : vector<32x128xf32>
    %c5_i32 = arith.constant 5 : i32
    %127 = tpu.dynamic_rotate %126 by %c5_i32 dim 0 : vector<32x128xf32>, i32 -> vector<32x128xf32>
    %128 = vector.extract_strided_slice %72 {offsets = [0, 0], sizes = [32, 1], strides = [1, 1]} : vector<32x9xf32> to vector<32x1xf32>
    %129 = vector.broadcast %128 : vector<32x1xf32> to vector<32x128xf32>
    %130 = arith.mulf %127, %129 : vector<32x128xf32>
    %c4_i32 = arith.constant 4 : i32
    %131 = tpu.dynamic_rotate %126 by %c4_i32 dim 0 : vector<32x128xf32>, i32 -> vector<32x128xf32>
    %132 = vector.extract_strided_slice %72 {offsets = [0, 1], sizes = [32, 1], strides = [1, 1]} : vector<32x9xf32> to vector<32x1xf32>
    %133 = vector.broadcast %132 : vector<32x1xf32> to vector<32x128xf32>
    %134 = arith.mulf %131, %133 : vector<32x128xf32>
    %c16_i32 = arith.constant 16 : i32
    %135 = tpu.dynamic_rotate %134 by %c16_i32 dim 1 : vector<32x128xf32>, i32 -> vector<32x128xf32>
    %136 = arith.addf %130, %135 : vector<32x128xf32>
    %c3_i32 = arith.constant 3 : i32
    %137 = tpu.dynamic_rotate %126 by %c3_i32 dim 0 : vector<32x128xf32>, i32 -> vector<32x128xf32>
    %138 = vector.extract_strided_slice %72 {offsets = [0, 2], sizes = [32, 1], strides = [1, 1]} : vector<32x9xf32> to vector<32x1xf32>
    %139 = vector.broadcast %138 : vector<32x1xf32> to vector<32x128xf32>
    %140 = arith.mulf %137, %139 : vector<32x128xf32>
    %c32_i32 = arith.constant 32 : i32
    %141 = tpu.dynamic_rotate %140 by %c32_i32 dim 1 : vector<32x128xf32>, i32 -> vector<32x128xf32>
    %142 = arith.addf %136, %141 : vector<32x128xf32>
    %c1_i32_45 = arith.constant 1 : i32
    %143 = tpu.dynamic_rotate %126 by %c1_i32_45 dim 0 : vector<32x128xf32>, i32 -> vector<32x128xf32>
    %144 = vector.extract_strided_slice %72 {offsets = [0, 3], sizes = [32, 1], strides = [1, 1]} : vector<32x9xf32> to vector<32x1xf32>
    %145 = vector.broadcast %144 : vector<32x1xf32> to vector<32x128xf32>
    %146 = arith.mulf %143, %145 : vector<32x128xf32>
    %c48_i32 = arith.constant 48 : i32
    %147 = tpu.dynamic_rotate %146 by %c48_i32 dim 1 : vector<32x128xf32>, i32 -> vector<32x128xf32>
    %148 = arith.addf %142, %147 : vector<32x128xf32>
    %c64_i32 = arith.constant 64 : i32
    %149 = tpu.dynamic_rotate %126 by %c64_i32 dim 1 : vector<32x128xf32>, i32 -> vector<32x128xf32>
    %150 = arith.addf %148, %149 : vector<32x128xf32>
    %c31_i32 = arith.constant 31 : i32
    %151 = tpu.dynamic_rotate %126 by %c31_i32 dim 0 : vector<32x128xf32>, i32 -> vector<32x128xf32>
    %152 = vector.extract_strided_slice %72 {offsets = [0, 5], sizes = [32, 1], strides = [1, 1]} : vector<32x9xf32> to vector<32x1xf32>
    %153 = vector.broadcast %152 : vector<32x1xf32> to vector<32x128xf32>
    %154 = arith.mulf %151, %153 : vector<32x128xf32>
    %c80_i32 = arith.constant 80 : i32
    %155 = tpu.dynamic_rotate %154 by %c80_i32 dim 1 : vector<32x128xf32>, i32 -> vector<32x128xf32>
    %156 = arith.addf %150, %155 : vector<32x128xf32>
    %c29_i32 = arith.constant 29 : i32
    %157 = tpu.dynamic_rotate %126 by %c29_i32 dim 0 : vector<32x128xf32>, i32 -> vector<32x128xf32>
    %158 = vector.extract_strided_slice %72 {offsets = [0, 6], sizes = [32, 1], strides = [1, 1]} : vector<32x9xf32> to vector<32x1xf32>
    %159 = vector.broadcast %158 : vector<32x1xf32> to vector<32x128xf32>
    %160 = arith.mulf %157, %159 : vector<32x128xf32>
    %c96_i32 = arith.constant 96 : i32
    %161 = tpu.dynamic_rotate %160 by %c96_i32 dim 1 : vector<32x128xf32>, i32 -> vector<32x128xf32>
    %162 = arith.addf %156, %161 : vector<32x128xf32>
    %c28_i32 = arith.constant 28 : i32
    %163 = tpu.dynamic_rotate %126 by %c28_i32 dim 0 : vector<32x128xf32>, i32 -> vector<32x128xf32>
    %164 = vector.extract_strided_slice %72 {offsets = [0, 7], sizes = [32, 1], strides = [1, 1]} : vector<32x9xf32> to vector<32x1xf32>
    %165 = vector.broadcast %164 : vector<32x1xf32> to vector<32x128xf32>
    %166 = arith.mulf %163, %165 : vector<32x128xf32>
    %c112_i32 = arith.constant 112 : i32
    %167 = tpu.dynamic_rotate %166 by %c112_i32 dim 1 : vector<32x128xf32>, i32 -> vector<32x128xf32>
    %168 = arith.addf %162, %167 : vector<32x128xf32>
    %c27_i32 = arith.constant 27 : i32
    %169 = tpu.dynamic_rotate %126 by %c27_i32 dim 0 : vector<32x128xf32>, i32 -> vector<32x128xf32>
    %170 = vector.extract_strided_slice %72 {offsets = [0, 8], sizes = [32, 1], strides = [1, 1]} : vector<32x9xf32> to vector<32x1xf32>
    %171 = vector.broadcast %170 : vector<32x1xf32> to vector<32x128xf32>
    %172 = arith.mulf %169, %171 : vector<32x128xf32>
    %173 = tpu.concatenate %168, %172 in 1 : vector<32x128xf32>, vector<32x128xf32> -> vector<32x256xf32>
    %174 = arith.truncf %173 : vector<32x256xf32> to vector<32x256xbf16>
    %cst_46 = arith.constant dense<0.000000e+00> : vector<32x128xf32>
    %175 = tpu.matmul %174, %78, %cst_46 {dimension_numbers = #tpu.dot_dimension_numbers<[1], [0], [0], [1], [0, 0, 1, 1], [], []>} : vector<32x256xbf16>, vector<256x128xbf16>, vector<32x128xf32> -> vector<32x128xf32>
    %176 = arith.addf %71, %175 : vector<32x128xf32>
    %c0_47 = arith.constant 0 : index
    %c0_48 = arith.constant 0 : index
    %177 = vector.load %arg13[%c0_47, %c0_48] : memref<1x128xf32, #tpu.memory_space<vmem>>, vector<1x128xf32>
    %c0_49 = arith.constant 0 : index
    %c0_50 = arith.constant 0 : index
    %178 = vector.load %arg14[%c0_49, %c0_50] : memref<1x128xf32, #tpu.memory_space<vmem>>, vector<1x128xf32>
    %c0_51 = arith.constant 0 : index
    %c0_52 = arith.constant 0 : index
    %179 = vector.load %arg15[%c0_51, %c0_52] : memref<128x128xbf16, #tpu.memory_space<vmem>>, vector<128x128xbf16>
    %c0_53 = arith.constant 0 : index
    %c0_54 = arith.constant 0 : index
    %180 = vector.load %arg16[%c0_53, %c0_54] : memref<1x128xf32, #tpu.memory_space<vmem>>, vector<1x128xf32>
    %c0_55 = arith.constant 0 : index
    %c0_56 = arith.constant 0 : index
    %181 = vector.load %arg17[%c0_55, %c0_56] : memref<1x128xf32, #tpu.memory_space<vmem>>, vector<1x128xf32>
    %c0_57 = arith.constant 0 : index
    %c0_58 = arith.constant 0 : index
    %182 = vector.load %arg18[%c0_57, %c0_58] : memref<256x128xbf16, #tpu.memory_space<vmem>>, vector<256x128xbf16>
    %cst_59 = arith.constant dense<0.000000e+00> : vector<128xf32>
    %183 = vector.multi_reduction <add>, %176, %cst_59 [0] : vector<32x128xf32> to vector<128xf32>
    %184 = vector.shape_cast %183 : vector<128xf32> to vector<1x128xf32>
    %cst_60 = arith.constant 3.200000e+01 : f32
    %185 = vector.broadcast %cst_60 : f32 to vector<1x128xf32>
    %186 = arith.divf %184, %185 : vector<1x128xf32>
    %187 = arith.mulf %176, %176 : vector<32x128xf32>
    %cst_61 = arith.constant dense<0.000000e+00> : vector<128xf32>
    %188 = vector.multi_reduction <add>, %187, %cst_61 [0] : vector<32x128xf32> to vector<128xf32>
    %189 = vector.shape_cast %188 : vector<128xf32> to vector<1x128xf32>
    %cst_62 = arith.constant 3.200000e+01 : f32
    %190 = vector.broadcast %cst_62 : f32 to vector<1x128xf32>
    %191 = arith.divf %189, %190 : vector<1x128xf32>
    %192 = arith.mulf %186, %186 : vector<1x128xf32>
    %193 = arith.subf %191, %192 : vector<1x128xf32>
    %cst_63 = arith.constant 9.99999974E-6 : f32
    %194 = vector.broadcast %cst_63 : f32 to vector<1x128xf32>
    %195 = arith.addf %193, %194 : vector<1x128xf32>
    %196 = math.rsqrt %195 : vector<1x128xf32>
    %197 = arith.mulf %177, %196 : vector<1x128xf32>
    %198 = arith.mulf %186, %197 : vector<1x128xf32>
    %199 = arith.subf %178, %198 : vector<1x128xf32>
    %200 = vector.broadcast %197 : vector<1x128xf32> to vector<32x128xf32>
    %201 = arith.mulf %176, %200 : vector<32x128xf32>
    %202 = vector.broadcast %199 : vector<1x128xf32> to vector<32x128xf32>
    %203 = arith.addf %201, %202 : vector<32x128xf32>
    %cst_64 = arith.constant 0.000000e+00 : f32
    %204 = vector.broadcast %cst_64 : f32 to vector<32x128xf32>
    %205 = arith.maximumf %203, %204 : vector<32x128xf32>
    %206 = arith.truncf %205 : vector<32x128xf32> to vector<32x128xbf16>
    %cst_65 = arith.constant dense<0.000000e+00> : vector<32x128xf32>
    %207 = tpu.matmul %206, %179, %cst_65 {dimension_numbers = #tpu.dot_dimension_numbers<[1], [0], [0], [1], [0, 0, 1, 1], [], []>} : vector<32x128xbf16>, vector<128x128xbf16>, vector<32x128xf32> -> vector<32x128xf32>
    %cst_66 = arith.constant dense<0.000000e+00> : vector<128xf32>
    %208 = vector.multi_reduction <add>, %207, %cst_66 [0] : vector<32x128xf32> to vector<128xf32>
    %209 = vector.shape_cast %208 : vector<128xf32> to vector<1x128xf32>
    %cst_67 = arith.constant 3.200000e+01 : f32
    %210 = vector.broadcast %cst_67 : f32 to vector<1x128xf32>
    %211 = arith.divf %209, %210 : vector<1x128xf32>
    %212 = arith.mulf %207, %207 : vector<32x128xf32>
    %cst_68 = arith.constant dense<0.000000e+00> : vector<128xf32>
    %213 = vector.multi_reduction <add>, %212, %cst_68 [0] : vector<32x128xf32> to vector<128xf32>
    %214 = vector.shape_cast %213 : vector<128xf32> to vector<1x128xf32>
    %cst_69 = arith.constant 3.200000e+01 : f32
    %215 = vector.broadcast %cst_69 : f32 to vector<1x128xf32>
    %216 = arith.divf %214, %215 : vector<1x128xf32>
    %217 = arith.mulf %211, %211 : vector<1x128xf32>
    %218 = arith.subf %216, %217 : vector<1x128xf32>
    %cst_70 = arith.constant 9.99999974E-6 : f32
    %219 = vector.broadcast %cst_70 : f32 to vector<1x128xf32>
    %220 = arith.addf %218, %219 : vector<1x128xf32>
    %221 = math.rsqrt %220 : vector<1x128xf32>
    %222 = arith.mulf %180, %221 : vector<1x128xf32>
    %223 = arith.mulf %211, %222 : vector<1x128xf32>
    %224 = arith.subf %181, %223 : vector<1x128xf32>
    %225 = vector.broadcast %222 : vector<1x128xf32> to vector<32x128xf32>
    %226 = arith.mulf %207, %225 : vector<32x128xf32>
    %227 = vector.broadcast %224 : vector<1x128xf32> to vector<32x128xf32>
    %228 = arith.addf %226, %227 : vector<32x128xf32>
    %cst_71 = arith.constant 0.000000e+00 : f32
    %229 = vector.broadcast %cst_71 : f32 to vector<32x128xf32>
    %230 = arith.maximumf %228, %229 : vector<32x128xf32>
    %c5_i32_72 = arith.constant 5 : i32
    %231 = tpu.dynamic_rotate %230 by %c5_i32_72 dim 0 : vector<32x128xf32>, i32 -> vector<32x128xf32>
    %232 = vector.extract_strided_slice %72 {offsets = [0, 0], sizes = [32, 1], strides = [1, 1]} : vector<32x9xf32> to vector<32x1xf32>
    %233 = vector.broadcast %232 : vector<32x1xf32> to vector<32x128xf32>
    %234 = arith.mulf %231, %233 : vector<32x128xf32>
    %c4_i32_73 = arith.constant 4 : i32
    %235 = tpu.dynamic_rotate %230 by %c4_i32_73 dim 0 : vector<32x128xf32>, i32 -> vector<32x128xf32>
    %236 = vector.extract_strided_slice %72 {offsets = [0, 1], sizes = [32, 1], strides = [1, 1]} : vector<32x9xf32> to vector<32x1xf32>
    %237 = vector.broadcast %236 : vector<32x1xf32> to vector<32x128xf32>
    %238 = arith.mulf %235, %237 : vector<32x128xf32>
    %c16_i32_74 = arith.constant 16 : i32
    %239 = tpu.dynamic_rotate %238 by %c16_i32_74 dim 1 : vector<32x128xf32>, i32 -> vector<32x128xf32>
    %240 = arith.addf %234, %239 : vector<32x128xf32>
    %c3_i32_75 = arith.constant 3 : i32
    %241 = tpu.dynamic_rotate %230 by %c3_i32_75 dim 0 : vector<32x128xf32>, i32 -> vector<32x128xf32>
    %242 = vector.extract_strided_slice %72 {offsets = [0, 2], sizes = [32, 1], strides = [1, 1]} : vector<32x9xf32> to vector<32x1xf32>
    %243 = vector.broadcast %242 : vector<32x1xf32> to vector<32x128xf32>
    %244 = arith.mulf %241, %243 : vector<32x128xf32>
    %c32_i32_76 = arith.constant 32 : i32
    %245 = tpu.dynamic_rotate %244 by %c32_i32_76 dim 1 : vector<32x128xf32>, i32 -> vector<32x128xf32>
    %246 = arith.addf %240, %245 : vector<32x128xf32>
    %c1_i32_77 = arith.constant 1 : i32
    %247 = tpu.dynamic_rotate %230 by %c1_i32_77 dim 0 : vector<32x128xf32>, i32 -> vector<32x128xf32>
    %248 = vector.extract_strided_slice %72 {offsets = [0, 3], sizes = [32, 1], strides = [1, 1]} : vector<32x9xf32> to vector<32x1xf32>
    %249 = vector.broadcast %248 : vector<32x1xf32> to vector<32x128xf32>
    %250 = arith.mulf %247, %249 : vector<32x128xf32>
    %c48_i32_78 = arith.constant 48 : i32
    %251 = tpu.dynamic_rotate %250 by %c48_i32_78 dim 1 : vector<32x128xf32>, i32 -> vector<32x128xf32>
    %252 = arith.addf %246, %251 : vector<32x128xf32>
    %c64_i32_79 = arith.constant 64 : i32
    %253 = tpu.dynamic_rotate %230 by %c64_i32_79 dim 1 : vector<32x128xf32>, i32 -> vector<32x128xf32>
    %254 = arith.addf %252, %253 : vector<32x128xf32>
    %c31_i32_80 = arith.constant 31 : i32
    %255 = tpu.dynamic_rotate %230 by %c31_i32_80 dim 0 : vector<32x128xf32>, i32 -> vector<32x128xf32>
    %256 = vector.extract_strided_slice %72 {offsets = [0, 5], sizes = [32, 1], strides = [1, 1]} : vector<32x9xf32> to vector<32x1xf32>
    %257 = vector.broadcast %256 : vector<32x1xf32> to vector<32x128xf32>
    %258 = arith.mulf %255, %257 : vector<32x128xf32>
    %c80_i32_81 = arith.constant 80 : i32
    %259 = tpu.dynamic_rotate %258 by %c80_i32_81 dim 1 : vector<32x128xf32>, i32 -> vector<32x128xf32>
    %260 = arith.addf %254, %259 : vector<32x128xf32>
    %c29_i32_82 = arith.constant 29 : i32
    %261 = tpu.dynamic_rotate %230 by %c29_i32_82 dim 0 : vector<32x128xf32>, i32 -> vector<32x128xf32>
    %262 = vector.extract_strided_slice %72 {offsets = [0, 6], sizes = [32, 1], strides = [1, 1]} : vector<32x9xf32> to vector<32x1xf32>
    %263 = vector.broadcast %262 : vector<32x1xf32> to vector<32x128xf32>
    %264 = arith.mulf %261, %263 : vector<32x128xf32>
    %c96_i32_83 = arith.constant 96 : i32
    %265 = tpu.dynamic_rotate %264 by %c96_i32_83 dim 1 : vector<32x128xf32>, i32 -> vector<32x128xf32>
    %266 = arith.addf %260, %265 : vector<32x128xf32>
    %c28_i32_84 = arith.constant 28 : i32
    %267 = tpu.dynamic_rotate %230 by %c28_i32_84 dim 0 : vector<32x128xf32>, i32 -> vector<32x128xf32>
    %268 = vector.extract_strided_slice %72 {offsets = [0, 7], sizes = [32, 1], strides = [1, 1]} : vector<32x9xf32> to vector<32x1xf32>
    %269 = vector.broadcast %268 : vector<32x1xf32> to vector<32x128xf32>
    %270 = arith.mulf %267, %269 : vector<32x128xf32>
    %c112_i32_85 = arith.constant 112 : i32
    %271 = tpu.dynamic_rotate %270 by %c112_i32_85 dim 1 : vector<32x128xf32>, i32 -> vector<32x128xf32>
    %272 = arith.addf %266, %271 : vector<32x128xf32>
    %c27_i32_86 = arith.constant 27 : i32
    %273 = tpu.dynamic_rotate %230 by %c27_i32_86 dim 0 : vector<32x128xf32>, i32 -> vector<32x128xf32>
    %274 = vector.extract_strided_slice %72 {offsets = [0, 8], sizes = [32, 1], strides = [1, 1]} : vector<32x9xf32> to vector<32x1xf32>
    %275 = vector.broadcast %274 : vector<32x1xf32> to vector<32x128xf32>
    %276 = arith.mulf %273, %275 : vector<32x128xf32>
    %277 = tpu.concatenate %272, %276 in 1 : vector<32x128xf32>, vector<32x128xf32> -> vector<32x256xf32>
    %278 = arith.truncf %277 : vector<32x256xf32> to vector<32x256xbf16>
    %cst_87 = arith.constant dense<0.000000e+00> : vector<32x128xf32>
    %279 = tpu.matmul %278, %182, %cst_87 {dimension_numbers = #tpu.dot_dimension_numbers<[1], [0], [0], [1], [0, 0, 1, 1], [], []>} : vector<32x256xbf16>, vector<256x128xbf16>, vector<32x128xf32> -> vector<32x128xf32>
    %280 = arith.addf %176, %279 : vector<32x128xf32>
    %c0_88 = arith.constant 0 : index
    %c0_89 = arith.constant 0 : index
    %281 = vector.load %arg19[%c0_88, %c0_89] : memref<1x128xf32, #tpu.memory_space<vmem>>, vector<1x128xf32>
    %c0_90 = arith.constant 0 : index
    %c0_91 = arith.constant 0 : index
    %282 = vector.load %arg20[%c0_90, %c0_91] : memref<1x128xf32, #tpu.memory_space<vmem>>, vector<1x128xf32>
    %cst_92 = arith.constant dense<0.000000e+00> : vector<128xf32>
    %283 = vector.multi_reduction <add>, %280, %cst_92 [0] : vector<32x128xf32> to vector<128xf32>
    %284 = vector.shape_cast %283 : vector<128xf32> to vector<1x128xf32>
    %cst_93 = arith.constant 3.200000e+01 : f32
    %285 = vector.broadcast %cst_93 : f32 to vector<1x128xf32>
    %286 = arith.divf %284, %285 : vector<1x128xf32>
    %287 = arith.mulf %280, %280 : vector<32x128xf32>
    %cst_94 = arith.constant dense<0.000000e+00> : vector<128xf32>
    %288 = vector.multi_reduction <add>, %287, %cst_94 [0] : vector<32x128xf32> to vector<128xf32>
    %289 = vector.shape_cast %288 : vector<128xf32> to vector<1x128xf32>
    %cst_95 = arith.constant 3.200000e+01 : f32
    %290 = vector.broadcast %cst_95 : f32 to vector<1x128xf32>
    %291 = arith.divf %289, %290 : vector<1x128xf32>
    %292 = arith.mulf %286, %286 : vector<1x128xf32>
    %293 = arith.subf %291, %292 : vector<1x128xf32>
    %cst_96 = arith.constant 9.99999974E-6 : f32
    %294 = vector.broadcast %cst_96 : f32 to vector<1x128xf32>
    %295 = arith.addf %293, %294 : vector<1x128xf32>
    %296 = math.rsqrt %295 : vector<1x128xf32>
    %297 = arith.mulf %281, %296 : vector<1x128xf32>
    %298 = arith.mulf %286, %297 : vector<1x128xf32>
    %299 = arith.subf %282, %298 : vector<1x128xf32>
    %300 = vector.broadcast %297 : vector<1x128xf32> to vector<32x128xf32>
    %301 = arith.mulf %280, %300 : vector<32x128xf32>
    %302 = vector.broadcast %299 : vector<1x128xf32> to vector<32x128xf32>
    %303 = arith.addf %301, %302 : vector<32x128xf32>
    %cst_97 = arith.constant 0.000000e+00 : f32
    %304 = vector.broadcast %cst_97 : f32 to vector<32x128xf32>
    %305 = arith.maximumf %303, %304 : vector<32x128xf32>
    %c0_98 = arith.constant 0 : index
    %c0_99 = arith.constant 0 : index
    %306 = vector.load %arg21[%c0_98, %c0_99] : memref<128x128xbf16, #tpu.memory_space<vmem>>, vector<128x128xbf16>
    %307 = arith.truncf %305 : vector<32x128xf32> to vector<32x128xbf16>
    %cst_100 = arith.constant dense<0.000000e+00> : vector<32x128xf32>
    %308 = tpu.matmul %307, %306, %cst_100 {dimension_numbers = #tpu.dot_dimension_numbers<[1], [0], [0], [1], [0, 0, 1, 1], [], []>} : vector<32x128xbf16>, vector<128x128xbf16>, vector<32x128xf32> -> vector<32x128xf32>
    %c0_101 = arith.constant 0 : index
    %c0_102 = arith.constant 0 : index
    %309 = vector.load %arg22[%c0_101, %c0_102] : memref<8x32xbf16, #tpu.memory_space<vmem>>, vector<8x32xbf16>
    %310 = arith.truncf %308 : vector<32x128xf32> to vector<32x128xbf16>
    %cst_103 = arith.constant dense<0.000000e+00> : vector<8x128xf32>
    %311 = tpu.matmul %309, %310, %cst_103 {dimension_numbers = #tpu.dot_dimension_numbers<[1], [0], [0], [1], [0, 0, 1, 1], [], []>} : vector<8x32xbf16>, vector<32x128xbf16>, vector<8x128xf32> -> vector<8x128xf32>
    %c0_104 = arith.constant 0 : index
    %c0_105 = arith.constant 0 : index
    %312 = vector.load %arg23[%c0_104, %c0_105] : memref<8x9xf32, #tpu.memory_space<vmem>>, vector<8x9xf32>
    %c0_106 = arith.constant 0 : index
    %c0_107 = arith.constant 0 : index
    %313 = vector.load %arg24[%c0_106, %c0_107] : memref<1x128xf32, #tpu.memory_space<vmem>>, vector<1x128xf32>
    %c0_108 = arith.constant 0 : index
    %c0_109 = arith.constant 0 : index
    %314 = vector.load %arg25[%c0_108, %c0_109] : memref<1x128xf32, #tpu.memory_space<vmem>>, vector<1x128xf32>
    %c0_110 = arith.constant 0 : index
    %c0_111 = arith.constant 0 : index
    %315 = vector.load %arg26[%c0_110, %c0_111] : memref<128x128xbf16, #tpu.memory_space<vmem>>, vector<128x128xbf16>
    %c0_112 = arith.constant 0 : index
    %c0_113 = arith.constant 0 : index
    %316 = vector.load %arg27[%c0_112, %c0_113] : memref<1x128xf32, #tpu.memory_space<vmem>>, vector<1x128xf32>
    %c0_114 = arith.constant 0 : index
    %c0_115 = arith.constant 0 : index
    %317 = vector.load %arg28[%c0_114, %c0_115] : memref<1x128xf32, #tpu.memory_space<vmem>>, vector<1x128xf32>
    %c0_116 = arith.constant 0 : index
    %c0_117 = arith.constant 0 : index
    %318 = vector.load %arg29[%c0_116, %c0_117] : memref<256x128xbf16, #tpu.memory_space<vmem>>, vector<256x128xbf16>
    %cst_118 = arith.constant dense<0.000000e+00> : vector<128xf32>
    %319 = vector.multi_reduction <add>, %311, %cst_118 [0] : vector<8x128xf32> to vector<128xf32>
    %320 = vector.shape_cast %319 : vector<128xf32> to vector<1x128xf32>
    %cst_119 = arith.constant 8.000000e+00 : f32
    %321 = vector.broadcast %cst_119 : f32 to vector<1x128xf32>
    %322 = arith.divf %320, %321 : vector<1x128xf32>
    %323 = arith.mulf %311, %311 : vector<8x128xf32>
    %cst_120 = arith.constant dense<0.000000e+00> : vector<128xf32>
    %324 = vector.multi_reduction <add>, %323, %cst_120 [0] : vector<8x128xf32> to vector<128xf32>
    %325 = vector.shape_cast %324 : vector<128xf32> to vector<1x128xf32>
    %cst_121 = arith.constant 8.000000e+00 : f32
    %326 = vector.broadcast %cst_121 : f32 to vector<1x128xf32>
    %327 = arith.divf %325, %326 : vector<1x128xf32>
    %328 = arith.mulf %322, %322 : vector<1x128xf32>
    %329 = arith.subf %327, %328 : vector<1x128xf32>
    %cst_122 = arith.constant 9.99999974E-6 : f32
    %330 = vector.broadcast %cst_122 : f32 to vector<1x128xf32>
    %331 = arith.addf %329, %330 : vector<1x128xf32>
    %332 = math.rsqrt %331 : vector<1x128xf32>
    %333 = arith.mulf %313, %332 : vector<1x128xf32>
    %334 = arith.mulf %322, %333 : vector<1x128xf32>
    %335 = arith.subf %314, %334 : vector<1x128xf32>
    %336 = vector.broadcast %333 : vector<1x128xf32> to vector<8x128xf32>
    %337 = arith.mulf %311, %336 : vector<8x128xf32>
    %338 = vector.broadcast %335 : vector<1x128xf32> to vector<8x128xf32>
    %339 = arith.addf %337, %338 : vector<8x128xf32>
    %cst_123 = arith.constant 0.000000e+00 : f32
    %340 = vector.broadcast %cst_123 : f32 to vector<8x128xf32>
    %341 = arith.maximumf %339, %340 : vector<8x128xf32>
    %342 = arith.truncf %341 : vector<8x128xf32> to vector<8x128xbf16>
    %cst_124 = arith.constant dense<0.000000e+00> : vector<8x128xf32>
    %343 = tpu.matmul %342, %315, %cst_124 {dimension_numbers = #tpu.dot_dimension_numbers<[1], [0], [0], [1], [0, 0, 1, 1], [], []>} : vector<8x128xbf16>, vector<128x128xbf16>, vector<8x128xf32> -> vector<8x128xf32>
    %cst_125 = arith.constant dense<0.000000e+00> : vector<128xf32>
    %344 = vector.multi_reduction <add>, %343, %cst_125 [0] : vector<8x128xf32> to vector<128xf32>
    %345 = vector.shape_cast %344 : vector<128xf32> to vector<1x128xf32>
    %cst_126 = arith.constant 8.000000e+00 : f32
    %346 = vector.broadcast %cst_126 : f32 to vector<1x128xf32>
    %347 = arith.divf %345, %346 : vector<1x128xf32>
    %348 = arith.mulf %343, %343 : vector<8x128xf32>
    %cst_127 = arith.constant dense<0.000000e+00> : vector<128xf32>
    %349 = vector.multi_reduction <add>, %348, %cst_127 [0] : vector<8x128xf32> to vector<128xf32>
    %350 = vector.shape_cast %349 : vector<128xf32> to vector<1x128xf32>
    %cst_128 = arith.constant 8.000000e+00 : f32
    %351 = vector.broadcast %cst_128 : f32 to vector<1x128xf32>
    %352 = arith.divf %350, %351 : vector<1x128xf32>
    %353 = arith.mulf %347, %347 : vector<1x128xf32>
    %354 = arith.subf %352, %353 : vector<1x128xf32>
    %cst_129 = arith.constant 9.99999974E-6 : f32
    %355 = vector.broadcast %cst_129 : f32 to vector<1x128xf32>
    %356 = arith.addf %354, %355 : vector<1x128xf32>
    %357 = math.rsqrt %356 : vector<1x128xf32>
    %358 = arith.mulf %316, %357 : vector<1x128xf32>
    %359 = arith.mulf %347, %358 : vector<1x128xf32>
    %360 = arith.subf %317, %359 : vector<1x128xf32>
    %361 = vector.broadcast %358 : vector<1x128xf32> to vector<8x128xf32>
    %362 = arith.mulf %343, %361 : vector<8x128xf32>
    %363 = vector.broadcast %360 : vector<1x128xf32> to vector<8x128xf32>
    %364 = arith.addf %362, %363 : vector<8x128xf32>
    %cst_130 = arith.constant 0.000000e+00 : f32
    %365 = vector.broadcast %cst_130 : f32 to vector<8x128xf32>
    %366 = arith.maximumf %364, %365 : vector<8x128xf32>
    %c3_i32_131 = arith.constant 3 : i32
    %367 = tpu.dynamic_rotate %366 by %c3_i32_131 dim 0 : vector<8x128xf32>, i32 -> vector<8x128xf32>
    %368 = vector.extract_strided_slice %312 {offsets = [0, 0], sizes = [8, 1], strides = [1, 1]} : vector<8x9xf32> to vector<8x1xf32>
    %369 = vector.broadcast %368 : vector<8x1xf32> to vector<8x128xf32>
    %370 = arith.mulf %367, %369 : vector<8x128xf32>
    %c2_i32 = arith.constant 2 : i32
    %371 = tpu.dynamic_rotate %366 by %c2_i32 dim 0 : vector<8x128xf32>, i32 -> vector<8x128xf32>
    %372 = vector.extract_strided_slice %312 {offsets = [0, 1], sizes = [8, 1], strides = [1, 1]} : vector<8x9xf32> to vector<8x1xf32>
    %373 = vector.broadcast %372 : vector<8x1xf32> to vector<8x128xf32>
    %374 = arith.mulf %371, %373 : vector<8x128xf32>
    %c16_i32_132 = arith.constant 16 : i32
    %375 = tpu.dynamic_rotate %374 by %c16_i32_132 dim 1 : vector<8x128xf32>, i32 -> vector<8x128xf32>
    %376 = arith.addf %370, %375 : vector<8x128xf32>
    %c1_i32_133 = arith.constant 1 : i32
    %377 = tpu.dynamic_rotate %366 by %c1_i32_133 dim 0 : vector<8x128xf32>, i32 -> vector<8x128xf32>
    %378 = vector.extract_strided_slice %312 {offsets = [0, 2], sizes = [8, 1], strides = [1, 1]} : vector<8x9xf32> to vector<8x1xf32>
    %379 = vector.broadcast %378 : vector<8x1xf32> to vector<8x128xf32>
    %380 = arith.mulf %377, %379 : vector<8x128xf32>
    %c32_i32_134 = arith.constant 32 : i32
    %381 = tpu.dynamic_rotate %380 by %c32_i32_134 dim 1 : vector<8x128xf32>, i32 -> vector<8x128xf32>
    %382 = arith.addf %376, %381 : vector<8x128xf32>
    %c1_i32_135 = arith.constant 1 : i32
    %383 = tpu.dynamic_rotate %366 by %c1_i32_135 dim 0 : vector<8x128xf32>, i32 -> vector<8x128xf32>
    %384 = vector.extract_strided_slice %312 {offsets = [0, 3], sizes = [8, 1], strides = [1, 1]} : vector<8x9xf32> to vector<8x1xf32>
    %385 = vector.broadcast %384 : vector<8x1xf32> to vector<8x128xf32>
    %386 = arith.mulf %383, %385 : vector<8x128xf32>
    %c48_i32_136 = arith.constant 48 : i32
    %387 = tpu.dynamic_rotate %386 by %c48_i32_136 dim 1 : vector<8x128xf32>, i32 -> vector<8x128xf32>
    %388 = arith.addf %382, %387 : vector<8x128xf32>
    %c64_i32_137 = arith.constant 64 : i32
    %389 = tpu.dynamic_rotate %366 by %c64_i32_137 dim 1 : vector<8x128xf32>, i32 -> vector<8x128xf32>
    %390 = arith.addf %388, %389 : vector<8x128xf32>
    %c7_i32_138 = arith.constant 7 : i32
    %391 = tpu.dynamic_rotate %366 by %c7_i32_138 dim 0 : vector<8x128xf32>, i32 -> vector<8x128xf32>
    %392 = vector.extract_strided_slice %312 {offsets = [0, 5], sizes = [8, 1], strides = [1, 1]} : vector<8x9xf32> to vector<8x1xf32>
    %393 = vector.broadcast %392 : vector<8x1xf32> to vector<8x128xf32>
    %394 = arith.mulf %391, %393 : vector<8x128xf32>
    %c80_i32_139 = arith.constant 80 : i32
    %395 = tpu.dynamic_rotate %394 by %c80_i32_139 dim 1 : vector<8x128xf32>, i32 -> vector<8x128xf32>
    %396 = arith.addf %390, %395 : vector<8x128xf32>
    %c7_i32_140 = arith.constant 7 : i32
    %397 = tpu.dynamic_rotate %366 by %c7_i32_140 dim 0 : vector<8x128xf32>, i32 -> vector<8x128xf32>
    %398 = vector.extract_strided_slice %312 {offsets = [0, 6], sizes = [8, 1], strides = [1, 1]} : vector<8x9xf32> to vector<8x1xf32>
    %399 = vector.broadcast %398 : vector<8x1xf32> to vector<8x128xf32>
    %400 = arith.mulf %397, %399 : vector<8x128xf32>
    %c96_i32_141 = arith.constant 96 : i32
    %401 = tpu.dynamic_rotate %400 by %c96_i32_141 dim 1 : vector<8x128xf32>, i32 -> vector<8x128xf32>
    %402 = arith.addf %396, %401 : vector<8x128xf32>
    %c6_i32 = arith.constant 6 : i32
    %403 = tpu.dynamic_rotate %366 by %c6_i32 dim 0 : vector<8x128xf32>, i32 -> vector<8x128xf32>
    %404 = vector.extract_strided_slice %312 {offsets = [0, 7], sizes = [8, 1], strides = [1, 1]} : vector<8x9xf32> to vector<8x1xf32>
    %405 = vector.broadcast %404 : vector<8x1xf32> to vector<8x128xf32>
    %406 = arith.mulf %403, %405 : vector<8x128xf32>
    %c112_i32_142 = arith.constant 112 : i32
    %407 = tpu.dynamic_rotate %406 by %c112_i32_142 dim 1 : vector<8x128xf32>, i32 -> vector<8x128xf32>
    %408 = arith.addf %402, %407 : vector<8x128xf32>
    %c5_i32_143 = arith.constant 5 : i32
    %409 = tpu.dynamic_rotate %366 by %c5_i32_143 dim 0 : vector<8x128xf32>, i32 -> vector<8x128xf32>
    %410 = vector.extract_strided_slice %312 {offsets = [0, 8], sizes = [8, 1], strides = [1, 1]} : vector<8x9xf32> to vector<8x1xf32>
    %411 = vector.broadcast %410 : vector<8x1xf32> to vector<8x128xf32>
    %412 = arith.mulf %409, %411 : vector<8x128xf32>
    %413 = tpu.concatenate %408, %412 in 1 : vector<8x128xf32>, vector<8x128xf32> -> vector<8x256xf32>
    %414 = arith.truncf %413 : vector<8x256xf32> to vector<8x256xbf16>
    %cst_144 = arith.constant dense<0.000000e+00> : vector<8x128xf32>
    %415 = tpu.matmul %414, %318, %cst_144 {dimension_numbers = #tpu.dot_dimension_numbers<[1], [0], [0], [1], [0, 0, 1, 1], [], []>} : vector<8x256xbf16>, vector<256x128xbf16>, vector<8x128xf32> -> vector<8x128xf32>
    %416 = arith.addf %311, %415 : vector<8x128xf32>
    %c0_145 = arith.constant 0 : index
    %c0_146 = arith.constant 0 : index
    %417 = vector.load %arg30[%c0_145, %c0_146] : memref<1x128xf32, #tpu.memory_space<vmem>>, vector<1x128xf32>
    %c0_147 = arith.constant 0 : index
    %c0_148 = arith.constant 0 : index
    %418 = vector.load %arg31[%c0_147, %c0_148] : memref<1x128xf32, #tpu.memory_space<vmem>>, vector<1x128xf32>
    %c0_149 = arith.constant 0 : index
    %c0_150 = arith.constant 0 : index
    %419 = vector.load %arg32[%c0_149, %c0_150] : memref<128x128xbf16, #tpu.memory_space<vmem>>, vector<128x128xbf16>
    %c0_151 = arith.constant 0 : index
    %c0_152 = arith.constant 0 : index
    %420 = vector.load %arg33[%c0_151, %c0_152] : memref<1x128xf32, #tpu.memory_space<vmem>>, vector<1x128xf32>
    %c0_153 = arith.constant 0 : index
    %c0_154 = arith.constant 0 : index
    %421 = vector.load %arg34[%c0_153, %c0_154] : memref<1x128xf32, #tpu.memory_space<vmem>>, vector<1x128xf32>
    %c0_155 = arith.constant 0 : index
    %c0_156 = arith.constant 0 : index
    %422 = vector.load %arg35[%c0_155, %c0_156] : memref<256x128xbf16, #tpu.memory_space<vmem>>, vector<256x128xbf16>
    %cst_157 = arith.constant dense<0.000000e+00> : vector<128xf32>
    %423 = vector.multi_reduction <add>, %416, %cst_157 [0] : vector<8x128xf32> to vector<128xf32>
    %424 = vector.shape_cast %423 : vector<128xf32> to vector<1x128xf32>
    %cst_158 = arith.constant 8.000000e+00 : f32
    %425 = vector.broadcast %cst_158 : f32 to vector<1x128xf32>
    %426 = arith.divf %424, %425 : vector<1x128xf32>
    %427 = arith.mulf %416, %416 : vector<8x128xf32>
    %cst_159 = arith.constant dense<0.000000e+00> : vector<128xf32>
    %428 = vector.multi_reduction <add>, %427, %cst_159 [0] : vector<8x128xf32> to vector<128xf32>
    %429 = vector.shape_cast %428 : vector<128xf32> to vector<1x128xf32>
    %cst_160 = arith.constant 8.000000e+00 : f32
    %430 = vector.broadcast %cst_160 : f32 to vector<1x128xf32>
    %431 = arith.divf %429, %430 : vector<1x128xf32>
    %432 = arith.mulf %426, %426 : vector<1x128xf32>
    %433 = arith.subf %431, %432 : vector<1x128xf32>
    %cst_161 = arith.constant 9.99999974E-6 : f32
    %434 = vector.broadcast %cst_161 : f32 to vector<1x128xf32>
    %435 = arith.addf %433, %434 : vector<1x128xf32>
    %436 = math.rsqrt %435 : vector<1x128xf32>
    %437 = arith.mulf %417, %436 : vector<1x128xf32>
    %438 = arith.mulf %426, %437 : vector<1x128xf32>
    %439 = arith.subf %418, %438 : vector<1x128xf32>
    %440 = vector.broadcast %437 : vector<1x128xf32> to vector<8x128xf32>
    %441 = arith.mulf %416, %440 : vector<8x128xf32>
    %442 = vector.broadcast %439 : vector<1x128xf32> to vector<8x128xf32>
    %443 = arith.addf %441, %442 : vector<8x128xf32>
    %cst_162 = arith.constant 0.000000e+00 : f32
    %444 = vector.broadcast %cst_162 : f32 to vector<8x128xf32>
    %445 = arith.maximumf %443, %444 : vector<8x128xf32>
    %446 = arith.truncf %445 : vector<8x128xf32> to vector<8x128xbf16>
    %cst_163 = arith.constant dense<0.000000e+00> : vector<8x128xf32>
    %447 = tpu.matmul %446, %419, %cst_163 {dimension_numbers = #tpu.dot_dimension_numbers<[1], [0], [0], [1], [0, 0, 1, 1], [], []>} : vector<8x128xbf16>, vector<128x128xbf16>, vector<8x128xf32> -> vector<8x128xf32>
    %cst_164 = arith.constant dense<0.000000e+00> : vector<128xf32>
    %448 = vector.multi_reduction <add>, %447, %cst_164 [0] : vector<8x128xf32> to vector<128xf32>
    %449 = vector.shape_cast %448 : vector<128xf32> to vector<1x128xf32>
    %cst_165 = arith.constant 8.000000e+00 : f32
    %450 = vector.broadcast %cst_165 : f32 to vector<1x128xf32>
    %451 = arith.divf %449, %450 : vector<1x128xf32>
    %452 = arith.mulf %447, %447 : vector<8x128xf32>
    %cst_166 = arith.constant dense<0.000000e+00> : vector<128xf32>
    %453 = vector.multi_reduction <add>, %452, %cst_166 [0] : vector<8x128xf32> to vector<128xf32>
    %454 = vector.shape_cast %453 : vector<128xf32> to vector<1x128xf32>
    %cst_167 = arith.constant 8.000000e+00 : f32
    %455 = vector.broadcast %cst_167 : f32 to vector<1x128xf32>
    %456 = arith.divf %454, %455 : vector<1x128xf32>
    %457 = arith.mulf %451, %451 : vector<1x128xf32>
    %458 = arith.subf %456, %457 : vector<1x128xf32>
    %cst_168 = arith.constant 9.99999974E-6 : f32
    %459 = vector.broadcast %cst_168 : f32 to vector<1x128xf32>
    %460 = arith.addf %458, %459 : vector<1x128xf32>
    %461 = math.rsqrt %460 : vector<1x128xf32>
    %462 = arith.mulf %420, %461 : vector<1x128xf32>
    %463 = arith.mulf %451, %462 : vector<1x128xf32>
    %464 = arith.subf %421, %463 : vector<1x128xf32>
    %465 = vector.broadcast %462 : vector<1x128xf32> to vector<8x128xf32>
    %466 = arith.mulf %447, %465 : vector<8x128xf32>
    %467 = vector.broadcast %464 : vector<1x128xf32> to vector<8x128xf32>
    %468 = arith.addf %466, %467 : vector<8x128xf32>
    %cst_169 = arith.constant 0.000000e+00 : f32
    %469 = vector.broadcast %cst_169 : f32 to vector<8x128xf32>
    %470 = arith.maximumf %468, %469 : vector<8x128xf32>
    %c3_i32_170 = arith.constant 3 : i32
    %471 = tpu.dynamic_rotate %470 by %c3_i32_170 dim 0 : vector<8x128xf32>, i32 -> vector<8x128xf32>
    %472 = vector.extract_strided_slice %312 {offsets = [0, 0], sizes = [8, 1], strides = [1, 1]} : vector<8x9xf32> to vector<8x1xf32>
    %473 = vector.broadcast %472 : vector<8x1xf32> to vector<8x128xf32>
    %474 = arith.mulf %471, %473 : vector<8x128xf32>
    %c2_i32_171 = arith.constant 2 : i32
    %475 = tpu.dynamic_rotate %470 by %c2_i32_171 dim 0 : vector<8x128xf32>, i32 -> vector<8x128xf32>
    %476 = vector.extract_strided_slice %312 {offsets = [0, 1], sizes = [8, 1], strides = [1, 1]} : vector<8x9xf32> to vector<8x1xf32>
    %477 = vector.broadcast %476 : vector<8x1xf32> to vector<8x128xf32>
    %478 = arith.mulf %475, %477 : vector<8x128xf32>
    %c16_i32_172 = arith.constant 16 : i32
    %479 = tpu.dynamic_rotate %478 by %c16_i32_172 dim 1 : vector<8x128xf32>, i32 -> vector<8x128xf32>
    %480 = arith.addf %474, %479 : vector<8x128xf32>
    %c1_i32_173 = arith.constant 1 : i32
    %481 = tpu.dynamic_rotate %470 by %c1_i32_173 dim 0 : vector<8x128xf32>, i32 -> vector<8x128xf32>
    %482 = vector.extract_strided_slice %312 {offsets = [0, 2], sizes = [8, 1], strides = [1, 1]} : vector<8x9xf32> to vector<8x1xf32>
    %483 = vector.broadcast %482 : vector<8x1xf32> to vector<8x128xf32>
    %484 = arith.mulf %481, %483 : vector<8x128xf32>
    %c32_i32_174 = arith.constant 32 : i32
    %485 = tpu.dynamic_rotate %484 by %c32_i32_174 dim 1 : vector<8x128xf32>, i32 -> vector<8x128xf32>
    %486 = arith.addf %480, %485 : vector<8x128xf32>
    %c1_i32_175 = arith.constant 1 : i32
    %487 = tpu.dynamic_rotate %470 by %c1_i32_175 dim 0 : vector<8x128xf32>, i32 -> vector<8x128xf32>
    %488 = vector.extract_strided_slice %312 {offsets = [0, 3], sizes = [8, 1], strides = [1, 1]} : vector<8x9xf32> to vector<8x1xf32>
    %489 = vector.broadcast %488 : vector<8x1xf32> to vector<8x128xf32>
    %490 = arith.mulf %487, %489 : vector<8x128xf32>
    %c48_i32_176 = arith.constant 48 : i32
    %491 = tpu.dynamic_rotate %490 by %c48_i32_176 dim 1 : vector<8x128xf32>, i32 -> vector<8x128xf32>
    %492 = arith.addf %486, %491 : vector<8x128xf32>
    %c64_i32_177 = arith.constant 64 : i32
    %493 = tpu.dynamic_rotate %470 by %c64_i32_177 dim 1 : vector<8x128xf32>, i32 -> vector<8x128xf32>
    %494 = arith.addf %492, %493 : vector<8x128xf32>
    %c7_i32_178 = arith.constant 7 : i32
    %495 = tpu.dynamic_rotate %470 by %c7_i32_178 dim 0 : vector<8x128xf32>, i32 -> vector<8x128xf32>
    %496 = vector.extract_strided_slice %312 {offsets = [0, 5], sizes = [8, 1], strides = [1, 1]} : vector<8x9xf32> to vector<8x1xf32>
    %497 = vector.broadcast %496 : vector<8x1xf32> to vector<8x128xf32>
    %498 = arith.mulf %495, %497 : vector<8x128xf32>
    %c80_i32_179 = arith.constant 80 : i32
    %499 = tpu.dynamic_rotate %498 by %c80_i32_179 dim 1 : vector<8x128xf32>, i32 -> vector<8x128xf32>
    %500 = arith.addf %494, %499 : vector<8x128xf32>
    %c7_i32_180 = arith.constant 7 : i32
    %501 = tpu.dynamic_rotate %470 by %c7_i32_180 dim 0 : vector<8x128xf32>, i32 -> vector<8x128xf32>
    %502 = vector.extract_strided_slice %312 {offsets = [0, 6], sizes = [8, 1], strides = [1, 1]} : vector<8x9xf32> to vector<8x1xf32>
    %503 = vector.broadcast %502 : vector<8x1xf32> to vector<8x128xf32>
    %504 = arith.mulf %501, %503 : vector<8x128xf32>
    %c96_i32_181 = arith.constant 96 : i32
    %505 = tpu.dynamic_rotate %504 by %c96_i32_181 dim 1 : vector<8x128xf32>, i32 -> vector<8x128xf32>
    %506 = arith.addf %500, %505 : vector<8x128xf32>
    %c6_i32_182 = arith.constant 6 : i32
    %507 = tpu.dynamic_rotate %470 by %c6_i32_182 dim 0 : vector<8x128xf32>, i32 -> vector<8x128xf32>
    %508 = vector.extract_strided_slice %312 {offsets = [0, 7], sizes = [8, 1], strides = [1, 1]} : vector<8x9xf32> to vector<8x1xf32>
    %509 = vector.broadcast %508 : vector<8x1xf32> to vector<8x128xf32>
    %510 = arith.mulf %507, %509 : vector<8x128xf32>
    %c112_i32_183 = arith.constant 112 : i32
    %511 = tpu.dynamic_rotate %510 by %c112_i32_183 dim 1 : vector<8x128xf32>, i32 -> vector<8x128xf32>
    %512 = arith.addf %506, %511 : vector<8x128xf32>
    %c5_i32_184 = arith.constant 5 : i32
    %513 = tpu.dynamic_rotate %470 by %c5_i32_184 dim 0 : vector<8x128xf32>, i32 -> vector<8x128xf32>
    %514 = vector.extract_strided_slice %312 {offsets = [0, 8], sizes = [8, 1], strides = [1, 1]} : vector<8x9xf32> to vector<8x1xf32>
    %515 = vector.broadcast %514 : vector<8x1xf32> to vector<8x128xf32>
    %516 = arith.mulf %513, %515 : vector<8x128xf32>
    %517 = tpu.concatenate %512, %516 in 1 : vector<8x128xf32>, vector<8x128xf32> -> vector<8x256xf32>
    %518 = arith.truncf %517 : vector<8x256xf32> to vector<8x256xbf16>
    %cst_185 = arith.constant dense<0.000000e+00> : vector<8x128xf32>
    %519 = tpu.matmul %518, %422, %cst_185 {dimension_numbers = #tpu.dot_dimension_numbers<[1], [0], [0], [1], [0, 0, 1, 1], [], []>} : vector<8x256xbf16>, vector<256x128xbf16>, vector<8x128xf32> -> vector<8x128xf32>
    %520 = arith.addf %416, %519 : vector<8x128xf32>
    %c0_186 = arith.constant 0 : index
    %c0_187 = arith.constant 0 : index
    %521 = vector.load %arg36[%c0_186, %c0_187] : memref<1x128xf32, #tpu.memory_space<vmem>>, vector<1x128xf32>
    %c0_188 = arith.constant 0 : index
    %c0_189 = arith.constant 0 : index
    %522 = vector.load %arg37[%c0_188, %c0_189] : memref<1x128xf32, #tpu.memory_space<vmem>>, vector<1x128xf32>
    %cst_190 = arith.constant dense<0.000000e+00> : vector<128xf32>
    %523 = vector.multi_reduction <add>, %520, %cst_190 [0] : vector<8x128xf32> to vector<128xf32>
    %524 = vector.shape_cast %523 : vector<128xf32> to vector<1x128xf32>
    %cst_191 = arith.constant 8.000000e+00 : f32
    %525 = vector.broadcast %cst_191 : f32 to vector<1x128xf32>
    %526 = arith.divf %524, %525 : vector<1x128xf32>
    %527 = arith.mulf %520, %520 : vector<8x128xf32>
    %cst_192 = arith.constant dense<0.000000e+00> : vector<128xf32>
    %528 = vector.multi_reduction <add>, %527, %cst_192 [0] : vector<8x128xf32> to vector<128xf32>
    %529 = vector.shape_cast %528 : vector<128xf32> to vector<1x128xf32>
    %cst_193 = arith.constant 8.000000e+00 : f32
    %530 = vector.broadcast %cst_193 : f32 to vector<1x128xf32>
    %531 = arith.divf %529, %530 : vector<1x128xf32>
    %532 = arith.mulf %526, %526 : vector<1x128xf32>
    %533 = arith.subf %531, %532 : vector<1x128xf32>
    %cst_194 = arith.constant 9.99999974E-6 : f32
    %534 = vector.broadcast %cst_194 : f32 to vector<1x128xf32>
    %535 = arith.addf %533, %534 : vector<1x128xf32>
    %536 = math.rsqrt %535 : vector<1x128xf32>
    %537 = arith.mulf %521, %536 : vector<1x128xf32>
    %538 = arith.mulf %526, %537 : vector<1x128xf32>
    %539 = arith.subf %522, %538 : vector<1x128xf32>
    %540 = vector.broadcast %537 : vector<1x128xf32> to vector<8x128xf32>
    %541 = arith.mulf %520, %540 : vector<8x128xf32>
    %542 = vector.broadcast %539 : vector<1x128xf32> to vector<8x128xf32>
    %543 = arith.addf %541, %542 : vector<8x128xf32>
    %cst_195 = arith.constant 0.000000e+00 : f32
    %544 = vector.broadcast %cst_195 : f32 to vector<8x128xf32>
    %545 = arith.maximumf %543, %544 : vector<8x128xf32>
    %c0_196 = arith.constant 0 : index
    %c0_197 = arith.constant 0 : index
    %546 = vector.load %arg38[%c0_196, %c0_197] : memref<8x8xbf16, #tpu.memory_space<vmem>>, vector<8x8xbf16>
    %547 = arith.truncf %545 : vector<8x128xf32> to vector<8x128xbf16>
    %cst_198 = arith.constant dense<0.000000e+00> : vector<8x128xf32>
    %548 = tpu.matmul %546, %547, %cst_198 {dimension_numbers = #tpu.dot_dimension_numbers<[1], [0], [0], [1], [0, 0, 1, 1], [], []>} : vector<8x8xbf16>, vector<8x128xbf16>, vector<8x128xf32> -> vector<8x128xf32>
    %c0_199 = arith.constant 0 : index
    %c0_200 = arith.constant 0 : index
    %549 = vector.load %arg39[%c0_199, %c0_200] : memref<128x128xbf16, #tpu.memory_space<vmem>>, vector<128x128xbf16>
    %550 = arith.truncf %548 : vector<8x128xf32> to vector<8x128xbf16>
    %cst_201 = arith.constant dense<0.000000e+00> : vector<8x128xf32>
    %551 = tpu.matmul %550, %549, %cst_201 {dimension_numbers = #tpu.dot_dimension_numbers<[1], [0], [0], [1], [0, 0, 1, 1], [], []>} : vector<8x128xbf16>, vector<128x128xbf16>, vector<8x128xf32> -> vector<8x128xf32>
    %c0_202 = arith.constant 0 : index
    %c0_203 = arith.constant 0 : index
    %552 = vector.load %arg40[%c0_202, %c0_203] : memref<1x128xf32, #tpu.memory_space<vmem>>, vector<1x128xf32>
    %553 = vector.broadcast %552 : vector<1x128xf32> to vector<8x128xf32>
    %554 = arith.addf %551, %553 : vector<8x128xf32>
    %c0_204 = arith.constant 0 : index
    %c0_205 = arith.constant 0 : index
    %555 = vector.load %arg41[%c0_204, %c0_205] : memref<8x128xf32, #tpu.memory_space<vmem>>, vector<8x128xf32>
    tpu.vector_store %arg41[%c0_204, %c0_205], %554 {strides = array<i32>} : memref<8x128xf32, #tpu.memory_space<vmem>>, vector<8x128xf32>,
    return
  }
}

</mosaic_0001>

<bundles_post_ra>
// kernel: _lambda_.1
= control target key start
LH: loop header
LB: loop body
LE: loop exit
PB: predicated region body
PF: predicated region fallthrough
CT: control target
= control target key end

     0   :  { %v7245_v0 = vmov 1   ;;  %s4999_s3 = smov 4   ;;  %s5000_s7 = smov 1   ;;  %v7251_v1 = vmov 8   ;;  %v7249_v11 = vmov 0   ;;  %v7247_v16 = vmov 2   ;;  %s7240_s0 = inlined_call_operand.smem [shape: u32[42], index: -1, kind: input, shape index: {}] }
   0x1   :  { %4717 = vset.pattern.permute.xlu1 %v7245_v0  ;;  %s5063_s6 = sld [smem:[%s7240_s0 + %s4999_s3]]   ;;  %4736 = vset.pattern.permute.xlu0 %v7251_v1  ;;  %v7253_v22 = vmov 3   ;;  %v7243_v35 = vmov 5   ;;  %v7255_v43 = vmov 6   ;;  %v7241_v52 = vmov 7   ;;  %s5008_s14 = smov 2  }
   0x2   :  { %s5068_s10 = sld [smem:[%s7240_s0 + %s5000_s7]]   ;;  %s5009_s18 = smov 3   ;;  %vm5034_vm5 = vmmov 0   ;;  %vm3018_vm6 = vcmask 261120   ;;  %vm3920_vm7 = vcmask 1043456   ;;  %vm3916_vm8 = vcmask 64512  }
   0x3   :  { %s5098_s13 = sld [smem:[%s7240_s0]]   ;;  %s5010_s22 = smov 5  }
   0x4   :  { %s4082_s17 = sld [smem:[%s7240_s0 + %s5008_s14]]   ;;  %s5011_s26 = smov 9  }
   0x5   :  { %s4083_s21 = sld [smem:[%s7240_s0 + %s5009_s18]]   ;;  %s5012_s30 = smov 6  }
   0x6   :  { %s6109_s25 = sld [smem:[%s7240_s0 + %s5010_s22]]   ;;  %s5013_s4 = smov 7  }
   0x7   :  { %v5072_v2 = vld [vmem:[%s5063_s6] sm:$0xff]  ;;  %v5078_v5 = vld [vmem:[%s5063_s6 + $0x8] sm:$0xff]  ;;  %v5086_v9 = vld [vmem:[%s5063_s6 + $0x18] sm:$0xff]  ;;  %s6316_s29 = sld [smem:[%s7240_s0 + %s5011_s26]]   ;;  %s5014_s8 = smov 8  }
   0x8   :  { %786 = vperm.xlu1 %4717, %v5072_v2   ;;  %v4819_v3 = vld [vmem:[%s5068_s10 + $0x40] sm:$0xff]   ;;  %v4821_v6 = vld [vmem:[%s5068_s10 + $0x48] sm:$0xff]   ;;  %1399 = vperm.xlu0 %4736, %v5078_v5   ;;  %v4823_v8 = vld [vmem:[%s5068_s10 + $0x50] sm:$0xff]   ;;  %s4086_s3 = sld [smem:[%s7240_s0 + %s5012_s30]]   ;;  %s5015_s12 = smov 32  }
   0x9   :  { %v4820_v4 = vld [vmem:[%s5068_s10] sm:$0xff]   ;;  %4271 = vmatprep.subr.bf16.mxu0 %v4819_v3  ;;  %v4822_v7 = vld [vmem:[%s5068_s10 + $0x8] sm:$0xff]   ;;  %v4824_v10 = vld [vmem:[%s5068_s10 + $0x10] sm:$0xff]   ;;  %s4087_s7 = sld [smem:[%s7240_s0 + %s5013_s4]]   ;;  %s5016_s16 = smov 12  }
   0xa   :  { %4272 = vmatpush3.bf16.msra.mxu0 %v4820_v4  ;;  %v4825_v12 = vld [vmem:[%s5068_s10 + $0x58] sm:$0xff]   ;;  %v5093_v13 = vld [vmem:[%s5063_s6 + $0x10] sm:$0xff]  ;;  %v4827_v15 = vld [vmem:[%s5068_s10 + $0x60] sm:$0xff]   ;;  %s4088_s11 = sld [smem:[%s7240_s0 + %s5014_s8]]   ;;  %s5017_s20 = smov 10  }
   0xb   :  { %4273 = vmatprep.subr.bf16.mxu0 %v4821_v6  ;;  %v4826_v14 = vld [vmem:[%s5068_s10 + $0x18] sm:$0xff]   ;;  %v4828_v17 = vld [vmem:[%s5068_s10 + $0x20] sm:$0xff]   ;;  %v4829_v18 = vld [vmem:[%s5068_s10 + $0x68] sm:$0xff]   ;;  %s6426_s15 = sld [smem:[%s7240_s0 + %s5015_s12]]   ;;  %s5018_s24 = smov 11  }
   0xc   :  { %790 = vperm.xlu1 %4717, %v5078_v5   ;;  %1403 = vperm.xlu0 %4736, %v5093_v13   ;;  %v4837_v19 = vld [vmem:[%s5098_s13 + $0x4] ss:$8 sps:$4 sm:$0xff]   ;;  %v4831_v21 = vld [vmem:[%s5068_s10 + $0x70] sm:$0xff]   ;;  %v4833_v24 = vld [vmem:[%s5068_s10 + $0x78] sm:$0xff]   ;;  %s6443_s19 = sld [smem:[%s7240_s0 + %s5016_s16]]   ;;  %s5019_s28 = smov 64  }
   0xd   :  { %v4830_v20 = vld [vmem:[%s5068_s10 + $0x28] sm:$0xff]   ;;  %427 = vmatprep.mubr.bf16.mxu0 %v4837_v19  ;;  %v4832_v23 = vld [vmem:[%s5068_s10 + $0x30] sm:$0xff]   ;;  %v4834_v25 = vld [vmem:[%s5068_s10 + $0x38] sm:$0xff]   ;;  %s4090_s23 = sld [smem:[%s7240_s0 + %s5017_s20]]   ;;  %s5021_s30 = smov 48  }
   0xe   :  { %4274 = vmatpush3.bf16.msra.mxu0 %v4822_v7  ;;  %v5123_v26 = vld [vmem:[%s5063_s6 + $0x20] sm:$0xff]  ;;  %v5127_v27 = vld [vmem:[%s5063_s6 + $0x28] sm:$0xff]  ;;  %v4838_v29 = vld [vmem:[%s5098_s13 + $0x14] ss:$8 sps:$4 sm:$0xff]   ;;  %s4091_s27 = sld [smem:[%s7240_s0 + %s5018_s24]]   ;;  %s5022_s1 = smov 80  }
   0xf   :  { %4275 = vmatprep.subr.bf16.mxu0 %v4823_v8  ;;  %v4835_v28 = vld [vmem:[%s5098_s13] ss:$8 sps:$4 sm:$0xff]   ;;  %v5133_v30 = vld [vmem:[%s5063_s6 + $0x30] sm:$0xff]  ;;  %v5138_v31 = vld [vmem:[%s5063_s6 + $0x58] sm:$0xff]  ;;  %s5023_s2 = smov 96   ;;  %s5025_s4 = smov 15  }
  0x10   :  { %4718 = vset.pattern.permute.xlu1 %v7249_v11  ;;  %4744 = vset.pattern.permute.xlu0 %v7249_v11  ;;  %v4840_v32 = vld [vmem:[%s5098_s13 + $0x10] ss:$8 sps:$4 sm:$0xff]   ;;  %v5145_v33 = vld [vmem:[%s5063_s6 + $0x60] sm:$0xff]  ;;  %v4844_v37 = vld [vmem:[%s5098_s13 + $0x34] ss:$8 sps:$4 sm:$0xff]   ;;  %s5026_s8 = smov 13  }
  0x11   :  { %690 = vperm.xlu1 %4718, %v5086_v9   ;;  %675 = vperm.xlu0 %4744, %v5072_v2   ;;  %v4841_v34 = vld [vmem:[%s5098_s13 + $0x24] ss:$8 sps:$4 sm:$0xff]   ;;  %v4843_v36 = vld [vmem:[%s5098_s13 + $0x20] ss:$8 sps:$4 sm:$0xff]   ;;  %v5160_v38 = vld [vmem:[%s5063_s6 + $0x38] sm:$0xff]  ;;  %s5030_s5 = smov 21  }
  0x12   :  { %4276 = vmatpush3.bf16.msra.mxu0 %v4824_v10  ;;  %v4846_v39 = vld [vmem:[%s5098_s13 + $0x30] ss:$8 sps:$4 sm:$0xff]   ;;  %v4847_v40 = vld [vmem:[%s5098_s13 + $0x44] ss:$8 sps:$4 sm:$0xff]   ;;  %v4849_v44 = vld [vmem:[%s5098_s13 + $0x40] ss:$8 sps:$4 sm:$0xff]  }
  0x13   :  { %4277 = vmatprep.subr.bf16.mxu0 %v4825_v12  ;;  %v5168_v41 = vld [vmem:[%s5063_s6 + $0x40] sm:$0xff]  ;;  %v5172_v42 = vld [vmem:[%s5063_s6 + $0x68] sm:$0xff]  ;;  %v4850_v45 = vld [vmem:[%s5098_s13 + $0x54] ss:$8 sps:$4 sm:$0xff]   ;;  %s5031_s9 = smov 19   ;;  %s5032_s14 = smov 20  }
  0x14   :  { %v5180_v46 = vld [vmem:[%s5063_s6 + $0x70] sm:$0xff]  ;;  %v4853_v48 = vld [vmem:[%s5098_s13 + $0x64] ss:$8 sps:$4 sm:$0xff]   ;;  %v4855_v49 = vld [vmem:[%s5098_s13 + $0x60] ss:$8 sps:$4 sm:$0xff]   ;;  %s4100_s18 = sld [smem:[%s7240_s0 + %s5032_s14]]  }
  0x15   :  { %4719 = vset.pattern.permute.xlu1 %v7247_v16  ;;  %680 = vperm.xlu0 %4744, %v5078_v5   ;;  %v4852_v47 = vld [vmem:[%s5098_s13 + $0x50] ss:$8 sps:$4 sm:$0xff]   ;;  %v4856_v50 = vld [vmem:[%s5098_s13 + $0x74] ss:$8 sps:$4 sm:$0xff]   ;;  %v5231_v55 = vld [vmem:[%s5063_s6 + $0x48] sm:$0xff] }
  0x16   :  { %919 = vperm.xlu1 %4719, %v5078_v5   ;;  %4278 = vmatpush3.bf16.msra.mxu0 %v4826_v14  ;;  %v4858_v51 = vld [vmem:[%s5098_s13 + $0x70] ss:$8 sps:$4 sm:$0xff]   ;;  %s5027_s13 = smov 14  }
  0x17   :  { %4279 = vmatprep.subr.bf16.mxu0 %v4827_v15  ;;  %v5206_v53 = vld [vmem:[%s5063_s6 + $0x78] sm:$0xff]  ;;  %v5221_v54 = vld [vmem:[%s5063_s6 + $0x50] sm:$0xff] }
  0x19   :  { %685 = vperm.xlu0 %4744, %v5093_v13  }
  0x1a   :  { %4720 = vset.pattern.permute.xlu1 %v7245_v0  ;;  %4280 = vmatpush3.bf16.msra.mxu0 %v4828_v17 }
  0x1b   :  { %794 = vperm.xlu1 %4720, %v5093_v13   ;;  %4281 = vmatprep.subr.bf16.mxu0 %v4829_v18 }
  0x1d   :  { %695 = vperm.xlu0 %4744, %v5123_v26  }
  0x1e   :  { %4282 = vmatpush3.bf16.msra.mxu0 %v4830_v20 }
  0x1f   :  { %4721 = vset.pattern.permute.xlu1 %v7253_v22  ;;  %4283 = vmatprep.subr.bf16.mxu0 %v4831_v21 }
  0x20   :  { %1011 = vperm.xlu1 %4721, %v5072_v2  }
  0x21   :  { %705 = vperm.xlu0 %4744, %v5133_v30  }
  0x22   :  { %4284 = vmatpush3.bf16.msra.mxu0 %v4832_v23 }
  0x23   :  { %4285 = vmatprep.subr.bf16.mxu0 %v4833_v24 }
  0x24   :  { %1015 = vperm.xlu1 %4721, %v5078_v5  }
  0x25   :  { %730 = vperm.xlu0 %4744, %v5138_v31  }
  0x26   :  { %4286 = vmatpush3.bf16.msra.mxu0 %v4834_v25 }
  0x28   :  { %4722 = vset.pattern.permute.xlu1 %v7249_v11 }
  0x29   :  { %700 = vperm.xlu1 %4722, %v5127_v27   ;;  %428 = vmatmul.mubr.bf16.vlgmr.msra.gmra.mrb[0].mxu0 %v4835_v28 }
  0x2a   :  { %435 = vmatprep.mubr.bf16.mxu0 %v4838_v29  ;;  %735 = vperm.xlu0 %4744, %v5145_v33  }
  0x2d   :  { %4723 = vset.pattern.permute.xlu1 %v7247_v16 }
  0x2e   :  { %923 = vperm.xlu1 %4723, %v5093_v13   ;;  %4754 = vset.pattern.permute.xlu0 %v7245_v0 }
  0x2f   :  { %798 = vperm.xlu0 %4754, %v5086_v9  }
  0x31   :  { %436 = vmatmul.mubr.bf16.gmra.mrb[4].mxu0 %v4840_v32 }
  0x32   :  { %4724 = vset.pattern.permute.xlu1 %v7243_v35  ;;  %443 = vmatprep.mubr.bf16.mxu0 %v4841_v34 }
  0x33   :  { %1107 = vperm.xlu1 %4724, %v5072_v2   ;;  %802 = vperm.xlu0 %4754, %v5123_v26  }
  0x37   :  { %1111 = vperm.xlu1 %4724, %v5078_v5   ;;  %814 = vperm.xlu0 %4754, %v5160_v38  }
  0x39   :  { %444 = vmatmul.mubr.bf16.gmra.mrb[8].mxu0 %v4843_v36 }
  0x3a   :  { %451 = vmatprep.mubr.bf16.mxu0 %v4844_v37 }
  0x3b   :  { %4725 = vset.pattern.permute.xlu1 %v7245_v0  ;;  %818 = vperm.xlu0 %4754, %v5168_v41  }
  0x3c   :  { %806 = vperm.xlu1 %4725, %v5127_v27  }
  0x3f   :  { %838 = vperm.xlu0 %4754, %v5172_v42  }
  0x40   :  { %4726 = vset.pattern.permute.xlu1 %v7253_v22 }
  0x41   :  { %1019 = vperm.xlu1 %4726, %v5093_v13   ;;  %452 = vmatmul.mubr.bf16.gmra.mrb[12].mxu0 %v4846_v39 }
  0x42   :  { %459 = vmatprep.mubr.bf16.mxu0 %v4847_v40 }
  0x43   :  { %842 = vperm.xlu0 %4754, %v5180_v46  }
  0x45   :  { %4727 = vset.pattern.permute.xlu1 %v7255_v43 }
  0x46   :  { %1203 = vperm.xlu1 %4727, %v5072_v2  }
  0x47   :  { %4767 = vset.pattern.permute.xlu0 %v7247_v16 }
  0x48   :  { %915 = vperm.xlu0 %4767, %v5072_v2  }
  0x49   :  { %460 = vmatmul.mubr.bf16.gmra.mrb[16].mxu0 %v4849_v44 }
  0x4a   :  { %1207 = vperm.xlu1 %4727, %v5078_v5   ;;  %467 = vmatprep.mubr.bf16.mxu0 %v4850_v45 }
  0x4c   :  { %927 = vperm.xlu0 %4767, %v5086_v9  }
  0x4e   :  { %4728 = vset.pattern.permute.xlu1 %v7249_v11 }
  0x4f   :  { %710 = vperm.xlu1 %4728, %v5160_v38  }
  0x50   :  { %935 = vperm.xlu0 %4767, %v5127_v27  }
  0x51   :  { %468 = vmatmul.mubr.bf16.gmra.mrb[20].mxu0 %v4852_v47 }
  0x52   :  { %475 = vmatprep.mubr.bf16.mxu0 %v4853_v48 }
  0x53   :  { %4729 = vset.pattern.permute.xlu1 %v7247_v16 }
  0x54   :  { %931 = vperm.xlu1 %4729, %v5123_v26   ;;  %939 = vperm.xlu0 %4767, %v5133_v30  }
  0x58   :  { %4730 = vset.pattern.permute.xlu1 %v7243_v35  ;;  %959 = vperm.xlu0 %4767, %v5138_v31  }
  0x59   :  { %1115 = vperm.xlu1 %4730, %v5093_v13   ;;  %476 = vmatmul.mubr.bf16.gmra.mrb[24].mxu0 %v4855_v49 }
  0x5a   :  { %483 = vmatprep.mubr.bf16.mxu0 %v4856_v50 }
  0x5c   :  { %963 = vperm.xlu0 %4767, %v5145_v33  }
  0x5d   :  { %1119 = vperm.xlu1 %4730, %v5086_v9  }
  0x60   :  { %975 = vperm.xlu0 %4767, %v5206_v53  }
  0x61   :  { %4731 = vset.pattern.permute.xlu1 %v7241_v52  ;;  %484 = vmatmul.mubr.bf16.gmra.mrb[28].mxu0 %v4858_v51 }
  0x62   :  { %1303 = vperm.xlu1 %4731, %v5078_v5  }
  0x64   :  { %4773 = vset.pattern.permute.xlu0 %v7241_v52 }
  0x65   :  { %1299 = vperm.xlu0 %4773, %v5072_v2  }
  0x66   :  { %4732 = vset.pattern.permute.xlu1 %v7245_v0 }
  0x67   :  { %810 = vperm.xlu1 %4732, %v5133_v30  }
  0x69   :  { %1319 = vperm.xlu0 %4773, %v5127_v27  }
  0x6b   :  { %4733 = vset.pattern.permute.xlu1 %v7253_v22 }
  0x6c   :  { %1027 = vperm.xlu1 %4733, %v5123_v26  }
  0x6d   :  { %1323 = vperm.xlu0 %4773, %v5133_v30  }
  0x70   :  { %1031 = vperm.xlu1 %4733, %v5127_v27  }
  0x71   :  { %1339 = vperm.xlu0 %4773, %v5221_v54  }
  0x74   :  { %4734 = vset.pattern.permute.xlu1 %v7255_v43 }
  0x75   :  { %1215 = vperm.xlu1 %4734, %v5086_v9   ;;  %4775 = vset.pattern.permute.xlu0 %v7253_v22 }
  0x76   :  { %1023 = vperm.xlu0 %4775, %v5086_v9  }
  0x79   :  { %4735 = vset.pattern.permute.xlu1 %v7251_v1 }
  0x7a   :  { %1395 = vperm.xlu1 %4735, %v5072_v2   ;;  %1039 = vperm.xlu0 %4775, %v5160_v38  }
  0x7e   :  { %4737 = vset.pattern.permute.xlu1 %v7249_v11  ;;  %1043 = vperm.xlu0 %4775, %v5168_v41  }
  0x7f   :  { %715 = vperm.xlu1 %4737, %v5168_v41  }
  0x82   :  { %1063 = vperm.xlu0 %4775, %v5172_v42  }
  0x83   :  { %720 = vperm.xlu1 %4737, %v5231_v55  }
  0x86   :  { %1071 = vperm.xlu0 %4775, %v5206_v53  }
  0x87   :  { %4738 = vset.pattern.permute.xlu1 %v7247_v16  ;;  %v5237_v56 = vpop.permute.xlu1 %786  ;;  %v5281_v3 = vpop.permute.xlu0 %1399 }
  0x88   :  { %7316 = vst [vmem:[#allocation2_spill] sm:$0xff] %v5237_v56  ;;  %943 = vperm.xlu1 %4738, %v5160_v38   ;;  %7324 = vst [vmem:[#allocation10_spill] sm:$0xff] %v5281_v3 }
  0x8a   :  { %4778 = vset.pattern.permute.xlu0 %v7243_v35 }
  0x8b   :  { %v5241_v57 = vpop.permute.xlu1 %790  ;;  %1127 = vperm.xlu0 %4778, %v5127_v27   ;;  %v5288_v5 = vpop.permute.xlu0 %1403 }
  0x8c   :  { %7317 = vst [vmem:[#allocation3_spill] sm:$0xff] %v5241_v57  ;;  %4739 = vset.pattern.permute.xlu1 %v7243_v35  ;;  %7326 = vst [vmem:[#allocation12_spill] sm:$0xff] %v5288_v5 }
  0x8d   :  { %1123 = vperm.xlu1 %4739, %v5123_v26  }
  0x8f   :  { %1131 = vperm.xlu0 %4778, %v5133_v30  }
  0x90   :  { %v5246_v58 = vpop.permute.xlu1 %690  ;;  %v5297_v7 = vpop.permute.xlu0 %675 }
  0x91   :  { %4740 = vset.pattern.permute.xlu1 %v7241_v52  ;;  %7328 = vst [vmem:[#allocation14_spill] sm:$0xff] %v5297_v7 }
  0x92   :  { %1307 = vperm.xlu1 %4740, %v5093_v13  }
  0x93   :  { %1151 = vperm.xlu0 %4778, %v5138_v31  }
  0x94   :  { %v5306_v10 = vpop.permute.xlu0 %680 }
  0x95   :  { %v5252_v59 = vpop.permute.xlu1 %919  ;;  %7331 = vst [vmem:[#allocation17_spill] sm:$0xff] %v5306_v10 }
  0x96   :  { %7318 = vst [vmem:[#allocation4_spill] sm:$0xff] %v5252_v59  ;;  %1311 = vperm.xlu1 %4740, %v5086_v9  }
  0x97   :  { %1167 = vperm.xlu0 %4778, %v5206_v53  }
  0x9a   :  { %4741 = vset.pattern.permute.xlu1 %v7245_v0  ;;  %v5257_v60 = vpop.permute.xlu1 %794 }
  0x9b   :  { %7319 = vst [vmem:[#allocation5_spill] sm:$0xff] %v5257_v60  ;;  %822 = vperm.xlu1 %4741, %v5231_v55   ;;  %4782 = vset.pattern.permute.xlu0 %v7255_v43 }
  0x9c   :  { %1211 = vperm.xlu0 %4782, %v5093_v13   ;;  %v5315_v13 = vpop.permute.xlu0 %685 }
  0x9d   :  { %7333 = vst [vmem:[#allocation19_spill] sm:$0xff] %v5315_v13 }
  0x9f   :  { %4742 = vset.pattern.permute.xlu1 %v7253_v22  ;;  %v5262_v61 = vpop.permute.xlu1 %1011 }
  0xa0   :  { %7320 = vst [vmem:[#allocation6_spill] sm:$0xff] %v5262_v61  ;;  %1035 = vperm.xlu1 %4742, %v5133_v30   ;;  %1231 = vperm.xlu0 %4782, %v5160_v38   ;;  %v5322_v15 = vpop.permute.xlu0 %695 }
  0xa3   :  { %v5266_v62 = vpop.permute.xlu1 %1015 }
  0xa4   :  { %7321 = vst [vmem:[#allocation7_spill] sm:$0xff] %v5266_v62  ;;  %4743 = vset.pattern.permute.xlu1 %v7255_v43  ;;  %1235 = vperm.xlu0 %4782, %v5168_v41   ;;  %v5327_v18 = vpop.permute.xlu0 %705 }
  0xa5   :  { %1219 = vperm.xlu1 %4743, %v5123_v26   ;;  %7335 = vst [vmem:[#allocation21_spill] sm:$0xff] %v5327_v18 }
  0xa8   :  { %v5272_v63 = vpop.permute.xlu1 %700  ;;  %1259 = vperm.xlu0 %4782, %v5180_v46   ;;  %v5336_v21 = vpop.permute.xlu0 %730 }
  0xa9   :  { %7322 = vst [vmem:[#allocation8_spill] sm:$0xff] %v5272_v63  ;;  %1223 = vperm.xlu1 %4743, %v5127_v27   ;;  %7337 = vst [vmem:[#allocation23_spill] sm:$0xff] %v5336_v21 }
  0xac   :  { %4784 = vset.pattern.permute.xlu0 %v7251_v1  ;;  %v5343_v24 = vpop.permute.xlu0 %735 }
  0xad   :  { %4745 = vset.pattern.permute.xlu1 %v7251_v1  ;;  %v5278_v2 = vpop.permute.xlu1 %923  ;;  %1423 = vperm.xlu0 %4784, %v5160_v38   ;;  %7338 = vst [vmem:[#allocation24_spill] sm:$0xff] %v5343_v24  ;;  %v7352_v24 = vmov 0  }
  0xae   :  { %7323 = vst [vmem:[#allocation9_spill] sm:$0xff] %v5278_v2  ;;  %1407 = vperm.xlu1 %4745, %v5086_v9  }
  0xb0   :  { %v5348_v28 = vpop.permute.xlu0 %798 }
  0xb1   :  { %1427 = vperm.xlu0 %4784, %v5168_v41  }
  0xb2   :  { %4746 = vset.pattern.permute.xlu1 %v7249_v11  ;;  %v5285_v4 = vpop.permute.xlu1 %1107 }
  0xb3   :  { %7325 = vst [vmem:[#allocation11_spill] sm:$0xff] %v5285_v4  ;;  %725 = vperm.xlu1 %4746, %v5221_v54  }
  0xb4   :  { %v5354_v32 = vpop.permute.xlu0 %802 }
  0xb5   :  { %1435 = vperm.xlu0 %4784, %v5221_v54  }
  0xb6   :  { %v5292_v6 = vpop.permute.xlu1 %1111 }
  0xb7   :  { %7327 = vst [vmem:[#allocation13_spill] sm:$0xff] %v5292_v6  ;;  %4747 = vset.pattern.permute.xlu1 %v7247_v16 }
  0xb8   :  { %947 = vperm.xlu1 %4747, %v5168_v41  }
  0xb9   :  { %1447 = vperm.xlu0 %4784, %v5172_v42  }
  0xbb   :  { %v5299_v8 = vpop.permute.xlu1 %806 }
  0xbc   :  { %7329 = vst [vmem:[#allocation15_spill] sm:$0xff] %v5299_v8  ;;  %951 = vperm.xlu1 %4747, %v5231_v55  }
  0xbd   :  { %1451 = vperm.xlu0 %4784, %v5180_v46  }
  0xc0   :  { %4748 = vset.pattern.permute.xlu1 %v7243_v35  ;;  %v5304_v9 = vpop.permute.xlu1 %1019 }
  0xc1   :  { %7330 = vst [vmem:[#allocation16_spill] sm:$0xff] %v5304_v9  ;;  %1135 = vperm.xlu1 %4748, %v5160_v38   ;;  %4791 = vset.pattern.permute.xlu0 %v7247_v16 }
  0xc5   :  { %4749 = vset.pattern.permute.xlu1 %v7241_v52  ;;  %v5311_v12 = vpop.permute.xlu1 %1203 }
  0xc6   :  { %7332 = vst [vmem:[#allocation18_spill] sm:$0xff] %v5311_v12  ;;  %1315 = vperm.xlu1 %4749, %v5123_v26  }
  0xc9   :  { %v5317_v14 = vpop.permute.xlu1 %1207 }
  0xca   :  { %7334 = vst [vmem:[#allocation20_spill] sm:$0xff] %v5317_v14  ;;  %4750 = vset.pattern.permute.xlu1 %v7245_v0 }
  0xcb   :  { %826 = vperm.xlu1 %4750, %v5221_v54  }
  0xce   :  { %v5324_v17 = vpop.permute.xlu1 %710 }
  0xcf   :  { %830 = vperm.xlu1 %4750, %v5138_v31  }
  0xd3   :  { %4751 = vset.pattern.permute.xlu1 %v7253_v22  ;;  %v5330_v19 = vpop.permute.xlu1 %931 }
  0xd4   :  { %1047 = vperm.xlu1 %4751, %v5231_v55  }
  0xd8   :  { %4752 = vset.pattern.permute.xlu1 %v7255_v43  ;;  %v5334_v20 = vpop.permute.xlu1 %1115 }
  0xd9   :  { %7336 = vst [vmem:[#allocation22_spill] sm:$0xff] %v5334_v20  ;;  %1227 = vperm.xlu1 %4752, %v5133_v30  }
  0xdc   :  { %v5339_v23 = vpop.permute.xlu1 %1119 }
  0xdd   :  { %4753 = vset.pattern.permute.xlu1 %v7251_v1 }
  0xde   :  { %1411 = vperm.xlu1 %4753, %v5123_v26  }
  0xe1   :  { %v5345_v25 = vpop.permute.xlu1 %1303 }
  0xe2   :  { %7339 = vst [vmem:[#allocation25_spill] sm:$0xff] %v5345_v25  ;;  %1415 = vperm.xlu1 %4753, %v5127_v27   ;;  %v5363_v27 = vpop.permute.xlu0 %814 }
  0xe6   :  { %4755 = vset.pattern.permute.xlu1 %v7249_v11  ;;  %v5351_v29 = vpop.permute.xlu1 %810  ;;  %v5369_v37 = vpop.permute.xlu0 %818 }
  0xe7   :  { %7340 = vst [vmem:[#allocation26_spill] sm:$0xff] %v5351_v29  ;;  %740 = vperm.xlu1 %4755, %v5172_v42  }
  0xea   :  { %v5375_v40 = vpop.permute.xlu0 %838 }
  0xeb   :  { %4756 = vset.pattern.permute.xlu1 %v7247_v16  ;;  %v5357_v34 = vpop.permute.xlu1 %1027  ;;  %7343 = vst [vmem:[#allocation29_spill] sm:$0xff] %v5375_v40 }
  0xec   :  { %955 = vperm.xlu1 %4756, %v5221_v54  }
  0xef   :  { %v5360_v26 = vpop.permute.xlu1 %1031 }
  0xf0   :  { %7341 = vst [vmem:[#allocation27_spill] sm:$0xff] %v5360_v26  ;;  %4757 = vset.pattern.permute.xlu1 %v7243_v35  ;;  %v5387_v35 = vpop.permute.xlu0 %842 }
  0xf1   :  { %1139 = vperm.xlu1 %4757, %v5168_v41   ;;  %7345 = vst [vmem:[#allocation31_spill] sm:$0xff] %v5387_v35 }
  0xf4   :  { %v5366_v36 = vpop.permute.xlu1 %1215 }
  0xf5   :  { %1143 = vperm.xlu1 %4757, %v5231_v55  }
  0xf9   :  { %4758 = vset.pattern.permute.xlu1 %v7241_v52  ;;  %v5372_v39 = vpop.permute.xlu1 %1395 }
  0xfa   :  { %7342 = vst [vmem:[#allocation28_spill] sm:$0xff] %v5372_v39  ;;  %1327 = vperm.xlu1 %4758, %v5160_v38  }
  0xfc   :  { %v4287_v44 = vpop.f32.mrb[0].mxu0 }
  0xfd   :  { %v4288_v47 = vpop.f32.mrb[1].mxu0 }
  0xfe   :  { %4759 = vset.pattern.permute.xlu1 %v7245_v0  ;;  %v5378_v45 = vpop.permute.xlu1 %715  ;;  %v5381_v48 = vadd.f32 %v4288_v47, %v4287_v44  ;;  %v4290_v49 = vpop.f32.mrb[2].mxu0 }
  0xff   :  { %834 = vperm.xlu1 %4759, %v5145_v33   ;;  %v4291_v50 = vpop.f32.mrb[3].mxu0 }
 0x100   :  { %7344 = vst [vmem:[#allocation30_spill] sm:$0xff] %v5381_v48  ;;  %v5383_v51 = vadd.f32 %v4291_v50, %v4290_v49  ;;  %v517_v38 = vmul.f32 %v5381_v48, %v5381_v48 }
 0x102   :  { %v5385_v52 = vpop.permute.xlu1 %720  ;;  %v518_v0 = vmul.f32 %v5383_v51, %v5383_v51  ;;  %v494_v44 = vadd.f32 %v5383_v51, %v5381_v48 }
 0x103   :  { %4760 = vset.pattern.permute.xlu1 %v7253_v22  ;;  %v5402_v22 = vpop.permute.xlu0 %915 }
 0x104   :  { %1051 = vperm.xlu1 %4760, %v5221_v54   ;;  %v4293_v47 = vpop.f32.mrb[4].mxu0  ;;  %v533_v16 = vadd.f32 %v518_v0, %v517_v38  ;;  %7346 = vst [vmem:[#allocation32_spill] sm:$0xff] %v5402_v22  ;;  %v7347_v0 = vmov 6  }
 0x105   :  { %v4294_v49 = vpop.f32.mrb[5].mxu0 }
 0x106   :  { %v5399_v11 = vadd.f32 %v4294_v49, %v4293_v47  ;;  %v4296_v1 = vpop.f32.mrb[6].mxu0 }
 0x107   :  { %v5397_v50 = vpop.permute.xlu1 %943  ;;  %v4297_v43 = vpop.f32.mrb[7].mxu0 }
 0x108   :  { %1055 = vperm.xlu1 %4760, %v5138_v31   ;;  %v495_v35 = vadd.f32 %v5399_v11, %v494_v44  ;;  %v519_v40 = vmul.f32 %v5399_v11, %v5399_v11  ;;  %v5407_v3 = vadd.f32 %v4297_v43, %v4296_v1  ;;  %v5416_v39 = vpop.permute.xlu0 %927  ;;  %v7348_v43 = vmov 8  }
 0x10a   :  { %v534_v25 = vadd.f32 %v533_v16, %v519_v40  ;;  %v520_v5 = vmul.f32 %v5407_v3, %v5407_v3  ;;  %v496_v47 = vadd.f32 %v5407_v3, %v495_v35 }
 0x10c   :  { %4761 = vset.pattern.permute.xlu1 %v7347_v0  ;;  %v5412_v38 = vpop.permute.xlu1 %1123  ;;  %v4299_v49 = vpop.f32.mrb[8].mxu0  ;;  %v535_v14 = vadd.f32 %v534_v25, %v520_v5 }
 0x10d   :  { %1239 = vperm.xlu1 %4761, %v5231_v55   ;;  %v4300_v44 = vpop.f32.mrb[9].mxu0  ;;  %v5431_v25 = vpop.permute.xlu0 %935 }
 0x10e   :  { %v5418_v6 = vadd.f32 %v4300_v44, %v4299_v49  ;;  %v4302_v1 = vpop.f32.mrb[10].mxu0  ;;  %7350 = vst [vmem:[#allocation34_spill] sm:$0xff] %v5431_v25 }
 0x10f   :  { %v4303_v16 = vpop.f32.mrb[11].mxu0 }
 0x110   :  { %v497_v12 = vadd.f32 %v5418_v6, %v496_v47  ;;  %v521_v62 = vmul.f32 %v5418_v6, %v5418_v6  ;;  %v5426_v4 = vadd.f32 %v4303_v16, %v4302_v1 }
 0x111   :  { %4762 = vset.pattern.permute.xlu1 %v7348_v43  ;;  %v5421_v40 = vpop.permute.xlu1 %1307 }
 0x112   :  { %7349 = vst [vmem:[#allocation33_spill] sm:$0xff] %v5421_v40  ;;  %1419 = vperm.xlu1 %4762, %v5133_v30   ;;  %v536_v35 = vadd.f32 %v535_v14, %v521_v62  ;;  %v522_v5 = vmul.f32 %v5426_v4, %v5426_v4  ;;  %v498_v44 = vadd.f32 %v5426_v4, %v497_v12  ;;  %v5447_v12 = vpop.permute.xlu0 %939 }
 0x113   :  { %7353 = vst [vmem:[#allocation36_spill] sm:$0xff] %v5447_v12 }
 0x114   :  { %v4305_v59 = vpop.f32.mrb[12].mxu0  ;;  %v537_v1 = vadd.f32 %v536_v35, %v522_v5 }
 0x115   :  { %v5433_v49 = vpop.permute.xlu1 %1311  ;;  %v4306_v47 = vpop.f32.mrb[13].mxu0 }
 0x116   :  { %7351 = vst [vmem:[#allocation35_spill] sm:$0xff] %v5433_v49  ;;  %4763 = vset.pattern.permute.xlu1 %v7352_v24  ;;  %v5438_v16 = vadd.f32 %v4306_v47, %v4305_v59  ;;  %v4308_v30 = vpop.f32.mrb[14].mxu0  ;;  %v5459_v9 = vpop.permute.xlu0 %959 }
 0x117   :  { %745 = vperm.xlu1 %4763, %v5180_v46   ;;  %v4309_v62 = vpop.f32.mrb[15].mxu0  ;;  %7356 = vst [vmem:[#allocation38_spill] sm:$0xff] %v5459_v9 }
 0x118   :  { %v499_v14 = vadd.f32 %v5438_v16, %v498_v44  ;;  %v523_v57 = vmul.f32 %v5438_v16, %v5438_v16  ;;  %v5443_v40 = vadd.f32 %v4309_v62, %v4308_v30  ;;  %v7354_v44 = vmov 2  }
 0x11a   :  { %v5445_v49 = vpop.permute.xlu1 %822  ;;  %v538_v24 = vadd.f32 %v537_v1, %v523_v57  ;;  %v524_v59 = vmul.f32 %v5443_v40, %v5443_v40  ;;  %v500_v35 = vadd.f32 %v5443_v40, %v499_v14 }
 0x11b   :  { %750 = vperm.xlu1 %4763, %v5206_v53  }
 0x11c   :  { %v4311_v5 = vpop.f32.mrb[16].mxu0  ;;  %v539_v30 = vadd.f32 %v538_v24, %v524_v59  ;;  %v7357_v59 = vmov 5  }
 0x11d   :  { %v4312_v47 = vpop.f32.mrb[17].mxu0 }
 0x11e   :  { %v5456_v62 = vadd.f32 %v4312_v47, %v4311_v5  ;;  %v4314_v20 = vpop.f32.mrb[18].mxu0 }
 0x11f   :  { %4764 = vset.pattern.permute.xlu1 %v7354_v44  ;;  %v5454_v61 = vpop.permute.xlu1 %1035  ;;  %v4315_v57 = vpop.f32.mrb[19].mxu0 }
 0x120   :  { %7355 = vst [vmem:[#allocation37_spill] sm:$0xff] %v5454_v61  ;;  %967 = vperm.xlu1 %4764, %v5172_v42   ;;  %v501_v1 = vadd.f32 %v5456_v62, %v500_v35  ;;  %v525_v14 = vmul.f32 %v5456_v62, %v5456_v62  ;;  %v5464_v2 = vadd.f32 %v4315_v57, %v4314_v20  ;;  %v5473_v35 = vpop.permute.xlu0 %963 }
 0x121   :  { %7358 = vst [vmem:[#allocation39_spill] sm:$0xff] %v5473_v35 }
 0x122   :  { %v540_v60 = vadd.f32 %v539_v30, %v525_v14  ;;  %v502_v22 = vadd.f32 %v5464_v2, %v501_v1  ;;  %v526_v24 = vmul.f32 %v5464_v2, %v5464_v2  ;;  %v7360_v1 = vmov 7  }
 0x124   :  { %4765 = vset.pattern.permute.xlu1 %v7357_v59  ;;  %v5470_v5 = vpop.permute.xlu1 %1219  ;;  %v541_v47 = vadd.f32 %v540_v60, %v526_v24  ;;  %v4317_v9 = vpop.f32.mrb[20].mxu0 }
 0x125   :  { %1147 = vperm.xlu1 %4765, %v5221_v54   ;;  %v4318_v13 = vpop.f32.mrb[21].mxu0 }
 0x126   :  { %v5475_v56 = vadd.f32 %v4318_v13, %v4317_v9  ;;  %v4320_v20 = vpop.f32.mrb[22].mxu0  ;;  %v5489_v13 = vpop.permute.xlu0 %975 }
 0x127   :  { %v4321_v57 = vpop.f32.mrb[23].mxu0  ;;  %7361 = vst [vmem:[#allocation41_spill] sm:$0xff] %v5489_v13 }
 0x128   :  { %v5477_v30 = vpop.permute.xlu1 %1223  ;;  %v503_v14 = vadd.f32 %v5475_v56, %v502_v22  ;;  %v527_v10 = vmul.f32 %v5475_v56, %v5475_v56  ;;  %v5483_v61 = vadd.f32 %v4321_v57, %v4320_v20 }
 0x129   :  { %7359 = vst [vmem:[#allocation40_spill] sm:$0xff] %v5477_v30  ;;  %4766 = vset.pattern.permute.xlu1 %v7360_v1 }
 0x12a   :  { %1331 = vperm.xlu1 %4766, %v5168_v41   ;;  %v542_v60 = vadd.f32 %v541_v47, %v527_v10  ;;  %v504_v24 = vadd.f32 %v5483_v61, %v503_v14  ;;  %v528_v9 = vmul.f32 %v5483_v61, %v5483_v61  ;;  %v7363_v14 = vmov 1  }
 0x12c   :  { %v543_v30 = vadd.f32 %v542_v60, %v528_v9  ;;  %v4323_v7 = vpop.f32.mrb[24].mxu0  ;;  %v5504_v60 = vpop.permute.xlu0 %1299 }
 0x12d   :  { %v5491_v35 = vpop.permute.xlu1 %1407  ;;  %v4324_v22 = vpop.f32.mrb[25].mxu0  ;;  %7364 = vst [vmem:[#allocation43_spill] sm:$0xff] %v5504_v60 }
 0x12e   :  { %7362 = vst [vmem:[#allocation42_spill] sm:$0xff] %v5491_v35  ;;  %1335 = vperm.xlu1 %4766, %v5231_v55   ;;  %v5494_v26 = vadd.f32 %v4324_v22, %v4323_v7  ;;  %v4326_v20 = vpop.f32.mrb[26].mxu0 }
 0x12f   :  { %v4327_v57 = vpop.f32.mrb[27].mxu0 }
 0x130   :  { %v505_v41 = vadd.f32 %v5494_v26, %v504_v24  ;;  %v529_v10 = vmul.f32 %v5494_v26, %v5494_v26  ;;  %v5499_v47 = vadd.f32 %v4327_v57, %v4326_v20  ;;  %v7366_v20 = vmov 3  }
 0x132   :  { %4768 = vset.pattern.permute.xlu1 %v7363_v14  ;;  %v5502_v13 = vpop.permute.xlu1 %725  ;;  %v544_v9 = vadd.f32 %v543_v30, %v529_v10  ;;  %v506_v7 = vadd.f32 %v5499_v47, %v505_v41  ;;  %v530_v22 = vmul.f32 %v5499_v47, %v5499_v47  ;;  %v5516_v10 = vpop.permute.xlu0 %1319 }
 0x133   :  { %846 = vperm.xlu1 %4768, %v5206_v53   ;;  %7367 = vst [vmem:[#allocation45_spill] sm:$0xff] %v5516_v10 }
 0x134   :  { %v545_v24 = vadd.f32 %v544_v9, %v530_v22  ;;  %v4329_v35 = vpop.f32.mrb[28].mxu0 }
 0x135   :  { %v4330_v29 = vpop.f32.mrb[29].mxu0 }
 0x136   :  { %v5510_v12 = vadd.f32 %v4330_v29, %v4329_v35  ;;  %v4332_v14 = vpop.f32.mrb[30].mxu0  ;;  %v5530_v18 = vpop.permute.xlu0 %1323 }
 0x137   :  { %4769 = vset.pattern.permute.xlu1 %v7366_v20  ;;  %v5513_v57 = vpop.permute.xlu1 %947  ;;  %v4333_v30 = vpop.f32.mrb[31].mxu0  ;;  %7368 = vst [vmem:[#allocation46_spill] sm:$0xff] %v5530_v18 }
 0x138   :  { %7365 = vst [vmem:[#allocation44_spill] sm:$0xff] %v5510_v12  ;;  %1059 = vperm.xlu1 %4769, %v5145_v33   ;;  %v507_v41 = vadd.f32 %v5510_v12, %v506_v7  ;;  %v531_v60 = vmul.f32 %v5510_v12, %v5510_v12  ;;  %v5521_v9 = vadd.f32 %v4333_v30, %v4332_v14 }
 0x13a   :  { %v546_v22 = vadd.f32 %v545_v24, %v531_v60  ;;  %v508_v29 = vadd.f32 %v5521_v9, %v507_v41  ;;  %v532_v35 = vmul.f32 %v5521_v9, %v5521_v9  ;;  %v5535_v48 = vpop.permute.xlu0 %1339 }
 0x13b   :  { %v5526_v25 = vpop.permute.xlu1 %951  ;;  %7370 = vst [vmem:[#allocation48_spill] sm:$0xff] %v5535_v48 }
 0x13c   :  { %4770 = vset.pattern.permute.xlu1 %v7347_v0  ;;  %v509_v8 = vrot.slane %v508_v29, 4  ;;  %v547_v63 = vadd.f32 %v546_v22, %v532_v35 }
 0x13d   :  { %1243 = vperm.xlu1 %4770, %v5221_v54  }
 0x13e   :  { %v510_v7 = vadd.f32 %v509_v8, %v508_v29  ;;  %v548_v10 = vrot.slane %v547_v63, 4 }
 0x140   :  { %v5532_v14 = vpop.permute.xlu1 %1135  ;;  %v511_v60 = vrot.slane %v510_v7, 2  ;;  %v549_v24 = vadd.f32 %v548_v10, %v547_v63 }
 0x141   :  { %7369 = vst [vmem:[#allocation47_spill] sm:$0xff] %v5532_v14  ;;  %1247 = vperm.xlu1 %4770, %v5138_v31  }
 0x142   :  { %v512_v30 = vadd.f32 %v511_v60, %v510_v7  ;;  %v550_v41 = vrot.slane %v549_v24, 2  ;;  %v5544_v60 = vpop.permute.xlu0 %1023 }
 0x144   :  { %v513_v12 = vrot.slane %v512_v30, 1  ;;  %v551_v21 = vadd.f32 %v550_v41, %v549_v24 }
 0x145   :  { %4771 = vset.pattern.permute.xlu1 %v7348_v43  ;;  %v5538_v22 = vpop.permute.xlu1 %1315 }
 0x146   :  { %1431 = vperm.xlu1 %4771, %v5231_v55   ;;  %v514_v54 = vadd.f32 %v513_v12, %v512_v30  ;;  %v552_v8 = vrot.slane %v551_v21, 1  ;;  %v5554_v55 = vpop.permute.xlu0 %1039 }
 0x148   :  { %v516_v29 = vmul.f32 0.0078125, %v514_v54  ;;  %v553_v35 = vadd.f32 %v552_v8, %v551_v21  ;;  %v563_v21 = vlaneseq }
 0x14a   :  { %4772 = vset.pattern.permute.xlu1 %v7354_v44  ;;  %v5542_v63 = vpop.permute.xlu1 %826  ;;  %v554_v10 = vmul.f32 0.0078125, %v553_v35  ;;  %v555_v7 = vmul.f32 %v516_v29, %v516_v29  ;;  %v5562_v30 = vshrl.u32 %v563_v21, 7  ;;  %v5564_v54 = vpop.permute.xlu0 %1043 }
 0x14b   :  { %971 = vperm.xlu1 %4772, %v5180_v46  }
 0x14c   :  { %v556_v24 = vsub.f32 %v554_v10, %v555_v7  ;;  %v5571_v35 = vsub.s32 0, %v5562_v30  ;;  %vm656_vm0 = vcmp.lt.s32.totalorder %v5562_v30, 1  ;;  %vm897_vm1 = vcmp.lt.s32.totalorder %v5562_v30, 7 }
 0x14d   :  { %vm1907_vm2 = vcmp.lt.s32.totalorder %v5562_v30, 3  ;;  %vm1866_vm3 = vcmp.lt.s32.totalorder %v5562_v30, 4  ;;  %vm1833_vm4 = vcmp.lt.s32.totalorder %v5562_v30, 5 }
 0x14e   :  { %v5547_v41 = vpop.permute.xlu1 %830  ;;  %v557_v48 = vadd.f32 1e-05, %v556_v24  ;;  %7373 = vst [vmem:[#allocation51_spill] sm:$0xff] %v5571_v35  ;;  %v493_v24 = vld [vmem:[%s4083_s21] sm:$0x1]  ;;  %v5573_v44 = vpop.permute.xlu0 %1063  ;;  %s5028_s21 = smov 17  }
 0x14f   :  { %4774 = vset.pattern.permute.xlu1 %v7357_v59  ;;  %7374 = vst [vmem:[#allocation52_spill] sm:$0xff] %v5573_v44  ;;  %s4097_s24 = sld [smem:[%s7240_s0 + %s5028_s21]]   ;;  %s5041_s21 = smov 28  }
 0x150   :  { %1155 = vperm.xlu1 %4774, %v5145_v33   ;;  %4973 = vrsqrt.f32 %v557_v48  ;;  %v492_v48 = vld [vmem:[%s4082_s17] sm:$0x1]  ;;  %s4094_s17 = sld [smem:[%s7240_s0 + %s5027_s13]]  }
 0x151   :  { %s4099_s13 = sld [smem:[%s7240_s0 + %s5031_s9]]  }
 0x153   :  { %v5556_v12 = vpop.permute.xlu1 %1047 }
 0x154   :  { %7371 = vst [vmem:[#allocation49_spill] sm:$0xff] %v5556_v12  ;;  %1159 = vperm.xlu1 %4774, %v5172_v42  }
 0x158   :  { %4776 = vset.pattern.permute.xlu1 %v7360_v1  ;;  %v5567_v8 = vpop.permute.xlu1 %1227 }
 0x159   :  { %7372 = vst [vmem:[#allocation50_spill] sm:$0xff] %v5567_v8  ;;  %1343 = vperm.xlu1 %4776, %v5138_v31  }
 0x15a   :  { %v4974_v10 = vpop.eup %4973 }
 0x15b   :  { %v559_v7 = vmul.f32 %v4974_v10, %v492_v48 }
 0x15d   :  { %4777 = vset.pattern.permute.xlu1 %v7366_v20  ;;  %v5576_v21 = vpop.permute.xlu1 %1411  ;;  %v560_v18 = vmul.f32 %v559_v7, %v516_v29  ;;  %v5579_v14 = vrot.slane %v559_v7, %v5571_v35 }
 0x15e   :  { %7375 = vst [vmem:[#allocation53_spill] sm:$0xff] %v5576_v21  ;;  %1067 = vperm.xlu1 %4777, %v5180_v46  }
 0x15f   :  { %v561_v8 = vsub.f32 %v493_v24, %v560_v18  ;;  %v583_v12 = vmul.f32 %v5521_v9, %v5579_v14  ;;  %v575_v48 = vmul.f32 %v5443_v40, %v5579_v14  ;;  %v576_v10 = vmul.f32 %v5456_v62, %v5579_v14  ;;  %v5618_v62 = vpop.permute.xlu0 %1071 }
 0x160   :  { %v577_v20 = vmul.f32 %v5464_v2, %v5579_v14  ;;  %v579_v29 = vmul.f32 %v5483_v61, %v5579_v14  ;;  %v569_v7 = vmul.f32 %v5383_v51, %v5579_v14  ;;  %v570_v18 = vmul.f32 %v5399_v11, %v5579_v14  ;;  %7377 = vst [vmem:[#allocation55_spill] sm:$0xff] %v5618_v62 }
 0x161   :  { %v5596_v24 = vpop.permute.xlu1 %1415  ;;  %v5599_v9 = vrot.slane %v561_v8, %v5571_v35  ;;  %v571_v40 = vmul.f32 %v5407_v3, %v5579_v14  ;;  %v572_v2 = vmul.f32 %v5418_v6, %v5579_v14  ;;  %v5608_v61 = vmul.f32 %v5475_v56, %v5579_v14 }
 0x162   :  { %7376 = vst [vmem:[#allocation54_spill] sm:$0xff] %v5596_v24  ;;  %4779 = vset.pattern.permute.xlu1 %v7347_v0  ;;  %v5612_v11 = vmul.f32 %v5494_v26, %v5579_v14  ;;  %v5616_v51 = vmul.f32 %v5499_v47, %v5579_v14 }
 0x163   :  { %1251 = vperm.xlu1 %4779, %v5145_v33   ;;  %v605_v3 = vadd.f32 %v5599_v9, %v583_v12  ;;  %v597_v6 = vadd.f32 %v5599_v9, %v575_v48  ;;  %v598_v8 = vadd.f32 %v5599_v9, %v576_v10  ;;  %v599_v56 = vadd.f32 %v5599_v9, %v577_v20 }
 0x164   :  { %v601_v35 = vadd.f32 %v5599_v9, %v579_v29  ;;  %v591_v26 = vadd.f32 %v5599_v9, %v569_v7  ;;  %v592_v44 = vadd.f32 %v5599_v9, %v570_v18  ;;  %v593_v47 = vadd.f32 %v5599_v9, %v571_v40 }
 0x165   :  { %v5629_v24 = vmax.f32 %v597_v6, 0.0  ;;  %v5631_v62 = vmax.f32 %v598_v8, 0.0  ;;  %v5633_v21 = vmax.f32 %v599_v56, 0.0  ;;  %v594_v20 = vadd.f32 %v5599_v9, %v572_v2  ;;  %v5654_v8 = vpop.permute.xlu0 %1127 }
 0x166   :  { %v5635_v12 = vpop.permute.xlu1 %740  ;;  %v5639_v48 = vmax.f32 %v591_v26, 0.0  ;;  %v5641_v10 = vmax.f32 %v592_v44, 0.0  ;;  %v573_v18 = vmul.f32 %v5426_v4, %v5579_v14  ;;  %v574_v44 = vmul.f32 %v5438_v16, %v5579_v14  ;;  %7380 = vst [vmem:[#allocation58_spill] sm:$0xff] %v5654_v8 }
 0x167   :  { %7378 = vst [vmem:[#allocation56_spill] sm:$0xff] %v5635_v12  ;;  %1255 = vperm.xlu1 %4779, %v5172_v42   ;;  %v7264_v29 = vrot.slane %v5629_v24, 7  ;;  %v7263_v7 = vrot.slane %v5631_v62, 7  ;;  %v889_v40 = vrot.slane %v5631_v62, 1  ;;  %v5664_v4 = vmax.f32 %v593_v47, 0.0 }
 0x168   :  { %7379 = vst [vmem:[#allocation57_spill] sm:$0xff] %v5639_v48  ;;  %v5666_v26 = vmax.f32 %v594_v20, 0.0  ;;  %v7382_v16 = vrot.slane %v5633_v21, 1  ;;  %v7384_v8 = vrot.slane %v5629_v24, 1  ;;  %v640_v47 = vrot.slane %v5641_v10, 7 }
 0x169   :  { %v5662_v56 = vsel %vm656_vm0, %v7264_v29, %v7263_v7  ;;  %7381 = vst [vmem:[#allocation59_spill] sm:$0xff] %v5664_v4  ;;  %v5687_v29 = vmax.f32 %v605_v3, 0.0  ;;  %v641_v6 = vrot.slane %v5664_v4, 7 }
 0x16a   :  { %v762_v2 = vmul.f32 %v5385_v52, %v5662_v56  ;;  %v5675_v12 = vsel %vm897_vm1, %v889_v40, %v7382_v16  ;;  %v5681_v7 = vsel %vm897_vm1, %v7384_v8, %v889_v40  ;;  %v858_v52 = vmul.f32 %v5445_v49, %v5631_v62 }
 0x16b   :  { %7383 = vst [vmem:[#allocation60_spill] sm:$0xff] %v5675_v12  ;;  %4780 = vset.pattern.permute.xlu1 %v7348_v43  ;;  %v5685_v20 = vpop.permute.xlu1 %955  ;;  %7386 = vst [vmem:[#allocation62_spill] sm:$0xff] %v5687_v29  ;;  %v5693_v16 = vmul.f32 %v5526_v25, %v5675_v12  ;;  %v642_v8 = vrot.slane %v5666_v26, 7  ;;  %v7387_v43 = vrot.slane %v5639_v48, 7  ;;  %v852_v49 = vmul.f32 %v5348_v28, %v5641_v10  ;;  %v5725_v48 = vpop.permute.xlu0 %1131 }
 0x16c   :  { %7385 = vst [vmem:[#allocation61_spill] sm:$0xff] %v5685_v20  ;;  %1439 = vperm.xlu1 %4780, %v5138_v31   ;;  %v778_v40 = vmax.f32 %v5633_v21, %v762_v2  ;;  %v5709_v25 = vsel %vm656_vm0, %v640_v47, %v641_v6  ;;  %v853_v2 = vmul.f32 %v5354_v32, %v5664_v4  ;;  %v7273_v20 = vrot.slane %v5641_v10, 1 }
 0x16d   :  { %v5703_v3 = vsel %vm656_vm0, %v7387_v43, %v640_v47  ;;  %7388 = vst [vmem:[#allocation63_spill] sm:$0xff] %v5709_v25  ;;  %v5720_v43 = vsel %vm656_vm0, %v641_v6, %v642_v8  ;;  %v757_v28 = vmul.f32 %v5322_v15, %v5709_v25  ;;  %v884_v47 = vrot.slane %v5664_v4, 1 }
 0x16e   :  { %v756_v31 = vmul.f32 %v5246_v58, %v5703_v3  ;;  %v5716_v12 = vmax.f32 %v778_v40, %v858_v52  ;;  %v5727_v29 = vmax.f32 %v601_v35, 0.0  ;;  %v885_v32 = vrot.slane %v5666_v26, 1 }
 0x16f   :  { %v1077_v52 = vmul.f32 %v5544_v60, %v5709_v25  ;;  %v773_v40 = vmax.f32 %v5666_v26, %v757_v28  ;;  %v5743_v35 = vsel %vm897_vm1, %v7273_v20, %v884_v47  ;;  %v596_v28 = vadd.f32 %v5599_v9, %v574_v44 }
 0x170   :  { %v772_v58 = vmax.f32 %v5664_v4, %v756_v31  ;;  %4781 = vset.pattern.permute.xlu1 %v7357_v59  ;;  %v5734_v6 = vpop.permute.xlu1 %1139  ;;  %v595_v31 = vadd.f32 %v5599_v9, %v573_v18  ;;  %v5749_v59 = vsel %vm897_vm1, %v884_v47, %v885_v32  ;;  %v981_v15 = vmul.f32 %v5416_v39, %v5743_v35 }
 0x171   :  { %1163 = vperm.xlu1 %4781, %v5180_v46   ;;  %v5756_v4 = vmul.f32 %v5513_v57, %v5681_v7  ;;  %v869_v20 = vmax.f32 %v773_v40, %v853_v2  ;;  %v982_v18 = vmul.f32 %v5330_v19, %v5749_v59  ;;  %v1269_v47 = vmul.f32 %v5366_v36, %v5720_v43  ;;  %v5774_v40 = vpop.permute.xlu0 %1151 }
 0x172   :  { %v868_v60 = vmax.f32 %v772_v58, %v852_v49  ;;  %v5760_v25 = vmax.f32 %v595_v31, 0.0  ;;  %v1173_v49 = vmul.f32 %v5339_v23, %v5749_v59  ;;  %v5766_v39 = vmax.f32 %v596_v28, 0.0  ;;  %7389 = vst [vmem:[#allocation64_spill] sm:$0xff] %v5774_v40 }
 0x173   :  { %v998_v58 = vmax.f32 %v869_v20, %v982_v18  ;;  %v1078_v19 = vmul.f32 %v5357_v34, %v5720_v43  ;;  %v857_v31 = vmul.f32 %v5369_v37, %v5629_v24  ;;  %v7390_v37 = vrot.slane %v5629_v24, 7 }
 0x174   :  { %v997_v46 = vmax.f32 %v868_v60, %v981_v15  ;;  %v5768_v44 = vpop.permute.xlu1 %1143  ;;  %v643_v57 = vrot.slane %v5760_v25, 7  ;;  %v7278_v2 = vrot.slane %v5760_v25, 1  ;;  %v644_v15 = vrot.slane %v5766_v39, 7 }
 0x175   :  { %4783 = vset.pattern.permute.xlu1 %v7360_v1  ;;  %v7279_v36 = vrot.slane %v5766_v39, 1  ;;  %v5794_v60 = vmul.f32 %v5538_v22, %v5760_v25  ;;  %v7391_v18 = vrot.slane %v5629_v24, 1 }
 0x176   :  { %v1093_v23 = vmax.f32 %v997_v46, %v1077_v52  ;;  %1347 = vperm.xlu1 %4783, %v5145_v33   ;;  %v5784_v20 = vsel %vm656_vm0, %v642_v8, %v643_v57  ;;  %v5790_v34 = vsel %vm897_vm1, %v885_v32, %v7278_v2  ;;  %v1094_v52 = vmax.f32 %v998_v58, %v1078_v19  ;;  %v4995_v2 = vld [vmem:[%s5063_s6 + $0x60] sm:$0xff] }
 0x177   :  { %v5800_v33 = vsel %vm656_vm0, %v644_v15, %v7390_v37  ;;  %v5804_v8 = vsel %vm656_vm0, %v643_v57, %v644_v15  ;;  %v5812_v32 = vsel %vm897_vm1, %v7279_v36, %v7391_v18  ;;  %v1082_v57 = vmul.f32 %v5564_v54, %v5662_v56  ;;  %v7403_v36 = vld [vmem:[#allocation15_spill] sm:$0xff] }
 0x178   :  { %v1189_v28 = vmax.f32 %v1093_v23, %v1173_v49  ;;  %v760_v22 = vmul.f32 %v5324_v17, %v5804_v8  ;;  %v761_v46 = vmul.f32 %v5378_v45, %v5800_v33  ;;  %v856_v49 = vmul.f32 %v5363_v27, %v5766_v39 }
 0x179   :  { %v5822_v58 = vpop.permute.xlu1 %1327  ;;  %v985_v23 = vmul.f32 %v5397_v50, %v5812_v32  ;;  %v1081_v15 = vmul.f32 %v5554_v55, %v5800_v33  ;;  %v1174_v17 = vmul.f32 %v5412_v38, %v5790_v34  ;;  %v600_v54 = vadd.f32 %v5599_v9, %v5608_v61 }
 0x17a   :  { %v5824_v19 = vmax.f32 %v1189_v28, %v1269_v47  ;;  %1351 = vperm.xlu1 %4783, %v5172_v42   ;;  %v776_v27 = vmax.f32 %v5629_v24, %v760_v22  ;;  %v777_v45 = vmax.f32 %v5631_v62, %v761_v46  ;;  %v647_v47 = vrot.slane %v5633_v21, 7  ;;  %v5838_v28 = vpop.permute.xlu0 %1167 }
 0x17b   :  { %7392 = vst [vmem:[#allocation65_spill] sm:$0xff] %v5838_v28  ;;  %v1190_v50 = vmax.f32 %v1094_v52, %v1174_v17  ;;  %v1270_v55 = vmul.f32 %v5470_v5, %v5784_v20  ;;  %v602_v38 = vadd.f32 %v5599_v9, %v5612_v11  ;;  %v603_v42 = vadd.f32 %v5599_v9, %v5616_v51 }
 0x17c   :  { %v872_v37 = vmax.f32 %v776_v27, %v856_v49  ;;  %v873_v18 = vmax.f32 %v777_v45, %v857_v31  ;;  %v5846_v22 = vmax.f32 %v600_v54, 0.0  ;;  %v7393_v61 = vrot.slane %v5631_v62, 7 }
 0x17d   :  { %v5854_v52 = vmax.f32 %v1190_v50, %v1270_v55  ;;  %v5858_v17 = vmax.f32 %v602_v38, 0.0  ;;  %v5860_v11 = vmax.f32 %v603_v42, 0.0  ;;  %v859_v27 = vmul.f32 %v5542_v63, %v5633_v21 }
 0x17e   :  { %v5852_v46 = vsel %vm656_vm0, %v7393_v61, %v647_v47  ;;  %4785 = vset.pattern.permute.xlu1 %v7347_v0  ;;  %v5863_v51 = vpop.permute.xlu1 %834  ;;  %v1001_v31 = vmax.f32 %v872_v37, %v985_v23  ;;  %v1002_v49 = vmax.f32 %v873_v18, %v5756_v4  ;;  %v7275_v45 = vrot.slane %v5846_v22, 7  ;;  %v5887_v42 = vpop.permute.xlu0 %1211  ;;  %v7396_v18 = vld [vmem:[#allocation44_spill] sm:$0xff] }
 0x17f   :  { %v763_v5 = vmul.f32 %v5502_v13, %v5852_v46  ;;  %1263 = vperm.xlu1 %4785, %v5206_v53   ;;  %v7277_v50 = vrot.slane %v5858_v17, 7  ;;  %v7276_v55 = vrot.slane %v5860_v11, 7  ;;  %v7394_v53 = vld [vmem:[#allocation30_spill] sm:$0xff]  ;;  %v582_v61 = vmul.f32 %v7396_v18, %v5579_v14 }
 0x180   :  { %v5875_v38 = vmax.f32 %v1001_v31, %v1081_v15  ;;  %v5877_v23 = vmax.f32 %v1002_v49, %v1082_v57  ;;  %v5883_v63 = vsel %vm656_vm0, %v647_v47, %v7275_v45  ;;  %v568_v4 = vmul.f32 %v7394_v53, %v5579_v14  ;;  %v7395_v15 = vld [vmem:[#allocation23_spill] sm:$0xff]  ;;  %v7400_v14 = vld [vmem:[#allocation62_spill] sm:$0xff] }
 0x181   :  { %v779_v54 = vmax.f32 %v5846_v22, %v763_v5  ;;  %v5897_v57 = vsel %vm656_vm0, %v7277_v50, %v7276_v55  ;;  %v764_v47 = vmul.f32 %v7395_v15, %v5883_v63  ;;  %v7397_v5 = vld [vmem:[#allocation21_spill] sm:$0xff]  ;;  %v860_v49 = vmul.f32 %v5547_v41, %v5846_v22 }
 0x182   :  { %v759_v31 = vmul.f32 %v7397_v5, %v5784_v20  ;;  %v7399_v45 = vmov 8   ;;  %v604_v50 = vadd.f32 %v5599_v9, %v582_v61  ;;  %v653_v18 = vrot.slane %v7400_v14, 7  ;;  %v7401_v5 = vld [vmem:[#allocation8_spill] sm:$0xff] }
 0x183   :  { %v5889_v37 = vmax.f32 %v779_v54, %v859_v27  ;;  %v590_v27 = vadd.f32 %v5599_v9, %v568_v4  ;;  %v7398_v54 = vld [vmem:[#allocation49_spill] sm:$0xff]  ;;  %4786 = vset.pattern.permute.xlu1 %v7399_v45  ;;  %v5911_v55 = vpop.permute.xlu1 %1051  ;;  %v780_v15 = vmax.f32 %v5727_v29, %v764_v47  ;;  %v758_v13 = vmul.f32 %v7401_v5, %v5720_v43 }
 0x184   :  { %v1083_v53 = vmul.f32 %v7398_v54, %v5852_v46  ;;  %1443 = vperm.xlu1 %4786, %v4995_v2   ;;  %v7402_v4 = vmax.f32 %v5716_v12, %v5693_v16  ;;  %v854_v47 = vmul.f32 %v7403_v36, %v5666_v26  ;;  %v7404_v9 = vrot.slane %v5766_v39, 1  ;;  %v7408_v12 = vld [vmem:[#allocation34_spill] sm:$0xff] }
 0x185   :  { %v5919_v41 = vmax.f32 %v590_v27, 0.0  ;;  %v7405_v61 = vrot.slane %v5760_v25, 1  ;;  %v5934_v5 = vmax.f32 %v780_v15, %v860_v49  ;;  %v5936_v2 = vmax.f32 %v604_v50, 0.0  ;;  %v7410_v50 = vld [vmem:[#allocation36_spill] sm:$0xff] }
 0x186   :  { %v5924_v54 = vmax.f32 %v7402_v4, %v1083_v53  ;;  %v774_v27 = vmax.f32 %v5760_v25, %v758_v13  ;;  %v983_v16 = vmul.f32 %v7408_v12, %v5790_v34  ;;  %v5941_v53 = vpop.permute.xlu0 %1231  ;;  %v7411_v13 = vld [vmem:[#allocation26_spill] sm:$0xff] }
 0x187   :  { %v907_v43 = vsel %vm897_vm1, %v7405_v61, %v7404_v9  ;;  %7406 = vst [vmem:[#allocation30_spill] sm:$0xff] %v5934_v5  ;;  %7407 = vst [vmem:[#allocation23_spill] sm:$0xff] %v5936_v2  ;;  %v5943_v4 = vpop.permute.xlu1 %1055  ;;  %v638_v36 = vrot.slane %v5919_v41, 7  ;;  %v7282_v0 = vrot.slane %v5936_v2, 7  ;;  %v775_v9 = vmax.f32 %v5766_v39, %v759_v31  ;;  %v4996_v61 = vld [vmem:[%s5063_s6 + $0x70] sm:$0xff] }
 0x188   :  { %7409 = vst [vmem:[#allocation44_spill] sm:$0xff] %v5943_v4  ;;  %v870_v28 = vmax.f32 %v774_v27, %v854_v47  ;;  %4787 = vset.pattern.permute.xlu1 %v7360_v1  ;;  %v984_v49 = vmul.f32 %v7410_v50, %v907_v43  ;;  %v855_v15 = vmul.f32 %v7411_v13, %v5760_v25  ;;  %v7413_v47 = vld [vmem:[#allocation27_spill] sm:$0xff]  ;;  %v7414_v27 = vld [vmem:[#allocation58_spill] sm:$0xff]  ;;  %v7286_v25 = vrot.slane %v5727_v29, 1 }
 0x189   :  { %1355 = vperm.xlu1 %4787, %v4996_v61   ;;  %v5957_v12 = vsel %vm656_vm0, %v7282_v0, %v653_v18  ;;  %v1079_v31 = vmul.f32 %v7413_v47, %v5784_v20  ;;  %v1175_v1 = vmul.f32 %v7414_v27, %v907_v43  ;;  %v7415_v50 = vld [vmem:[#allocation14_spill] sm:$0xff]  ;;  %v7285_v13 = vrot.slane %v5858_v17, 1  ;;  %v7419_v47 = vld [vmem:[#allocation37_spill] sm:$0xff] }
 0x18a   :  { %7412 = vst [vmem:[#allocation21_spill] sm:$0xff] %v5957_v12  ;;  %v999_v5 = vmax.f32 %v870_v28, %v983_v16  ;;  %v753_v40 = vmul.f32 %v7415_v50, %v5957_v12  ;;  %v871_v4 = vmax.f32 %v775_v9, %v855_v15  ;;  %v5968_v61 = vsel %vm656_vm0, %v653_v18, %v638_v36  ;;  %v7417_v28 = vld [vmem:[#allocation53_spill] sm:$0xff]  ;;  %v7420_v15 = vld [vmem:[#allocation40_spill] sm:$0xff] }
 0x18b   :  { %7416 = vst [vmem:[#allocation49_spill] sm:$0xff] %v5968_v61  ;;  %v1462_v16 = vmul.f32 %v7417_v28, %v907_v43  ;;  %v1080_v27 = vmul.f32 %v7419_v47, %v5804_v8  ;;  %v1176_v9 = vmul.f32 %v5725_v48, %v5812_v32  ;;  %v5983_v18 = vsel %vm897_vm1, %v7286_v25, %v7285_v13  ;;  %v4997_v43 = vld [vmem:[%s5063_s6 + $0x78] sm:$0xff] }
 0x18c   :  { %v1095_v0 = vmax.f32 %v999_v5, %v1079_v31  ;;  %v5971_v2 = vpop.permute.xlu1 %1239  ;;  %v1000_v20 = vmax.f32 %v871_v4, %v984_v49  ;;  %v5985_v5 = vpop.permute.xlu0 %1235  ;;  %v769_v4 = vmax.f32 %v5919_v41, %v753_v40  ;;  %v1271_v31 = vmul.f32 %v7420_v15, %v5804_v8  ;;  %v7422_v28 = vld [vmem:[#allocation17_spill] sm:$0xff] }
 0x18d   :  { %7418 = vst [vmem:[#allocation62_spill] sm:$0xff] %v5971_v2  ;;  %1359 = vperm.xlu1 %4787, %v4997_v43   ;;  %v7421_v48 = vmax.f32 %v5854_v52, %v5794_v60  ;;  %v5998_v47 = vmul.f32 %v7422_v28, %v5968_v61  ;;  %v7290_v25 = vrot.slane %v5919_v41, 1  ;;  %v7289_v12 = vrot.slane %v7400_v14, 1  ;;  %v7424_v40 = vld [vmem:[#allocation45_spill] sm:$0xff] }
 0x18e   :  { %v1191_v49 = vmax.f32 %v1095_v0, %v1175_v1  ;;  %v1096_v13 = vmax.f32 %v1000_v20, %v1080_v27  ;;  %v7423_v0 = vld [vmem:[#allocation2_spill] sm:$0xff]  ;;  %v1367_v8 = vmul.f32 %v7424_v40, %v5766_v39  ;;  %v7425_v15 = vld [vmem:[#allocation57_spill] sm:$0xff]  ;;  %v7429_v39 = vld [vmem:[#allocation19_spill] sm:$0xff] }
 0x18f   :  { %v5994_v50 = vmax.f32 %v7421_v48, %v1462_v16  ;;  %v849_v1 = vmul.f32 %v7423_v0, %v7400_v14  ;;  %v7426_v60 = vrot.slane %v7425_v15, 7  ;;  %v7427_v16 = vld [vmem:[#allocation50_spill] sm:$0xff]  ;;  %v7431_v40 = vld [vmem:[#allocation32_spill] sm:$0xff] }
 0x190   :  { %v1287_v2 = vmax.f32 %v1191_v49, %v1271_v31  ;;  %v1272_v20 = vmul.f32 %v7427_v16, %v5800_v33  ;;  %v1192_v27 = vmax.f32 %v1096_v13, %v1176_v9  ;;  %v6020_v49 = vsel %vm897_vm1, %v7289_v12, %v7290_v25  ;;  %v7430_v33 = vld [vmem:[#allocation54_spill] sm:$0xff]  ;;  %v6037_v25 = vpop.permute.xlu0 %1259 }
 0x191   :  { %v6010_v52 = vsel %vm656_vm0, %v638_v36, %v7426_v60  ;;  %7428 = vst [vmem:[#allocation8_spill] sm:$0xff] %v6020_v49  ;;  %4788 = vset.pattern.permute.xlu1 %v7399_v45  ;;  %v6025_v48 = vpop.permute.xlu1 %1419  ;;  %v865_v36 = vmax.f32 %v769_v4, %v849_v1  ;;  %v1463_v13 = vmul.f32 %v7430_v33, %v5812_v32  ;;  %v882_v9 = vrot.slane %v7425_v15, 1  ;;  %v7437_v33 = vld [vmem:[#allocation16_spill] sm:$0xff] }
 0x192   :  { %v755_v31 = vmul.f32 %v7429_v39, %v6010_v52  ;;  %v1383_v28 = vmax.f32 %v1287_v2, %v1367_v8  ;;  %1455 = vperm.xlu1 %4788, %v4997_v43   ;;  %v6030_v0 = vmax.f32 %v1192_v27, %v1272_v20  ;;  %v978_v60 = vmul.f32 %v7431_v40, %v6020_v49  ;;  %v7432_v39 = vld [vmem:[#allocation5_spill] sm:$0xff]  ;;  %v7434_v2 = vld [vmem:[#allocation47_spill] sm:$0xff] }
 0x193   :  { %v851_v12 = vmul.f32 %v7432_v39, %v7425_v15  ;;  %7433 = vst [vmem:[#allocation15_spill] sm:$0xff] %v6037_v25  ;;  %v1177_v4 = vmul.f32 %v7434_v2, %v5681_v7  ;;  %v770_v32 = vmax.f32 %v7425_v15, %v5998_v47  ;;  %v7435_v43 = vrot.slane %v5641_v10, 1  ;;  %v7436_v27 = vld [vmem:[#allocation9_spill] sm:$0xff]  ;;  %v7438_v2 = vld [vmem:[#allocation22_spill] sm:$0xff] }
 0x194   :  { %v771_v16 = vmax.f32 %v5641_v10, %v755_v31  ;;  %v6043_v1 = vmax.f32 %v1383_v28, %v1463_v13  ;;  %v1076_v40 = vmul.f32 %v7437_v33, %v5703_v3  ;;  %v649_v39 = vrot.slane %v5727_v29, 7 }
 0x195   :  { %v6049_v8 = vsel %vm897_vm1, %v882_v9, %v7435_v43  ;;  %v1172_v47 = vmul.f32 %v7438_v2, %v5743_v35  ;;  %v1193_v28 = vmax.f32 %v5875_v38, %v1177_v4  ;;  %v1273_v13 = vmul.f32 %v5941_v53, %v5662_v56  ;;  %v7442_v2 = vld [vmem:[#allocation60_spill] sm:$0xff]  ;;  %v7443_v4 = vld [vmem:[#allocation63_spill] sm:$0xff] }
 0x196   :  { %v867_v20 = vmax.f32 %v771_v16, %v851_v12  ;;  %v980_v31 = vmul.f32 %v7436_v27, %v6049_v8  ;;  %v6062_v45 = vpop.permute.xlu1 %745  ;;  %v7439_v12 = vmov 1   ;;  %v994_v16 = vmax.f32 %v865_v36, %v978_v60  ;;  %v7444_v53 = vld [vmem:[#allocation56_spill] sm:$0xff] }
 0x197   :  { %4789 = vset.pattern.permute.xlu1 %v7439_v12  ;;  %v7440_v33 = vrot.slane %v5858_v17, 7  ;;  %v6073_v38 = vmul.f32 %v5734_v6, %v7442_v2  ;;  %v1268_v56 = vmul.f32 %v5887_v42, %v7443_v4  ;;  %v1289_v12 = vmax.f32 %v1193_v28, %v1273_v13  ;;  %v7447_v6 = vld [vmem:[#allocation61_spill] sm:$0xff]  ;;  %v1424_v28 = vpop.permute.xlu0 %1423  ;;  %v7448_v13 = vld [vmem:[#allocation6_spill] sm:$0xff] }
 0x198   :  { %v996_v27 = vmax.f32 %v867_v20, %v980_v31  ;;  %v7445_v36 = vrot.slane %v5846_v22, 1  ;;  %v7446_v60 = vrot.slane %v5633_v21, 1 }
 0x199   :  { %v6069_v25 = vsel %vm656_vm0, %v649_v39, %v7440_v33 }
 0x19a   :  { %7441 = vst [vmem:[#allocation34_spill] sm:$0xff] %v6069_v25  ;;  %v6079_v43 = vmul.f32 %v7444_v53, %v6069_v25  ;;  %v6087_v20 = vsel %vm897_vm1, %v7446_v60, %v7445_v36  ;;  %v1092_v31 = vmax.f32 %v996_v27, %v1076_v40  ;;  %v1074_v53 = vmul.f32 %v7448_v13, %v5968_v61  ;;  %v6104_v27 = vpop.permute.xlu1 %750  ;;  %v7449_v60 = vld [vmem:[#allocation59_spill] sm:$0xff] }
 0x19b   :  { %v988_v33 = vmul.f32 %v7447_v6, %v6087_v20  ;;  %v6095_v4 = vmul.f32 %v5768_v44, %v6087_v20  ;;  %v1465_v36 = vmul.f32 %v1424_v28, %v7442_v2  ;;  %v1369_v40 = vmul.f32 %v5822_v58, %v5631_v62  ;;  %v7450_v6 = vld [vmem:[#allocation33_spill] sm:$0xff]  ;;  %v7452_v61 = vld [vmem:[#allocation3_spill] sm:$0xff] }
 0x19c   :  { %v1188_v44 = vmax.f32 %v1092_v31, %v1172_v47  ;;  %v1364_v13 = vmul.f32 %v7450_v6, %v7449_v60  ;;  %v1090_v28 = vmax.f32 %v994_v16, %v1074_v53  ;;  %v7451_v62 = vrot.slane %v5846_v22, 7  ;;  %v7453_v31 = vld [vmem:[#allocation24_spill] sm:$0xff]  ;;  %v7457_v53 = vld [vmem:[#allocation46_spill] sm:$0xff]  ;;  %v7458_v6 = vld [vmem:[#allocation7_spill] sm:$0xff] }
 0x19d   :  { %v1004_v42 = vmax.f32 %v5889_v37, %v988_v33  ;;  %v1195_v2 = vmax.f32 %v5924_v54, %v6095_v4  ;;  %v1385_v49 = vmax.f32 %v1289_v12, %v1369_v40  ;;  %v850_v25 = vmul.f32 %v7452_v61, %v5919_v41  ;;  %v7455_v33 = vld [vmem:[#allocation4_spill] sm:$0xff] }
 0x19e   :  { %v6120_v58 = vsel %vm656_vm0, %v7451_v62, %v649_v39  ;;  %v1284_v47 = vmax.f32 %v1188_v44, %v1268_v56  ;;  %v861_v37 = vmul.f32 %v5863_v51, %v5727_v29  ;;  %v7454_v54 = vrot.slane %v5919_v41, 1  ;;  %v7456_v56 = vld [vmem:[#allocation11_spill] sm:$0xff] }
 0x19f   :  { %v765_v60 = vmul.f32 %v7453_v31, %v6120_v58  ;;  %v6134_v16 = vmax.f32 %v1385_v49, %v1465_v36  ;;  %v866_v39 = vmax.f32 %v770_v32, %v850_v25  ;;  %v1368_v40 = vmul.f32 %v7457_v53, %v5629_v24  ;;  %v7459_v25 = vld [vmem:[#allocation18_spill] sm:$0xff]  ;;  %v7460_v31 = vld [vmem:[#allocation43_spill] sm:$0xff] }
 0x1a0   :  { %v6132_v12 = vsel %vm897_vm1, %v7454_v54, %v882_v9  ;;  %v1380_v44 = vmax.f32 %v1284_v47, %v1364_v13  ;;  %v1075_v62 = vmul.f32 %v7458_v6, %v6010_v52  ;;  %v6145_v9 = vpop.permute.xlu1 %967  ;;  %v1266_v32 = vmul.f32 %v7459_v25, %v6010_v52  ;;  %v7462_v13 = vld [vmem:[#allocation39_spill] sm:$0xff]  ;;  %v7463_v52 = vld [vmem:[#allocation13_spill] sm:$0xff]  ;;  %v7465_v6 = vld [vmem:[#allocation20_spill] sm:$0xff] }
 0x1a1   :  { %v979_v61 = vmul.f32 %v7455_v33, %v6132_v12  ;;  %v1170_v4 = vmul.f32 %v7456_v56, %v6132_v12  ;;  %v781_v51 = vmax.f32 %v5858_v17, %v765_v60  ;;  %v1362_v54 = vmul.f32 %v7460_v31, %v7425_v15  ;;  %v4859_v33 = vld [vmem:[%s6109_s25] sm:$0xff]   ;;  %v7461_v56 = vld [vmem:[#allocation52_spill] sm:$0xff]  ;;  %v7464_v15 = vld [vmem:[#allocation35_spill] sm:$0xff] }
 0x1a2   :  { %v6154_v24 = vmul.f32 %v7461_v56, %v5897_v57  ;;  %v6158_v47 = vmul.f32 %v7462_v13, %v5983_v18  ;;  %v1274_v60 = vmul.f32 %v5985_v5, %v5852_v46  ;;  %v1365_v53 = vmul.f32 %v7464_v15, %v5666_v26  ;;  %4523 = vmatprep.mubr.bf16.mxu1 %v4859_v33  ;;  %v7466_v31 = vld [vmem:[#allocation28_spill] sm:$0xff]  ;;  %v7470_v33 = vld [vmem:[#allocation10_spill] sm:$0xff] }
 0x1a3   :  { %v995_v49 = vmax.f32 %v866_v39, %v979_v61  ;;  %v1186_v36 = vmax.f32 %v1090_v28, %v1170_v4  ;;  %v6162_v39 = vmax.f32 %v781_v51, %v861_v37  ;;  %v1171_v61 = vmul.f32 %v7463_v52, %v6049_v8  ;;  %v7467_v13 = vld [vmem:[#allocation12_spill] sm:$0xff] }
 0x1a4   :  { %v1267_v25 = vmul.f32 %v7465_v6, %v5703_v3  ;;  %v1458_v56 = vmul.f32 %v7466_v31, %v6049_v8  ;;  %v1460_v46 = vmul.f32 %v7467_v13, %v5749_v59  ;;  %v1084_v5 = vmul.f32 %v5911_v55, %v5883_v63  ;;  %v7476_v13 = vld [vmem:[#allocation23_spill] sm:$0xff] }
 0x1a5   :  { %v1091_v28 = vmax.f32 %v995_v49, %v1075_v62  ;;  %v1282_v4 = vmax.f32 %v1186_v36, %v1266_v32  ;;  %v1381_v62 = vmax.f32 %v5824_v19, %v1365_v53  ;;  %v7468_v49 = vld [vmem:[#allocation42_spill] sm:$0xff]  ;;  %v1148_v36 = vpop.permute.xlu1 %1147  ;;  %v7469_v32 = vld [vmem:[#allocation25_spill] sm:$0xff]  ;;  %v1459_v8 = vmul.f32 %v7470_v33, %v5743_v35 }
 0x1a6   :  { %v1461_v26 = vmul.f32 %v7468_v49, %v5790_v34  ;;  %v1363_v3 = vmul.f32 %v7469_v32, %v5641_v10  ;;  %v1476_v52 = vmax.f32 %v1380_v44, %v1460_v46  ;;  %v6183_v15 = vmax.f32 %v1004_v42, %v1084_v5  ;;  %v7473_v10 = vld [vmem:[#allocation44_spill] sm:$0xff]  ;;  %v7474_v42 = vld [vmem:[#allocation62_spill] sm:$0xff] }
 0x1a7   :  { %v1187_v37 = vmax.f32 %v1091_v28, %v1171_v61  ;;  %v1378_v51 = vmax.f32 %v1282_v4, %v1362_v54  ;;  %v1496_v54 = vpack.c.bf16 %v6043_v1, %v5994_v50  ;;  %v7471_v19 = vrot.slane %v5727_v29, 1  ;;  %v7475_v50 = vld [vmem:[#allocation38_spill] sm:$0xff] }
 0x1a8   :  { %v1477_v55 = vmax.f32 %v1381_v62, %v1461_v26  ;;  %v7472_v34 = vrot.slane %v5846_v22, 1  ;;  %v1085_v35 = vmul.f32 %v7473_v10, %v6120_v58  ;;  %v1275_v44 = vmul.f32 %v7474_v42, %v5883_v63  ;;  %v1428_v42 = vpop.permute.xlu0 %1427 }
 0x1a9   :  { %v1283_v59 = vmax.f32 %v1187_v37, %v1267_v25  ;;  %v1474_v6 = vmax.f32 %v1378_v51, %v1458_v56  ;;  %v1384_v61 = vmax.f32 %v6030_v0, %v1368_v40  ;;  %v1464_v25 = vmul.f32 %v6025_v48, %v5681_v7  ;;  %v7479_v0 = vld [vmem:[#allocation29_spill] sm:$0xff]  ;;  %v1332_v37 = vpop.permute.xlu1 %1331  ;;  %v7480_v51 = vld [vmem:[#allocation64_spill] sm:$0xff] }
 0x1aa   :  { %v6193_v28 = vsel %vm897_vm1, %v7472_v34, %v7471_v19  ;;  %v1495_v53 = vpack.c.bf16 %v1477_v55, %v1476_v52  ;;  %v6204_v31 = vmax.f32 %v1195_v2, %v1275_v44  ;;  %v767_v56 = vmul.f32 %v6062_v45, %v5897_v57  ;;  %v7481_v2 = vld [vmem:[#allocation30_spill] sm:$0xff] }
 0x1ab   :  { %v1379_v4 = vmax.f32 %v1283_v59, %v1363_v3  ;;  %v989_v1 = vmul.f32 %v7475_v50, %v6193_v28  ;;  %v7477_v46 = vrot.slane %v7476_v13, 7  ;;  %v7478_v5 = vrot.slane %v5860_v11, 7 }
 0x1ac   :  { %v862_v40 = vmul.f32 %v7479_v0, %v5858_v17  ;;  %v6220_v7 = vmul.f32 %v7480_v51, %v5983_v18  ;;  %v1480_v45 = vmax.f32 %v1384_v61, %v1464_v25  ;;  %v895_v49 = vrot.slane %v7476_v13, 1  ;;  %v7488_v0 = vld [vmem:[#allocation21_spill] sm:$0xff] }
 0x1ad   :  { %v6214_v63 = vsel %vm656_vm0, %v7478_v5, %v7477_v46  ;;  %v1475_v48 = vmax.f32 %v1379_v4, %v1459_v8  ;;  %v1005_v62 = vmax.f32 %v7481_v2, %v989_v1  ;;  %v7482_v26 = vmax.f32 %v5860_v11, %v6079_v43 }
 0x1ae   :  { %v894_v3 = vrot.slane %v5860_v11, 1  ;;  %v1180_v33 = vmul.f32 %v1148_v36, %v6193_v28  ;;  %v783_v55 = vmax.f32 %v7476_v13, %v767_v56  ;;  %v1497_v19 = vpack.c.bf16 %v6134_v16, %v1480_v45 }
 0x1af   :  { %v878_v32 = vmax.f32 %v7482_v26, %v862_v40  ;;  %v1494_v52 = vpack.c.bf16 %v1475_v48, %v1474_v6  ;;  %v1101_v59 = vmax.f32 %v1005_v62, %v1085_v35  ;;  %v7483_v8 = vrot.slane %v5858_v17, 1  ;;  %v1336_v35 = vpop.permute.xlu1 %1335  ;;  %v7489_v40 = vld [vmem:[#allocation55_spill] sm:$0xff]  ;;  %v7490_v48 = vld [vmem:[#allocation34_spill] sm:$0xff] }
 0x1b0   :  { %v1196_v43 = vmax.f32 %v6183_v15, %v1180_v33  ;;  %v7484_v10 = vmax.f32 %v5877_v23, %v6073_v38  ;;  %v1370_v6 = vmul.f32 %v1332_v37, %v5633_v21  ;;  %v1371_v44 = vmul.f32 %v1336_v35, %v5846_v22  ;;  %v7485_v38 = vld [vmem:[#allocation31_spill] sm:$0xff] }
 0x1b1   :  { %v6237_v34 = vsel %vm897_vm1, %v7483_v8, %v894_v3  ;;  %4507 = vmatprep.subr.bf16.mxu1 %v1494_v52  ;;  %v1006_v61 = vmax.f32 %v6162_v39, %v6158_v47  ;;  %v1197_v4 = vmax.f32 %v1101_v59, %v6220_v7  ;;  %v1466_v15 = vmul.f32 %v1428_v42, %v6087_v20  ;;  %v1436_v8 = vpop.permute.xlu0 %1435 }
 0x1b2   :  { %v1290_v36 = vmax.f32 %v7484_v10, %v1274_v60  ;;  %v991_v16 = vmul.f32 %v6145_v9, %v6237_v34  ;;  %4508 = vmatpush3.bf16.msra.mxu1 %v1494_v52  ;;  %v768_v23 = vmul.f32 %v6104_v27, %v6214_v63  ;;  %v863_v60 = vmul.f32 %v7485_v38, %v5860_v11 }
 0x1b3   :  { %4509 = vmatprep.subr.bf16.mxu1 %v1495_v53  ;;  %v1387_v9 = vmax.f32 %v6204_v31, %v1371_v44  ;;  %v7486_v47 = vrot.slane %v7400_v14, 1  ;;  %v847_v39 = vpop.permute.xlu1 %846  ;;  %v7487_v31 = vld [vmem:[#allocation41_spill] sm:$0xff]  ;;  %v1089_v37 = vmul.f32 %v7489_v40, %v7488_v0 }
 0x1b4   :  { %v1386_v21 = vmax.f32 %v1290_v36, %v1370_v6  ;;  %v1007_v50 = vmax.f32 %v878_v32, %v991_v16  ;;  %v879_v1 = vmax.f32 %v783_v55, %v863_v60  ;;  %v784_v25 = vmax.f32 %v7400_v14, %v768_v23 }
 0x1b5   :  { %v6262_v20 = vsel %vm897_vm1, %v895_v49, %v7486_v47  ;;  %v864_v56 = vmul.f32 %v847_v39, %v7476_v13  ;;  %v1468_v36 = vmul.f32 %v1436_v8, %v5983_v18 }
 0x1b6   :  { %v1482_v22 = vmax.f32 %v1386_v21, %v1466_v15  ;;  %v1103_v27 = vmax.f32 %v1007_v50, %v6154_v24  ;;  %4510 = vmatpush3.bf16.msra.mxu1 %v1495_v53  ;;  %v993_v46 = vmul.f32 %v7487_v31, %v6262_v20  ;;  %v7491_v24 = vld [vmem:[#allocation8_spill] sm:$0xff]  ;;  %v7492_v53 = vld [vmem:[#allocation65_spill] sm:$0xff] }
 0x1b7   :  { %4511 = vmatprep.subr.bf16.mxu1 %v1496_v54  ;;  %v880_v5 = vmax.f32 %v784_v25, %v864_v56  ;;  %v1060_v7 = vpop.permute.xlu1 %1059  ;;  %v6274_v62 = vmul.f32 %v7492_v53, %v7491_v24 }
 0x1b8   :  { %v1086_v2 = vmul.f32 %v1060_v7, %v7490_v48  ;;  %v7494_v7 = vld [vmem:[#allocation15_spill] sm:$0xff] }
 0x1b9   :  { %v1009_v51 = vmax.f32 %v880_v5, %v993_v46 }
 0x1ba   :  { %4512 = vmatpush3.bf16.msra.mxu1 %v1496_v54  ;;  %v1102_v26 = vmax.f32 %v1006_v61, %v1086_v2  ;;  %v7493_v54 = vld [vmem:[#allocation48_spill] sm:$0xff] }
 0x1bb   :  { %4513 = vmatprep.subr.bf16.mxu1 %v1497_v19  ;;  %v6276_v45 = vmax.f32 %v1009_v51, %v1089_v37  ;;  %v1372_v59 = vmul.f32 %v7493_v54, %v5727_v29  ;;  %v899_v29 = vsel %vm897_vm1, %v894_v3, %v895_v49 }
 0x1bc   :  { %v1244_v33 = vpop.permute.xlu1 %1243 }
 0x1bd   :  { %v1201_v32 = vmax.f32 %v6276_v45, %v6274_v62  ;;  %v1276_v52 = vmul.f32 %v1244_v33, %v6120_v58  ;;  %v4862_v62 = vld [vmem:[%s6316_s29 + $0x8] sm:$0xff]   ;;  %v4864_v45 = vld [vmem:[%s6316_s29 + $0x18] sm:$0xff]  }
 0x1be   :  { %4514 = vmatpush3.bf16.msra.mxu1 %v1497_v19 }
 0x1bf   :  { %v1292_v55 = vmax.f32 %v1196_v43, %v1276_v52 }
 0x1c0   :  { %v1248_v10 = vpop.permute.xlu1 %1247 }
 0x1c1   :  { %v1388_v6 = vmax.f32 %v1292_v55, %v1372_v59  ;;  %v1277_v35 = vmul.f32 %v1248_v10, %v7490_v48  ;;  %v1280_v48 = vmul.f32 %v7494_v7, %v7488_v0 }
 0x1c3   :  { %v1293_v42 = vmax.f32 %v1197_v4, %v1277_v35  ;;  %v1484_v16 = vmax.f32 %v1388_v6, %v1468_v36 }
 0x1c5   :  { %v1432_v19 = vpop.permute.xlu1 %1431 }
 0x1c6   :  { %v1467_v44 = vmul.f32 %v1432_v19, %v6193_v28 }
 0x1c8   :  { %v1483_v61 = vmax.f32 %v1387_v9, %v1467_v44 }
 0x1ca   :  { %v972_v15 = vpop.permute.xlu1 %971  ;;  %v1498_v58 = vpack.c.bf16 %v1483_v61, %v1482_v22 }
 0x1cb   :  { %v992_v43 = vmul.f32 %v972_v15, %v899_v29 }
 0x1cc   :  { %4515 = vmatprep.subr.bf16.mxu1 %v1498_v58 }
 0x1cd   :  { %v1008_v18 = vmax.f32 %v879_v1, %v992_v43  ;;  %4516 = vmatpush3.bf16.msra.mxu1 %v1498_v58 }
 0x1cf   :  { %v1156_v23 = vpop.permute.xlu1 %1155 }
 0x1d0   :  { %v1182_v4 = vmul.f32 %v1156_v23, %v6237_v34 }
 0x1d2   :  { %v1198_v21 = vmax.f32 %v1102_v26, %v1182_v4  ;;  %v4865_v4 = vld [vmem:[%s6316_s29 + $0x20] sm:$0xff]  }
 0x1d3   :  { %v1160_v38 = vpop.permute.xlu1 %1159 }
 0x1d4   :  { %v1183_v28 = vmul.f32 %v1160_v38, %v899_v29  ;;  %v4866_v38 = vld [vmem:[%s6316_s29 + $0x28] sm:$0xff]  }
 0x1d6   :  { %v1199_v60 = vmax.f32 %v1103_v27, %v1183_v28  ;;  %v7496_v28 = vmov 2  }
 0x1d8   :  { %v1344_v50 = vpop.permute.xlu1 %1343 }
 0x1d9   :  { %v1373_v9 = vmul.f32 %v1344_v50, %v5858_v17  ;;  %v4867_v50 = vld [vmem:[%s6316_s29 + $0x30] sm:$0xff]  }
 0x1db   :  { %v1389_v47 = vmax.f32 %v1293_v42, %v1373_v9  ;;  %v7498_v9 = vmov 3  }
 0x1dd   :  { %v1068_v39 = vpop.permute.xlu1 %1067 }
 0x1de   :  { %v1088_v25 = vmul.f32 %v1068_v39, %v6214_v63  ;;  %v4868_v39 = vld [vmem:[%s6316_s29 + $0x38] sm:$0xff]  }
 0x1e0   :  { %v1104_v49 = vmax.f32 %v1008_v18, %v1088_v25  ;;  %v6345_v25 = vld [vmem:[%s4086_s3 + $0x18] sm:$0xff] }
 0x1e2   :  { %v1252_v3 = vpop.permute.xlu1 %1251 }
 0x1e3   :  { %v1278_v22 = vmul.f32 %v1252_v3, %v5897_v57  ;;  %v7500_v3 = vmov 6  }
 0x1e5   :  { %v1294_v1 = vmax.f32 %v1198_v21, %v1278_v22  ;;  %v6330_v21 = vld [vmem:[%s4086_s3] sm:$0xff]  ;;  %v7501_v22 = vmov 0  }
 0x1e6   :  { %v1256_v56 = vpop.permute.xlu1 %1255 }
 0x1e7   :  { %v1279_v31 = vmul.f32 %v1256_v56, %v6214_v63  ;;  %v7503_v56 = vmov 8  }
 0x1e9   :  { %v1295_v46 = vmax.f32 %v1199_v60, %v1279_v31  ;;  %v7497_v60 = vmov 1  }
 0x1eb   :  { %v1440_v5 = vpop.permute.xlu1 %1439 }
 0x1ec   :  { %v1469_v40 = vmul.f32 %v1440_v5, %v6237_v34  ;;  %v1448_v34 = vpop.permute.xlu0 %1447 }
 0x1ed   :  { %v1471_v54 = vmul.f32 %v1448_v34, %v6262_v20 }
 0x1ee   :  { %v1485_v27 = vmax.f32 %v1389_v47, %v1469_v40  ;;  %v6339_v47 = vld [vmem:[%s4086_s3 + $0x10] sm:$0xff] }
 0x1f0   :  { %v1164_v37 = vpop.permute.xlu1 %1163  ;;  %v1499_v51 = vpack.c.bf16 %v1485_v27, %v1484_v16  ;;  %v1452_v0 = vpop.permute.xlu0 %1451 }
 0x1f1   :  { %v1184_v17 = vmul.f32 %v1164_v37, %v6262_v20 }
 0x1f2   :  { %4517 = vmatprep.subr.bf16.mxu1 %v1499_v51 }
 0x1f3   :  { %v1200_v2 = vmax.f32 %v1104_v49, %v1184_v17  ;;  %4518 = vmatpush3.bf16.msra.mxu1 %v1499_v51  ;;  %v7499_v49 = vmov 5  }
 0x1f5   :  { %v1348_v57 = vpop.permute.xlu1 %1347  ;;  %v1296_v53 = vmax.f32 %v1200_v2, %v1280_v48 }
 0x1f6   :  { %v1374_v26 = vmul.f32 %v1348_v57, %v5860_v11  ;;  %v1472_v11 = vmul.f32 %v1452_v0, %v7491_v24  ;;  %v4860_v24 = vld [vmem:[%s6109_s25 + $0x8] sm:$0xff]   ;;  %s5029_s25 = smov 18  }
 0x1f8   :  { %v1390_v63 = vmax.f32 %v1294_v1, %v1374_v26  ;;  %v7502_v1 = vmov 7  }
 0x1f9   :  { %v1352_v33 = vpop.permute.xlu1 %1351 }
 0x1fa   :  { %v1375_v52 = vmul.f32 %v1352_v33, %v7476_v13  ;;  %v7495_v13 = vld [vmem:[#allocation49_spill] sm:$0xff] }
 0x1fc   :  { %v1391_v59 = vmax.f32 %v1295_v46, %v1375_v52 }
 0x1fe   :  { %v1487_v55 = vmax.f32 %v1391_v59, %v1471_v54  ;;  %v1264_v8 = vpop.permute.xlu1 %1263 }
 0x1ff   :  { %v1281_v44 = vmul.f32 %v1264_v8, %v7495_v13  ;;  %v1567_v13 = vld [vmem:[%s4087_s7] sm:$0x1]  ;;  %s4095_s7 = sld [smem:[%s7240_s0 + %s5025_s4]]  }
 0x200   :  { %s6790_s4 = sld [smem:[%s7240_s0 + %s5029_s25]]   ;;  %s5042_s25 = smov 29  }
 0x203   :  { %v1444_v10 = vpop.permute.xlu1 %1443 }
 0x204   :  { %v1470_v36 = vmul.f32 %v1444_v10, %v899_v29  ;;  %v1297_v29 = vmax.f32 %v1201_v32, %v1281_v44  ;;  %v6325_v32 = vld [vmem:[%s4086_s3 + $0x8] sm:$0xff]  ;;  %s5024_s3 = smov 112  }
 0x205   :  { %1876 = vperm.xlu1 %4789, %v6325_v32   ;;  %1917 = vperm.xlu0 %4791, %v6325_v32  }
 0x206   :  { %v1486_v6 = vmax.f32 %v1390_v63, %v1470_v36 }
 0x208   :  { %v1356_v35 = vpop.permute.xlu1 %1355  ;;  %v1500_v42 = vpack.c.bf16 %v1487_v55, %v1486_v6 }
 0x209   :  { %v1376_v16 = vmul.f32 %v1356_v35, %v7400_v14  ;;  %4790 = vset.pattern.permute.xlu1 %v7496_v28  ;;  %4792 = vset.pattern.permute.xlu0 %v7497_v60 }
 0x20a   :  { %4519 = vmatprep.subr.bf16.mxu1 %v1500_v42  ;;  %1913 = vperm.xlu1 %4790, %v6330_v21  }
 0x20b   :  { %v1392_v19 = vmax.f32 %v1296_v53, %v1376_v16  ;;  %4520 = vmatpush3.bf16.msra.mxu1 %v1500_v42  ;;  %1872 = vperm.xlu0 %4792, %v6330_v21  }
 0x20c   :  { %v1360_v20 = vpop.permute.xlu1 %1359 }
 0x20d   :  { %v1488_v61 = vmax.f32 %v1392_v19, %v1472_v11  ;;  %v1377_v15 = vmul.f32 %v1360_v20, %v5919_v41  ;;  %v4861_v41 = vld [vmem:[%s6316_s29] sm:$0xff]  }
 0x20e   :  { %4793 = vset.pattern.permute.xlu1 %v7498_v9 }
 0x20f   :  { %v1393_v43 = vmax.f32 %v1297_v29, %v1377_v15  ;;  %1953 = vperm.xlu1 %4793, %v6330_v21   ;;  %1880 = vperm.xlu0 %4792, %v6339_v47   ;;  %v7505_v29 = vld [vmem:[#allocation51_spill] sm:$0xff] }
 0x211   :  { %v1456_v58 = vpop.permute.xlu1 %1455 }
 0x212   :  { %v1473_v14 = vmul.f32 %v1456_v58, %v6132_v12  ;;  %v4863_v12 = vld [vmem:[%s6316_s29 + $0x10] sm:$0xff]   ;;  %s5020_s29 = smov 16  }
 0x213   :  { %1957 = vperm.xlu1 %4793, %v6325_v32   ;;  %4799 = vset.pattern.permute.xlu0 %v7498_v9  ;;  %s4096_s20 = sld [smem:[%s7240_s0 + %s5020_s29]]  }
 0x214   :  { %v1489_v18 = vmax.f32 %v1393_v43, %v1473_v14  ;;  %1965 = vperm.xlu0 %4799, %v6345_v25  }
 0x216   :  { %v1501_v23 = vpack.c.bf16 %v1489_v18, %v1488_v61  ;;  %v1568_v61 = vld [vmem:[%s4088_s11] sm:$0x1]  ;;  %s4093_s11 = sld [smem:[%s7240_s0 + %s5026_s8]]  }
 0x217   :  { %4794 = vset.pattern.permute.xlu1 %v7497_v60  ;;  %s4101_s8 = sld [smem:[%s7240_s0 + %s5030_s5]]  }
 0x218   :  { %4521 = vmatprep.subr.bf16.mxu1 %v1501_v23  ;;  %1884 = vperm.xlu1 %4794, %v6345_v25  }
 0x219   :  { %4522 = vmatpush3.bf16.msra.mxu1 %v1501_v23  ;;  %4800 = vset.pattern.permute.xlu0 %v7499_v49 }
 0x21a   :  { %4527 = vmatprep.subr.bf16.mxu1 %v4861_v41  ;;  %2009 = vperm.xlu0 %4800, %v6325_v32  }
 0x21c   :  { %4524 = vmatmul.mubr.bf16.vlgmr.msra.gmra.mrb[0].mxu1 %v4860_v24  ;;  %4795 = vset.pattern.permute.xlu1 %v7499_v49 }
 0x21d   :  { %4528 = vmatpush3.bf16.msra.mxu1 %v4861_v41  ;;  %2005 = vperm.xlu1 %4795, %v6330_v21  }
 0x21e   :  { %4529 = vmatprep.subr.bf16.mxu1 %v4862_v62  ;;  %2013 = vperm.xlu0 %4800, %v6339_v47  }
 0x221   :  { %4530 = vmatpush3.bf16.msra.mxu1 %v4862_v62  ;;  %4796 = vset.pattern.permute.xlu1 %v7496_v28 }
 0x222   :  { %4531 = vmatprep.subr.bf16.mxu1 %v4863_v12  ;;  %1921 = vperm.xlu1 %4796, %v6339_v47  }
 0x223   :  { %4802 = vset.pattern.permute.xlu0 %v7500_v3 }
 0x224   :  { %2037 = vperm.xlu0 %4802, %v6330_v21  }
 0x225   :  { %4532 = vmatpush3.bf16.msra.mxu1 %v4863_v12 }
 0x226   :  { %4533 = vmatprep.subr.bf16.mxu1 %v4864_v45  ;;  %1925 = vperm.xlu1 %4796, %v6345_v25  }
 0x228   :  { %2049 = vperm.xlu0 %4802, %v6345_v25  }
 0x229   :  { %4534 = vmatpush3.bf16.msra.mxu1 %v4864_v45 }
 0x22a   :  { %4535 = vmatprep.subr.bf16.mxu1 %v4865_v4  ;;  %4797 = vset.pattern.permute.xlu1 %v7500_v3 }
 0x22b   :  { %2041 = vperm.xlu1 %4797, %v6325_v32  }
 0x22c   :  { %4806 = vset.pattern.permute.xlu0 %v7501_v22 }
 0x22d   :  { %4536 = vmatpush3.bf16.msra.mxu1 %v4865_v4  ;;  %1840 = vperm.xlu0 %4806, %v6330_v21  }
 0x22e   :  { %4537 = vmatprep.subr.bf16.mxu1 %v4866_v38 }
 0x22f   :  { %4798 = vset.pattern.permute.xlu1 %v7498_v9 }
 0x230   :  { %1961 = vperm.xlu1 %4798, %v6339_v47  }
 0x231   :  { %4538 = vmatpush3.bf16.msra.mxu1 %v4866_v38  ;;  %1855 = vperm.xlu0 %4806, %v6345_v25  }
 0x232   :  { %4539 = vmatprep.subr.bf16.mxu1 %v4867_v50 }
 0x234   :  { %4801 = vset.pattern.permute.xlu1 %v7502_v1 }
 0x235   :  { %4540 = vmatpush3.bf16.msra.mxu1 %v4867_v50  ;;  %4809 = vset.pattern.permute.xlu0 %v7503_v56 }
 0x236   :  { %4541 = vmatprep.subr.bf16.mxu1 %v4868_v39  ;;  %2069 = vperm.xlu1 %4801, %v6330_v21  }
 0x237   :  { %2105 = vperm.xlu0 %4809, %v6325_v32  }
 0x239   :  { %4542 = vmatpush3.bf16.msra.mxu1 %v4868_v39 }
 0x23a   :  { %2073 = vperm.xlu1 %4801, %v6325_v32  }
 0x23b   :  { %2109 = vperm.xlu0 %4809, %v6339_v47  }
 0x23e   :  { %4803 = vset.pattern.permute.xlu1 %v7499_v49 }
 0x23f   :  { %4810 = vset.pattern.permute.xlu0 %v7497_v60  ;;  %2017 = vperm.xlu1 %4803, %v6345_v25  }
 0x243   :  { %4804 = vset.pattern.permute.xlu1 %v7500_v3 }
 0x244   :  { %2045 = vperm.xlu1 %4804, %v6339_v47  }
 0x248   :  { %4805 = vset.pattern.permute.xlu1 %v7502_v1 }
 0x249   :  { %2077 = vperm.xlu1 %4805, %v6339_v47  }
 0x24d   :  { %2081 = vperm.xlu1 %4805, %v6345_v25  }
 0x251   :  { %4807 = vset.pattern.permute.xlu1 %v7501_v22  ;;  %v4875_v22 = vld [vmem:[%s6443_s19 + $0x58] sm:$0xff]  }
 0x252   :  { %1845 = vperm.xlu1 %4807, %v6325_v32  }
 0x256   :  { %1850 = vperm.xlu1 %4807, %v6339_v47  }
 0x25a   :  { %4808 = vset.pattern.permute.xlu1 %v7503_v56 }
 0x25b   :  { %2101 = vperm.xlu1 %4808, %v6330_v21  }
 0x25f   :  { %2113 = vperm.xlu1 %4808, %v6345_v25  }
 0x263   :  { %4811 = vset.pattern.permute.xlu1 %v7496_v28 }
 0x284   :  { %v6428_v47 = vpop.permute.xlu1 %1876 }
 0x285   :  { %7506 = vst [vmem:[#allocation26_spill] sm:$0xff] %v6428_v47 }
 0x289   :  { %v6430_v39 = vpop.permute.xlu1 %1913 }
 0x28e   :  { %v6432_v25 = vpop.permute.xlu1 %1953 }
 0x2ef   :  { %v6380_v31 = vpop.f32.mrb[0].mxu1 }
 0x2f0   :  { %v6382_v46 = vpop.f32.mrb[1].mxu1  ;;  %v1632_v17 = vmul.f32 %v6380_v31, %v6380_v31 }
 0x2f1   :  { %v6384_v5 = vpop.f32.mrb[2].mxu1  ;;  %v1630_v27 = vmul.f32 %v6382_v46, %v6382_v46 }
 0x2f2   :  { %7504 = vst [vmem:[#allocation36_spill] sm:$0xff] %v6384_v5  ;;  %v6387_v40 = vpop.f32.mrb[3].mxu1  ;;  %v1633_v2 = vmul.f32 %v6384_v5, %v6384_v5 }
 0x2f3   :  { %v1619_v37 = vadd.f32 %v6387_v40, %v6382_v46  ;;  %v1631_v51 = vmul.f32 %v6387_v40, %v6387_v40 }
 0x2f5   :  { %v1620_v7 = vadd.f32 %v6380_v31, %v1619_v37  ;;  %v1634_v48 = vadd.f32 %v1631_v51, %v1630_v27  ;;  %v6434_v27 = vpop.permute.xlu1 %1957 }
 0x2f7   :  { %v1621_v57 = vadd.f32 %v6384_v5, %v1620_v7  ;;  %v1635_v53 = vadd.f32 %v1634_v48, %v1632_v17  ;;  %v4869_v7 = vld [vmem:[%s6443_s19 + $0x40] sm:$0xff]  }
 0x2f8   :  { %v4870_v48 = vld [vmem:[%s6443_s19] sm:$0xff]   ;;  %4355 = vmatprep.subr.bf16.mxu0 %v4869_v7 }
 0x2f9   :  { %v1622_v26 = vrot.slane %v1621_v57, 4  ;;  %v1636_v63 = vadd.f32 %v1635_v53, %v1633_v2  ;;  %v6436_v37 = vpop.permute.xlu1 %1884  ;;  %4356 = vmatpush3.bf16.msra.mxu0 %v4870_v48 }
 0x2fb   :  { %v1623_v33 = vadd.f32 %v1622_v26, %v1621_v57  ;;  %v1637_v52 = vrot.slane %v1636_v63, 4  ;;  %v6451_v57 = vpop.permute.xlu0 %1917 }
 0x2fc   :  { %7507 = vst [vmem:[#allocation27_spill] sm:$0xff] %v6451_v57 }
 0x2fd   :  { %v1624_v34 = vrot.slane %v1623_v33, 2  ;;  %v1638_v54 = vadd.f32 %v1637_v52, %v1636_v63  ;;  %v6438_v51 = vpop.permute.xlu1 %2005 }
 0x2ff   :  { %v1625_v59 = vadd.f32 %v1624_v34, %v1623_v33  ;;  %v1639_v55 = vrot.slane %v1638_v54, 2 }
 0x301   :  { %v1626_v8 = vrot.slane %v1625_v59, 1  ;;  %v1640_v10 = vadd.f32 %v1639_v55, %v1638_v54  ;;  %v6445_v17 = vpop.permute.xlu1 %1921 }
 0x303   :  { %v1627_v36 = vadd.f32 %v1626_v8, %v1625_v59  ;;  %v1641_v6 = vrot.slane %v1640_v10, 1 }
 0x305   :  { %v1629_v0 = vmul.f32 0.03125, %v1627_v36  ;;  %v1642_v35 = vadd.f32 %v1641_v6, %v1640_v10  ;;  %v6449_v2 = vpop.permute.xlu1 %1925  ;;  %v6460_v36 = vpop.permute.xlu0 %1872 }
 0x306   :  { %7508 = vst [vmem:[#allocation58_spill] sm:$0xff] %v6460_v36 }
 0x307   :  { %v1643_v42 = vmul.f32 0.03125, %v1642_v35  ;;  %v1644_v16 = vmul.f32 %v1629_v0, %v1629_v0 }
 0x309   :  { %v1645_v11 = vsub.f32 %v1643_v42, %v1644_v16  ;;  %v6455_v26 = vpop.permute.xlu1 %2041 }
 0x30b   :  { %v1646_v19 = vadd.f32 1e-05, %v1645_v11 }
 0x30d   :  { %4975 = vrsqrt.f32 %v1646_v19  ;;  %v6462_v6 = vpop.permute.xlu1 %1961 }
 0x317   :  { %v4976_v44 = vpop.eup %4975 }
 0x318   :  { %v1648_v20 = vmul.f32 %v4976_v44, %v1567_v13  ;;  %v6464_v44 = vpop.permute.xlu0 %1880 }
 0x31a   :  { %v1649_v15 = vmul.f32 %v1648_v20, %v1629_v0  ;;  %v1655_v58 = vrot.slane %v1648_v20, %v7505_v29  ;;  %v6466_v20 = vpop.permute.xlu1 %2069 }
 0x31c   :  { %v1658_v43 = vmul.f32 %v1655_v58, %v6387_v40  ;;  %v1650_v14 = vsub.f32 %v1568_v61, %v1649_v15  ;;  %v1657_v18 = vmul.f32 %v1655_v58, %v6382_v46  ;;  %v1659_v23 = vmul.f32 %v6380_v31, %v1655_v58 }
 0x31d   :  { %v1660_v24 = vmul.f32 %v6384_v5, %v1655_v58 }
 0x31e   :  { %v1665_v41 = vrot.slane %v1650_v14, %v7505_v29 }
 0x320   :  { %v1667_v62 = vadd.f32 %v1665_v41, %v1657_v18  ;;  %v1668_v12 = vadd.f32 %v1665_v41, %v1658_v43  ;;  %v1669_v45 = vadd.f32 %v1665_v41, %v1659_v23  ;;  %v1670_v32 = vadd.f32 %v1665_v41, %v1660_v24  ;;  %v6468_v23 = vpop.permute.xlu0 %1965  ;;  %v6470_v24 = vpop.permute.xlu1 %2073 }
 0x322   :  { %v1671_v4 = vmax.f32 %v1667_v62, 0.0  ;;  %v1672_v21 = vmax.f32 %v1668_v12, 0.0  ;;  %v1673_v38 = vmax.f32 %v1669_v45, 0.0  ;;  %v1674_v28 = vmax.f32 %v1670_v32, 0.0 }
 0x324   :  { %v1675_v60 = vpack.c.bf16 %v1672_v21, %v1671_v4  ;;  %v1676_v50 = vpack.c.bf16 %v1674_v28, %v1673_v38  ;;  %v6472_v21 = vpop.permute.xlu0 %2009  ;;  %v6474_v38 = vpop.permute.xlu1 %2017 }
 0x326   :  { %4543 = vmatprep.mubr.bf16.mxu1 %v1675_v60 }
 0x327   :  { %4544 = vmatmul.mubr.bf16.vlgmr.msra.gmra.mrb[4].mxu1 %v1676_v50 }
 0x328   :  { %v6479_v50 = vpop.permute.xlu0 %2013  ;;  %v6481_v7 = vpop.permute.xlu1 %2045 }
 0x329   :  { %7509 = vst [vmem:[#allocation14_spill] sm:$0xff] %v6481_v7 }
 0x32c   :  { %v6486_v48 = vpop.permute.xlu0 %2037 }
 0x3fa   :  { %v6453_v53 = vpop.f32.mrb[4].mxu1 }
 0x3fb   :  { %v1759_v63 = vpop.f32.mrb[5].mxu1  ;;  %v1786_v55 = vmul.f32 %v6453_v53, %v6453_v53 }
 0x3fc   :  { %v4546_v33 = vpop.f32.mrb[6].mxu1  ;;  %v1784_v34 = vmul.f32 %v1759_v63, %v1759_v63 }
 0x3fd   :  { %v1762_v52 = vpop.f32.mrb[7].mxu1  ;;  %v1787_v0 = vmul.f32 %v4546_v33, %v4546_v33 }
 0x3fe   :  { %v1774_v54 = vadd.f32 %v1762_v52, %v1759_v63  ;;  %v1785_v59 = vmul.f32 %v1762_v52, %v1762_v52 }
 0x400   :  { %v1775_v8 = vadd.f32 %v6453_v53, %v1774_v54  ;;  %v1788_v10 = vadd.f32 %v1785_v59, %v1784_v34  ;;  %v6488_v34 = vpop.permute.xlu1 %2077  ;;  %v1585_v54 = vld [vmem:[%s4090_s23] sm:$0x1]  ;;  %v4871_v59 = vld [vmem:[%s6443_s19 + $0x48] sm:$0xff]   ;;  %s5036_s23 = smov 26  }
 0x401   :  { %7510 = vst [vmem:[#allocation53_spill] sm:$0xff] %v6488_v34  ;;  %4357 = vmatprep.subr.bf16.mxu0 %v4871_v59  ;;  %s6997_s26 = sld [smem:[%s7240_s0 + %s5036_s23]]  }
 0x402   :  { %v1776_v35 = vadd.f32 %v4546_v33, %v1775_v8  ;;  %v1789_v42 = vadd.f32 %v1788_v10, %v1786_v55  ;;  %v4872_v55 = vld [vmem:[%s6443_s19 + $0x8] sm:$0xff]  }
 0x403   :  { %4358 = vmatpush3.bf16.msra.mxu0 %v4872_v55 }
 0x404   :  { %v1777_v16 = vrot.slane %v1776_v35, 4  ;;  %v1790_v11 = vadd.f32 %v1789_v42, %v1787_v0  ;;  %v1586_v0 = vld [vmem:[%s4091_s27] sm:$0x1]  ;;  %v6494_v42 = vpop.permute.xlu1 %2081  ;;  %s5037_s27 = smov 23  }
 0x405   :  { %7512 = vst [vmem:[#allocation40_spill] sm:$0xff] %v6494_v42  ;;  %s4103_s6 = sld [smem:[%s7240_s0 + %s5037_s27]]   ;;  %s5050_s27 = smov 37  }
 0x406   :  { %v1778_v19 = vadd.f32 %v1777_v16, %v1776_v35  ;;  %v1791_v13 = vrot.slane %v1790_v11, 4  ;;  %v6492_v35 = vpop.permute.xlu0 %2049  ;;  %s4117_s5 = sld [smem:[%s7240_s0 + %s5050_s27]]  }
 0x407   :  { %7511 = vst [vmem:[#allocation37_spill] sm:$0xff] %v6492_v35 }
 0x408   :  { %v1779_v61 = vrot.slane %v1778_v19, 2  ;;  %v1792_v15 = vadd.f32 %v1791_v13, %v1790_v11 }
 0x40a   :  { %v1780_v58 = vadd.f32 %v1779_v61, %v1778_v19  ;;  %v1793_v43 = vrot.slane %v1792_v15, 2 }
 0x40c   :  { %v1781_v14 = vrot.slane %v1780_v58, 1  ;;  %v1794_v18 = vadd.f32 %v1793_v43, %v1792_v15 }
 0x40e   :  { %v1782_v41 = vadd.f32 %v1781_v14, %v1780_v58  ;;  %v1795_v62 = vrot.slane %v1794_v18, 1  ;;  %v4873_v14 = vld [vmem:[%s6443_s19 + $0x50] sm:$0xff]  }
 0x40f   :  { %4359 = vmatprep.subr.bf16.mxu0 %v4873_v14 }
 0x410   :  { %v1783_v12 = vmul.f32 0.03125, %v1782_v41  ;;  %v1796_v45 = vadd.f32 %v1795_v62, %v1794_v18  ;;  %v6500_v18 = vpop.permute.xlu0 %1840  ;;  %v6502_v41 = vpop.permute.xlu1 %1845 }
 0x412   :  { %v1797_v32 = vmul.f32 0.03125, %v1796_v45  ;;  %v1798_v4 = vmul.f32 %v1783_v12, %v1783_v12 }
 0x414   :  { %v1799_v28 = vsub.f32 %v1797_v32, %v1798_v4 }
 0x416   :  { %v1800_v60 = vadd.f32 1e-05, %v1799_v28 }
 0x418   :  { %4977 = vrsqrt.f32 %v1800_v60 }
 0x422   :  { %v4978_v8 = vpop.eup %4977 }
 0x423   :  { %v1802_v10 = vmul.f32 %v4978_v8, %v1585_v54 }
 0x425   :  { %v1803_v16 = vmul.f32 %v1802_v10, %v1783_v12  ;;  %v1809_v11 = vrot.slane %v1802_v10, %v7505_v29 }
 0x427   :  { %v1804_v19 = vsub.f32 %v1586_v0, %v1803_v16  ;;  %v1812_v13 = vmul.f32 %v1809_v11, %v1762_v52  ;;  %v1811_v61 = vmul.f32 %v1809_v11, %v1759_v63  ;;  %v1814_v15 = vmul.f32 %v4546_v33, %v1809_v11  ;;  %v6527_v16 = vpop.permute.xlu0 %1855 }
 0x428   :  { %v1813_v58 = vmul.f32 %v6453_v53, %v1809_v11  ;;  %v4874_v53 = vld [vmem:[%s6443_s19 + $0x10] sm:$0xff]   ;;  %7513 = vst [vmem:[#allocation17_spill] sm:$0xff] %v6527_v16  ;;  %v6529_v11 = vpop.permute.xlu1 %1850 }
 0x429   :  { %v1819_v43 = vrot.slane %v1804_v19, %v7505_v29  ;;  %4360 = vmatpush3.bf16.msra.mxu0 %v4874_v53 }
 0x42a   :  { %4361 = vmatprep.subr.bf16.mxu0 %v4875_v22 }
 0x42b   :  { %v1822_v62 = vadd.f32 %v1819_v43, %v1812_v13  ;;  %v1821_v45 = vadd.f32 %v1819_v43, %v1811_v61  ;;  %v1824_v32 = vadd.f32 %v1819_v43, %v1814_v15  ;;  %v1823_v12 = vadd.f32 %v1819_v43, %v1813_v58  ;;  %v6575_v56 = vpop.permute.xlu0 %2105 }
 0x42c   :  { %v6577_v1 = vpop.permute.xlu1 %2101 }
 0x42d   :  { %v6504_v4 = vmax.f32 %v1822_v62, 0.0  ;;  %v6506_v52 = vmax.f32 %v1821_v45, 0.0  ;;  %v6508_v63 = vmax.f32 %v1824_v32, 0.0  ;;  %v6510_v33 = vmax.f32 %v1823_v12, 0.0  ;;  %7514 = vst [vmem:[#allocation2_spill] sm:$0xff] %v6577_v1 }
 0x42f   :  { %v7298_v28 = vrot.slane %v6506_v52, 5  ;;  %v1904_v60 = vrot.slane %v6504_v4, 5  ;;  %v1862_v54 = vrot.slane %v6506_v52, 4  ;;  %v1865_v59 = vrot.slane %v6508_v63, 4  ;;  %1988 = vrot.lane.b32.xlu0 %v6510_v33, %s5019_s28  ;;  %1984 = vrot.lane.b32.xlu1 %v6506_v52, %s5019_s28  ;;  %v6617_v29 = vpop.permute.xlu0 %2109 }
 0x430   :  { %v7297_v55 = vrot.slane %v6504_v4, 7  ;;  %v1946_v8 = vrot.slane %v6510_v33, 7  ;;  %v1863_v10 = vrot.slane %v6504_v4, 4  ;;  %v1864_v0 = vrot.slane %v6510_v33, 4 }
 0x431   :  { %v1910_v19 = vsel %vm1907_vm2, %v7298_v28, %v1904_v60  ;;  %v6537_v13 = vsel %vm1866_vm3, %v1865_v59, %v1862_v54  ;;  %v1947_v61 = vrot.slane %v6508_v63, 7  ;;  %v1997_v62 = vrot.slane %v6504_v4, 1 }
 0x432   :  { %v6544_v15 = vsel %vm656_vm0, %v7297_v55, %v1946_v8  ;;  %v6548_v58 = vsel %vm1866_vm3, %v1863_v10, %v1864_v0  ;;  %v6552_v43 = vsel %vm1866_vm3, %v1862_v54, %v1863_v10  ;;  %v1998_v32 = vrot.slane %v6510_v33, 1 }
 0x433   :  { %v6556_v14 = vsel %vm656_vm0, %v1946_v8, %v1947_v61  ;;  %1986 = vrot.lane.b32.xlu1 %v6504_v4, %s5019_s28  ;;  %v1888_v45 = vmul.f32 %v6428_v47, %v6552_v43  ;;  %v1996_v12 = vrot.slane %v6506_v52, 1  ;;  %v1999_v53 = vrot.slane %v6508_v63, 1 }
 0x434   :  { %v1831_v54 = vrot.slane %v6510_v33, 3  ;;  %v1832_v8 = vrot.slane %v6508_v63, 3  ;;  %v1829_v10 = vrot.slane %v6506_v52, 3  ;;  %v1830_v55 = vrot.slane %v6504_v4, 3 }
 0x435   :  { %v6573_v28 = vsel %vm1866_vm3, %v1864_v0, %v1865_v59  ;;  %1893 = vrot.lane.b32.xlu0 %v1888_v45, %s5020_s29  ;;  %v2001_v3 = vsel %vm897_vm1, %v1997_v62, %v1998_v32  ;;  %v6585_v49 = vsel %vm897_vm1, %v1999_v53, %v1996_v12  ;;  %v6589_v59 = vsel %vm897_vm1, %v1998_v32, %v1999_v53  ;;  %v4876_v53 = vld [vmem:[%s6443_s19 + $0x18] sm:$0xff]  }
 0x436   :  { %v1929_v0 = vmul.f32 %v6451_v57, %v1910_v19  ;;  %v6596_v45 = vsel %vm1833_vm4, %v1831_v54, %v1832_v8  ;;  %v1887_v9 = vmul.f32 %v6460_v36, %v6537_v13  ;;  %v6602_v47 = vsel %vm1833_vm4, %v1829_v10, %v1830_v55  ;;  %4362 = vmatpush3.bf16.msra.mxu0 %v4876_v53 }
 0x437   :  { %1990 = vrot.lane.b32.xlu1 %v6508_v63, %s5019_s28  ;;  %v6606_v32 = vsel %vm1833_vm4, %v1832_v8, %v1829_v10  ;;  %v6612_v57 = vsel %vm1833_vm4, %v1830_v55, %v1831_v54  ;;  %v1905_v22 = vrot.slane %v6510_v33, 5  ;;  %v2116_v36 = vmul.f32 %v6577_v1, %v1910_v19  ;;  %v6620_v8 = vpop.permute.xlu1 %2113  ;;  %v4877_v54 = vld [vmem:[%s6443_s19 + $0x60] sm:$0xff]  }
 0x438   :  { %v1906_v5 = vrot.slane %v6508_v63, 5  ;;  %v2002_v55 = vsel %vm897_vm1, %v1996_v12, %v1997_v62  ;;  %v7515_v19 = vrot.slane %v6506_v52, 5  ;;  %v7516_v12 = vrot.slane %v6504_v4, 7  ;;  %4363 = vmatprep.subr.bf16.mxu0 %v4877_v54  ;;  %v4880_v54 = vld [vmem:[%s6443_s19 + $0x28] sm:$0xff]  }
 0x439   :  { %1934 = vrot.lane.b32.xlu0 %v1929_v0, %s5015_s12  ;;  %v1909_v10 = vsel %vm1907_vm2, %v1904_v60, %v1905_v22  ;;  %v1944_v0 = vrot.slane %v6506_v52, 7  ;;  %v1889_v4 = vmul.f32 %v6464_v44, %v6548_v58 }
 0x43a   :  { %v1908_v33 = vsel %vm1907_vm2, %v1905_v22, %v1906_v5  ;;  %v1911_v63 = vsel %vm1907_vm2, %v1906_v5, %v7515_v19 }
 0x43b   :  { %1891 = vrot.lane.b32.xlu1 %v1887_v9, %s5020_s29  ;;  %v2117_v9 = vmul.f32 %v6575_v56, %v1909_v10  ;;  %v6636_v53 = vmul.f32 %v6617_v29, %v1908_v33  ;;  %v1928_v60 = vmul.f32 %v6430_v39, %v1911_v63  ;;  %v6640_v1 = vmul.f32 %v6620_v8, %v1911_v63  ;;  %v4878_v63 = vld [vmem:[%s6443_s19 + $0x20] sm:$0xff]  }
 0x43c   :  { %v1950_v22 = vsel %vm656_vm0, %v1944_v0, %v7516_v12  ;;  %v1951_v52 = vsel %vm656_vm0, %v1947_v61, %v1944_v0  ;;  %4364 = vmatpush3.bf16.msra.mxu0 %v4878_v63  ;;  %v4879_v61 = vld [vmem:[%s6443_s19 + $0x68] sm:$0xff]   ;;  %v1890_v0 = vmul.f32 %v6436_v37, %v6573_v28  ;;  %v4881_v12 = vld [vmem:[%s6443_s19 + $0x70] sm:$0xff]   ;;  %v1971_v63 = vmul.f32 %v6468_v23, %v6556_v14 }
 0x43d   :  { %v2121_v62 = vpack.c.bf16 %v2117_v9, %v2116_v36  ;;  %v1969_v19 = vmul.f32 %v6434_v27, %v1950_v22  ;;  %v1968_v36 = vmul.f32 %v6432_v25, %v1951_v52  ;;  %4365 = vmatprep.subr.bf16.mxu0 %v4879_v61  ;;  %v2020_v9 = vmul.f32 %v6438_v51, %v2002_v55  ;;  %v4883_v52 = vld [vmem:[%s6443_s19 + $0x78] sm:$0xff]  }
 0x43e   :  { %v1931_v22 = vmul.f32 %v6449_v2, %v1908_v33  ;;  %v2052_v55 = vmul.f32 %v6486_v48, %v6602_v47  ;;  %v4884_v33 = vld [vmem:[%s6443_s19 + $0x38] sm:$0xff]   ;;  %v2023_v14 = vmul.f32 %v6474_v38, %v6585_v49  ;;  %v2087_v49 = vmul.f32 %v6494_v42, %v6537_v13 }
 0x43f   :  { %1932 = vrot.lane.b32.xlu1 %v1928_v60, %s5015_s12  ;;  %2252 = vmatprep.mubr.bf16.mxu0 %v2121_v62  ;;  %v2021_v60 = vmul.f32 %v6472_v21, %v2001_v3  ;;  %v1930_v62 = vmul.f32 %v6445_v17, %v1909_v10  ;;  %v4882_v3 = vld [vmem:[%s6443_s19 + $0x30] sm:$0xff]   ;;  %v1970_v10 = vmul.f32 %v6462_v6, %v6544_v15  ;;  %s5035_s19 = smov 22  }
 0x440   :  { %1974 = vrot.lane.b32.xlu0 %v1969_v19, %s5021_s30  ;;  %4366 = vmatpush3.bf16.msra.mxu0 %v4880_v54  ;;  %v2053_v19 = vmul.f32 %v6455_v26, %v6612_v57  ;;  %v2022_v15 = vmul.f32 %v6479_v50, %v6589_v59  ;;  %v2086_v59 = vmul.f32 %v6488_v34, %v6573_v28  ;;  %s4102_s22 = sld [smem:[%s7240_s0 + %s5035_s19]]  }
 0x441   :  { %4367 = vmatprep.subr.bf16.mxu0 %v4881_v12  ;;  %v1858_v13 = vmul.f32 %v6500_v18, %v6606_v32 }
 0x443   :  { %1972 = vrot.lane.b32.xlu1 %v1968_v36, %s5021_s30  ;;  %v2084_v36 = vmul.f32 %v6466_v20, %v6552_v43  ;;  %v2054_v43 = vmul.f32 %v6481_v7, %v6596_v45 }
 0x444   :  { %1895 = vrot.lane.b32.xlu0 %v1889_v4, %s5020_s29  ;;  %4368 = vmatpush3.bf16.msra.mxu0 %v4882_v3  ;;  %v2085_v4 = vmul.f32 %v6470_v24, %v6548_v58  ;;  %v2055_v58 = vmul.f32 %v6492_v35, %v6606_v32  ;;  %v1861_v32 = vmul.f32 %v6527_v16, %v6596_v45 }
 0x445   :  { %4369 = vmatprep.subr.bf16.mxu0 %v4883_v52 }
 0x447   :  { %1897 = vrot.lane.b32.xlu1 %v1890_v0, %s5020_s29 }
 0x448   :  { %2024 = vrot.lane.b32.xlu0 %v2020_v9, %s5022_s1  ;;  %4370 = vmatpush3.bf16.msra.mxu0 %v4884_v33  ;;  %v1859_v33 = vmul.f32 %v6502_v41, %v6602_v47  ;;  %v1860_v47 = vmul.f32 %v6529_v11, %v6612_v57  ;;  %v7517_v57 = vpack.c.bf16 %v6640_v1, %v6636_v53  ;;  %v4885_v1 = vld [vmem:[%s4095_s7] sm:$0xff]   ;;  %v4886_v53 = vld [vmem:[%s4095_s7 + $0x8] sm:$0xff]  }
 0x449   :  { %4547 = vmatprep.subr.bf16.mxu1 %v4885_v1 }
 0x44a   :  { %4548 = vmatpush3.bf16.msra.mxu1 %v4885_v1 }
 0x44b   :  { %2026 = vrot.lane.b32.xlu1 %v2021_v60, %s5022_s1  ;;  %4549 = vmatprep.subr.bf16.mxu1 %v4886_v53 }
 0x44c   :  { %1936 = vrot.lane.b32.xlu0 %v1930_v62, %s5015_s12 }
 0x44e   :  { %4550 = vmatpush3.bf16.msra.mxu1 %v4886_v53 }
 0x44f   :  { %1938 = vrot.lane.b32.xlu1 %v1931_v22, %s5015_s12 }
 0x450   :  { %2056 = vrot.lane.b32.xlu0 %v2052_v55, %s5023_s2 }
 0x453   :  { %2058 = vrot.lane.b32.xlu1 %v2053_v19, %s5023_s2 }
 0x454   :  { %1976 = vrot.lane.b32.xlu0 %v1970_v10, %s5021_s30 }
 0x457   :  { %1978 = vrot.lane.b32.xlu1 %v1971_v63, %s5021_s30 }
 0x458   :  { %2088 = vrot.lane.b32.xlu0 %v2084_v36, %s5024_s3 }
 0x45b   :  { %2090 = vrot.lane.b32.xlu1 %v2085_v4, %s5024_s3 }
 0x45c   :  { %2028 = vrot.lane.b32.xlu0 %v2022_v15, %s5022_s1 }
 0x45f   :  { %2030 = vrot.lane.b32.xlu1 %v2023_v14, %s5022_s1 }
 0x460   :  { %2060 = vrot.lane.b32.xlu0 %v2054_v43, %s5023_s2 }
 0x463   :  { %2062 = vrot.lane.b32.xlu1 %v2055_v58, %s5023_s2 }
 0x464   :  { %2092 = vrot.lane.b32.xlu0 %v2086_v59, %s5024_s3 }
 0x467   :  { %2094 = vrot.lane.b32.xlu1 %v2087_v49, %s5024_s3 }
 0x4a1   :  { %v1985_v61 = vpop.permute.xlu1 %1984  ;;  %v1989_v0 = vpop.permute.xlu0 %1988 }
 0x4a5   :  { %v1987_v9 = vpop.permute.xlu1 %1986 }
 0x4a7   :  { %v1894_v54 = vpop.permute.xlu0 %1893 }
 0x4a8   :  { %v1900_v4 = vadd.f32 %v1894_v54, %v1859_v33 }
 0x4a9   :  { %v1991_v60 = vpop.permute.xlu1 %1990 }
 0x4ab   :  { %v1935_v12 = vpop.permute.xlu0 %1934 }
 0x4ac   :  { %v1941_v43 = vadd.f32 %v1935_v12, %v1900_v4 }
 0x4ad   :  { %v1892_v62 = vpop.permute.xlu1 %1891 }
 0x4ae   :  { %v1899_v63 = vadd.f32 %v1892_v62, %v1858_v13 }
 0x4b1   :  { %v1933_v22 = vpop.permute.xlu1 %1932 }
 0x4b2   :  { %v1975_v55 = vpop.permute.xlu0 %1974  ;;  %v1940_v15 = vadd.f32 %v1933_v22, %v1899_v63 }
 0x4b3   :  { %v1981_v49 = vadd.f32 %v1975_v55, %v1941_v43 }
 0x4b5   :  { %v1973_v3 = vpop.permute.xlu1 %1972  ;;  %v1993_v7 = vadd.f32 %v1987_v9, %v1981_v49 }
 0x4b6   :  { %v1896_v28 = vpop.permute.xlu0 %1895  ;;  %v1980_v58 = vadd.f32 %v1973_v3, %v1940_v15 }
 0x4b7   :  { %v1901_v22 = vadd.f32 %v1896_v28, %v1860_v47  ;;  %v4891_v47 = vld [vmem:[%s4095_s7 + $0x30] sm:$0xff]  }
 0x4b8   :  { %v1992_v34 = vadd.f32 %v1985_v61, %v1980_v58 }
 0x4b9   :  { %v1898_v52 = vpop.permute.xlu1 %1897 }
 0x4ba   :  { %v2025_v19 = vpop.permute.xlu0 %2024  ;;  %v1902_v33 = vadd.f32 %v1898_v52, %v1861_v32  ;;  %v4890_v32 = vld [vmem:[%s4095_s7 + $0x28] sm:$0xff]  }
 0x4bb   :  { %v2032_v62 = vadd.f32 %v2025_v19, %v1992_v34 }
 0x4bd   :  { %v2027_v10 = vpop.permute.xlu1 %2026 }
 0x4be   :  { %v1937_v36 = vpop.permute.xlu0 %1936  ;;  %v2033_v13 = vadd.f32 %v2027_v10, %v1993_v7 }
 0x4bf   :  { %v1942_v55 = vadd.f32 %v1937_v36, %v1901_v22 }
 0x4c1   :  { %v1939_v14 = vpop.permute.xlu1 %1938 }
 0x4c2   :  { %v2057_v59 = vpop.permute.xlu0 %2056  ;;  %v1943_v4 = vadd.f32 %v1939_v14, %v1902_v33 }
 0x4c3   :  { %v2064_v12 = vadd.f32 %v2057_v59, %v2032_v62  ;;  %v4892_v62 = vld [vmem:[%s4095_s7 + $0x38] sm:$0xff]  }
 0x4c5   :  { %v2059_v5 = vpop.permute.xlu1 %2058 }
 0x4c6   :  { %v1977_v42 = vpop.permute.xlu0 %1976  ;;  %v2065_v3 = vadd.f32 %v2059_v5, %v2033_v13 }
 0x4c7   :  { %v1982_v43 = vadd.f32 %v1977_v42, %v1942_v55 }
 0x4c9   :  { %v1979_v35 = vpop.permute.xlu1 %1978  ;;  %v1994_v7 = vadd.f32 %v1989_v0, %v1982_v43  ;;  %v4887_v0 = vld [vmem:[%s4095_s7 + $0x10] sm:$0xff]  }
 0x4ca   :  { %v2089_v54 = vpop.permute.xlu0 %2088  ;;  %v1983_v58 = vadd.f32 %v1979_v35, %v1943_v4  ;;  %4551 = vmatprep.subr.bf16.mxu1 %v4887_v0 }
 0x4cb   :  { %v2096_v61 = vadd.f32 %v2089_v54, %v2064_v12  ;;  %4552 = vmatpush3.bf16.msra.mxu1 %v4887_v0 }
 0x4cc   :  { %v1995_v34 = vadd.f32 %v1991_v60, %v1983_v58  ;;  %v4889_v60 = vld [vmem:[%s4095_s7 + $0x20] sm:$0xff]  }
 0x4cd   :  { %v2091_v63 = vpop.permute.xlu1 %2090 }
 0x4ce   :  { %v2097_v15 = vadd.f32 %v2091_v63, %v2065_v3  ;;  %v2029_v9 = vpop.permute.xlu0 %2028 }
 0x4cf   :  { %v2034_v5 = vadd.f32 %v2029_v9, %v1994_v7 }
 0x4d0   :  { %v2120_v49 = vpack.c.bf16 %v2097_v15, %v2096_v61 }
 0x4d1   :  { %v2031_v45 = vpop.permute.xlu1 %2030 }
 0x4d2   :  { %2253 = vmatmul.mubr.bf16.vlgmr.msra.gmra.mrb[32].mxu0 %v2120_v49  ;;  %v2061_v16 = vpop.permute.xlu0 %2060  ;;  %v2035_v52 = vadd.f32 %v2031_v45, %v1995_v34 }
 0x4d3   :  { %2260 = vmatprep.mubr.bf16.mxu0 %v7517_v57  ;;  %v2066_v10 = vadd.f32 %v2061_v16, %v2034_v5  ;;  %v4888_v16 = vld [vmem:[%s4095_s7 + $0x18] sm:$0xff]   ;;  %s5038_s7 = smov 24  }
 0x4d4   :  { %4553 = vmatprep.subr.bf16.mxu1 %v4888_v16  ;;  %s4104_s10 = sld [smem:[%s7240_s0 + %s5038_s7]]  }
 0x4d5   :  { %v2063_v28 = vpop.permute.xlu1 %2062  ;;  %4554 = vmatpush3.bf16.msra.mxu1 %v4888_v16 }
 0x4d6   :  { %v2093_v19 = vpop.permute.xlu0 %2092  ;;  %v2067_v36 = vadd.f32 %v2063_v28, %v2035_v52  ;;  %4555 = vmatprep.subr.bf16.mxu1 %v4889_v60  ;;  %v7518_v28 = vld [vmem:[#allocation36_spill] sm:$0xff] }
 0x4d7   :  { %v2098_v59 = vadd.f32 %v2093_v19, %v2066_v10 }
 0x4d9   :  { %v2095_v14 = vpop.permute.xlu1 %2094  ;;  %4556 = vmatpush3.bf16.msra.mxu1 %v4889_v60 }
 0x4da   :  { %v2099_v42 = vadd.f32 %v2095_v14, %v2067_v36  ;;  %4557 = vmatprep.subr.bf16.mxu1 %v4890_v32 }
 0x4dc   :  { %v2122_v35 = vpack.c.bf16 %v2099_v42, %v2098_v59 }
 0x4dd   :  { %4558 = vmatpush3.bf16.msra.mxu1 %v4890_v32 }
 0x4de   :  { %2261 = vmatmul.mubr.bf16.gmra.mrb[36].mxu0 %v2122_v35  ;;  %4559 = vmatprep.subr.bf16.mxu1 %v4891_v47 }
 0x4e1   :  { %4560 = vmatpush3.bf16.msra.mxu1 %v4891_v47 }
 0x4e2   :  { %4561 = vmatprep.subr.bf16.mxu1 %v4892_v62 }
 0x4e5   :  { %4562 = vmatpush3.bf16.msra.mxu1 %v4892_v62 }
 0x5a5   :  { %v4371_v13 = vpop.f32.mrb[32].mxu0 }
 0x5a6   :  { %v4372_v54 = vpop.f32.mrb[33].mxu0 }
 0x5a7   :  { %v4373_v22 = vadd.f32 %v4372_v54, %v4371_v13  ;;  %v4374_v33 = vpop.f32.mrb[34].mxu0 }
 0x5a8   :  { %v4375_v12 = vpop.f32.mrb[35].mxu0 }
 0x5a9   :  { %v6727_v3 = vadd.f32 %v4373_v22, %v6382_v46  ;;  %v4376_v63 = vadd.f32 %v4375_v12, %v4374_v33  ;;  %v2273_v12 = vld [vmem:[%s4093_s11] sm:$0x1]  ;;  %s5039_s11 = smov 25  }
 0x5aa   :  { %s4105_s16 = sld [smem:[%s7240_s0 + %s5039_s11]]  }
 0x5ab   :  { %v6730_v55 = vadd.f32 %v4376_v63, %v6387_v40  ;;  %v2335_v49 = vmul.f32 %v6727_v3, %v6727_v3 }
 0x5ad   :  { %v2336_v15 = vmul.f32 %v6730_v55, %v6730_v55  ;;  %v2325_v45 = vadd.f32 %v6730_v55, %v6727_v3 }
 0x5af   :  { %v2339_v40 = vadd.f32 %v2336_v15, %v2335_v49  ;;  %v7519_v15 = vld [vmem:[#allocation51_spill] sm:$0xff] }
 0x5b1   :  { %v4377_v4 = vpop.f32.mrb[36].mxu0 }
 0x5b2   :  { %v4378_v61 = vpop.f32.mrb[37].mxu0 }
 0x5b3   :  { %v4379_v9 = vadd.f32 %v4378_v61, %v4377_v4  ;;  %v4380_v43 = vpop.f32.mrb[38].mxu0  ;;  %v2274_v61 = vld [vmem:[%s4094_s17] sm:$0x1]  ;;  %s5040_s17 = smov 27  }
 0x5b4   :  { %v4381_v58 = vpop.f32.mrb[39].mxu0 }
 0x5b5   :  { %v6739_v46 = vadd.f32 %v6380_v31, %v4379_v9  ;;  %v4382_v57 = vadd.f32 %v4381_v58, %v4380_v43 }
 0x5b7   :  { %v2326_v7 = vadd.f32 %v2325_v45, %v6739_v46  ;;  %v2337_v34 = vmul.f32 %v6739_v46, %v6739_v46  ;;  %v6745_v5 = vadd.f32 %v7518_v28, %v4382_v57 }
 0x5b9   :  { %v2340_v52 = vadd.f32 %v2339_v40, %v2337_v34  ;;  %v2327_v19 = vadd.f32 %v2326_v7, %v6745_v5  ;;  %v2338_v10 = vmul.f32 %v6745_v5, %v6745_v5 }
 0x5bb   :  { %v2328_v36 = vrot.slane %v2327_v19, 4  ;;  %v2341_v14 = vadd.f32 %v2340_v52, %v2338_v10 }
 0x5bd   :  { %v2329_v31 = vadd.f32 %v2328_v36, %v2327_v19  ;;  %v2342_v59 = vrot.slane %v2341_v14, 4 }
 0x5bf   :  { %v2330_v42 = vrot.slane %v2329_v31, 2  ;;  %v2343_v35 = vadd.f32 %v2342_v59, %v2341_v14 }
 0x5c1   :  { %v2331_v1 = vadd.f32 %v2330_v42, %v2329_v31  ;;  %v2344_v53 = vrot.slane %v2343_v35, 2 }
 0x5c3   :  { %v2332_v0 = vrot.slane %v2331_v1, 1  ;;  %v2345_v16 = vadd.f32 %v2344_v53, %v2343_v35 }
 0x5c5   :  { %v2333_v60 = vadd.f32 %v2332_v0, %v2331_v1  ;;  %v2346_v32 = vrot.slane %v2345_v16, 1 }
 0x5c7   :  { %v2334_v47 = vmul.f32 0.03125, %v2333_v60  ;;  %v2347_v62 = vadd.f32 %v2346_v32, %v2345_v16 }
 0x5c9   :  { %v2348_v13 = vmul.f32 0.03125, %v2347_v62  ;;  %v2349_v54 = vmul.f32 %v2334_v47, %v2334_v47 }
 0x5cb   :  { %v2350_v22 = vsub.f32 %v2348_v13, %v2349_v54 }
 0x5cd   :  { %v2351_v33 = vadd.f32 1e-05, %v2350_v22 }
 0x5cf   :  { %4979 = vrsqrt.f32 %v2351_v33 }
 0x5d9   :  { %v4980_v63 = vpop.eup %4979 }
 0x5da   :  { %v2353_v4 = vmul.f32 %v4980_v63, %v2273_v12 }
 0x5dc   :  { %v2360_v9 = vrot.slane %v2353_v4, %v7519_v15  ;;  %v2354_v43 = vmul.f32 %v2353_v4, %v2334_v47 }
 0x5de   :  { %v2355_v58 = vsub.f32 %v2274_v61, %v2354_v43  ;;  %v2365_v49 = vmul.f32 %v2360_v9, %v6745_v5  ;;  %v2362_v45 = vmul.f32 %v2360_v9, %v6727_v3  ;;  %v2363_v57 = vmul.f32 %v2360_v9, %v6730_v55 }
 0x5df   :  { %v2364_v7 = vmul.f32 %v2360_v9, %v6739_v46 }
 0x5e0   :  { %v2370_v40 = vrot.slane %v2355_v58, %v7519_v15 }
 0x5e2   :  { %v2372_v34 = vadd.f32 %v2370_v40, %v2362_v45  ;;  %v2373_v28 = vadd.f32 %v2370_v40, %v2363_v57  ;;  %v2374_v52 = vadd.f32 %v2370_v40, %v2364_v7  ;;  %v2375_v19 = vadd.f32 %v2370_v40, %v2365_v49 }
 0x5e4   :  { %v2376_v10 = vmax.f32 %v2372_v34, 0.0  ;;  %v2377_v36 = vmax.f32 %v2373_v28, 0.0  ;;  %v2378_v14 = vmax.f32 %v2374_v52, 0.0  ;;  %v2379_v31 = vmax.f32 %v2375_v19, 0.0 }
 0x5e6   :  { %v2380_v59 = vpack.c.bf16 %v2377_v36, %v2376_v10  ;;  %v2381_v42 = vpack.c.bf16 %v2379_v31, %v2378_v14  ;;  %v2291_v14 = vld [vmem:[%s4096_s20] sm:$0x1]  ;;  %s4107_s20 = sld [smem:[%s7240_s0 + %s5040_s17]]  }
 0x5e8   :  { %4563 = vmatprep.mubr.bf16.mxu1 %v2380_v59 }
 0x5e9   :  { %4564 = vmatmul.mubr.bf16.vlgmr.msra.gmra.mrb[8].mxu1 %v2381_v42  ;;  %v2292_v42 = vld [vmem:[%s4097_s24] sm:$0x1]  ;;  %s4108_s24 = sld [smem:[%s7240_s0 + %s5041_s21]]  }
 0x6bc   :  { %v4565_v35 = vpop.f32.mrb[8].mxu1 }
 0x6bd   :  { %v2464_v1 = vpop.f32.mrb[9].mxu1  ;;  %v2491_v47 = vmul.f32 %v4565_v35, %v4565_v35 }
 0x6be   :  { %v4566_v53 = vpop.f32.mrb[10].mxu1  ;;  %v2489_v16 = vmul.f32 %v2464_v1, %v2464_v1 }
 0x6bf   :  { %v2467_v0 = vpop.f32.mrb[11].mxu1  ;;  %v2492_v54 = vmul.f32 %v4566_v53, %v4566_v53 }
 0x6c0   :  { %v2479_v60 = vadd.f32 %v2467_v0, %v2464_v1  ;;  %v2490_v32 = vmul.f32 %v2467_v0, %v2467_v0 }
 0x6c2   :  { %v2480_v62 = vadd.f32 %v4565_v35, %v2479_v60  ;;  %v2493_v13 = vadd.f32 %v2490_v32, %v2489_v16 }
 0x6c4   :  { %v2481_v22 = vadd.f32 %v4566_v53, %v2480_v62  ;;  %v2494_v33 = vadd.f32 %v2493_v13, %v2491_v47 }
 0x6c6   :  { %v2482_v12 = vrot.slane %v2481_v22, 4  ;;  %v2495_v63 = vadd.f32 %v2494_v33, %v2492_v54 }
 0x6c8   :  { %v2483_v4 = vadd.f32 %v2482_v12, %v2481_v22  ;;  %v2496_v61 = vrot.slane %v2495_v63, 4 }
 0x6ca   :  { %v2484_v9 = vrot.slane %v2483_v4, 2  ;;  %v2497_v43 = vadd.f32 %v2496_v61, %v2495_v63 }
 0x6cc   :  { %v2485_v58 = vadd.f32 %v2484_v9, %v2483_v4  ;;  %v2498_v49 = vrot.slane %v2497_v43, 2 }
 0x6ce   :  { %v2486_v45 = vrot.slane %v2485_v58, 1  ;;  %v2499_v57 = vadd.f32 %v2498_v49, %v2497_v43 }
 0x6d0   :  { %v2487_v40 = vadd.f32 %v2486_v45, %v2485_v58  ;;  %v2500_v7 = vrot.slane %v2499_v57, 1 }
 0x6d2   :  { %v2488_v34 = vmul.f32 0.03125, %v2487_v40  ;;  %v2501_v28 = vadd.f32 %v2500_v7, %v2499_v57 }
 0x6d4   :  { %v2502_v52 = vmul.f32 0.03125, %v2501_v28  ;;  %v2503_v19 = vmul.f32 %v2488_v34, %v2488_v34 }
 0x6d6   :  { %v2504_v10 = vsub.f32 %v2502_v52, %v2503_v19  ;;  %v7520_v19 = vld [vmem:[#allocation2_spill] sm:$0xff] }
 0x6d8   :  { %v2505_v36 = vadd.f32 1e-05, %v2504_v10 }
 0x6da   :  { %4981 = vrsqrt.f32 %v2505_v36 }
 0x6e4   :  { %v4982_v31 = vpop.eup %4981 }
 0x6e5   :  { %v2507_v59 = vmul.f32 %v4982_v31, %v2291_v14 }
 0x6e7   :  { %v2508_v16 = vmul.f32 %v2507_v59, %v2488_v34  ;;  %v2514_v60 = vrot.slane %v2507_v59, %v7519_v15 }
 0x6e9   :  { %v2509_v32 = vsub.f32 %v2292_v42, %v2508_v16  ;;  %v2516_v47 = vmul.f32 %v2514_v60, %v2464_v1  ;;  %v2517_v62 = vmul.f32 %v2514_v60, %v2467_v0  ;;  %v2518_v13 = vmul.f32 %v4565_v35, %v2514_v60  ;;  %v7521_v16 = vld [vmem:[#allocation58_spill] sm:$0xff] }
 0x6ea   :  { %v2519_v54 = vmul.f32 %v4566_v53, %v2514_v60 }
 0x6eb   :  { %v2524_v22 = vrot.slane %v2509_v32, %v7519_v15 }
 0x6ed   :  { %v2527_v33 = vadd.f32 %v2524_v22, %v2517_v62  ;;  %v2526_v12 = vadd.f32 %v2524_v22, %v2516_v47  ;;  %v2529_v63 = vadd.f32 %v2524_v22, %v2519_v54  ;;  %v2528_v4 = vadd.f32 %v2524_v22, %v2518_v13  ;;  %v7522_v47 = vld [vmem:[#allocation26_spill] sm:$0xff] }
 0x6ef   :  { %v6771_v61 = vmax.f32 %v2527_v33, 0.0  ;;  %v6773_v9 = vmax.f32 %v2526_v12, 0.0  ;;  %v6775_v43 = vmax.f32 %v2529_v63, 0.0  ;;  %v6777_v58 = vmax.f32 %v2528_v4, 0.0  ;;  %v4893_v33 = vld [vmem:[%s6790_s4 + $0x40] sm:$0xff]  }
 0x6f0   :  { %v4894_v63 = vld [vmem:[%s6790_s4] sm:$0xff]   ;;  %4393 = vmatprep.subr.bf16.mxu0 %v4893_v33 }
 0x6f1   :  { %2620 = vrot.lane.b32.xlu1 %v6771_v61, %s5019_s28  ;;  %2618 = vrot.lane.b32.xlu0 %v6773_v9, %s5019_s28  ;;  %v2570_v35 = vrot.slane %v6773_v9, 5  ;;  %v2571_v1 = vrot.slane %v6771_v61, 5  ;;  %v2572_v53 = vrot.slane %v6777_v58, 5  ;;  %v2546_v0 = vrot.slane %v6773_v9, 4 }
 0x6f2   :  { %v2549_v49 = vrot.slane %v6775_v43, 4  ;;  %v2547_v45 = vrot.slane %v6771_v61, 4  ;;  %v2573_v57 = vrot.slane %v6775_v43, 5  ;;  %v2594_v40 = vrot.slane %v6773_v9, 7  ;;  %4394 = vmatpush3.bf16.msra.mxu0 %v4894_v63 }
 0x6f3   :  { %v6798_v7 = vsel %vm1907_vm2, %v2571_v1, %v2572_v53  ;;  %v2576_v34 = vsel %vm1907_vm2, %v2570_v35, %v2571_v1  ;;  %v2597_v28 = vrot.slane %v6775_v43, 7  ;;  %v2595_v52 = vrot.slane %v6771_v61, 7 }
 0x6f4   :  { %v2686_v10 = vmul.f32 %v2576_v34, %v7520_v19  ;;  %v2687_v36 = vmul.f32 %v6798_v7, %v6575_v56  ;;  %v6809_v14 = vsel %vm1866_vm3, %v2549_v49, %v2546_v0  ;;  %v6813_v31 = vsel %vm1866_vm3, %v2546_v0, %v2547_v45  ;;  %v4895_v19 = vld [vmem:[%s6790_s4 + $0x48] sm:$0xff]  }
 0x6f5   :  { %2624 = vrot.lane.b32.xlu1 %v6775_v43, %s5019_s28  ;;  %2622 = vrot.lane.b32.xlu0 %v6777_v58, %s5019_s28  ;;  %v2577_v59 = vsel %vm1907_vm2, %v2573_v57, %v2570_v35  ;;  %v2548_v56 = vrot.slane %v6777_v58, 4  ;;  %v2554_v60 = vmul.f32 %v6809_v14, %v7521_v16  ;;  %v2601_v32 = vsel %vm656_vm0, %v2597_v28, %v2594_v40 }
 0x6f6   :  { %v2691_v42 = vpack.c.bf16 %v2687_v36, %v2686_v10  ;;  %v2555_v62 = vmul.f32 %v6813_v31, %v7522_v47  ;;  %v2600_v13 = vsel %vm656_vm0, %v2594_v40, %v2595_v52  ;;  %v2630_v12 = vrot.slane %v6773_v9, 1  ;;  %v7523_v10 = vld [vmem:[#allocation27_spill] sm:$0xff]  ;;  %4395 = vmatprep.subr.bf16.mxu0 %v4895_v19  ;;  %v7524_v19 = vld [vmem:[#allocation37_spill] sm:$0xff] }
 0x6f7   :  { %v6832_v54 = vsel %vm1866_vm3, %v2547_v45, %v2548_v56  ;;  %v6836_v22 = vsel %vm1866_vm3, %v2548_v56, %v2549_v49  ;;  %v2631_v4 = vrot.slane %v6771_v61, 1  ;;  %v2632_v35 = vrot.slane %v6777_v58, 1 }
 0x6f8   :  { %2822 = vmatprep.mubr.bf16.mxu0 %v2691_v42  ;;  %v2574_v1 = vsel %vm1907_vm2, %v2572_v53, %v2573_v57  ;;  %v2578_v0 = vmul.f32 %v2577_v59, %v6430_v39  ;;  %v2535_v49 = vrot.slane %v6771_v61, 3  ;;  %v2536_v45 = vrot.slane %v6777_v58, 3  ;;  %v4896_v39 = vld [vmem:[%s6790_s4 + $0x8] sm:$0xff]   ;;  %v4897_v57 = vld [vmem:[%s6790_s4 + $0x50] sm:$0xff]  }
 0x6f9   :  { %2558 = vrot.lane.b32.xlu0 %v2554_v60, %s5020_s29  ;;  %2560 = vrot.lane.b32.xlu1 %v2555_v62, %s5020_s29  ;;  %v2534_v40 = vrot.slane %v6773_v9, 3  ;;  %v2579_v36 = vmul.f32 %v2576_v34, %v7523_v10  ;;  %v2636_v56 = vsel %vm897_vm1, %v2630_v12, %v2631_v4  ;;  %v2635_v42 = vsel %vm897_vm1, %v2631_v4, %v2632_v35 }
 0x6fa   :  { %v2596_v53 = vrot.slane %v6777_v58, 7  ;;  %v6861_v61 = vsel %vm1833_vm4, %v2535_v49, %v2536_v45  ;;  %v2633_v34 = vrot.slane %v6775_v43, 1  ;;  %v2537_v60 = vrot.slane %v6775_v43, 3  ;;  %4396 = vmatpush3.bf16.msra.mxu0 %v4896_v39 }
 0x6fb   :  { %v6865_v9 = vsel %vm1833_vm4, %v2534_v40, %v2535_v49  ;;  %v2602_v47 = vmul.f32 %v2601_v32, %v6432_v25  ;;  %v2603_v62 = vmul.f32 %v2600_v13, %v6434_v27  ;;  %4397 = vmatprep.subr.bf16.mxu0 %v4897_v57  ;;  %v4899_v25 = vld [vmem:[%s6790_s4 + $0x58] sm:$0xff]   ;;  %v2557_v32 = vmul.f32 %v6836_v22, %v6436_v37  ;;  %v4904_v49 = vld [vmem:[%s6790_s4 + $0x28] sm:$0xff]  }
 0x6fc   :  { %v2598_v58 = vsel %vm656_vm0, %v2596_v53, %v2597_v28  ;;  %v2599_v16 = vsel %vm656_vm0, %v2595_v52, %v2596_v53  ;;  %v2637_v33 = vsel %vm897_vm1, %v2633_v34, %v2630_v12  ;;  %v2634_v63 = vsel %vm897_vm1, %v2632_v35, %v2633_v34  ;;  %v4898_v28 = vld [vmem:[%s6790_s4 + $0x10] sm:$0xff]   ;;  %v4900_v27 = vld [vmem:[%s6790_s4 + $0x18] sm:$0xff]   ;;  %v4901_v12 = vld [vmem:[%s6790_s4 + $0x60] sm:$0xff]  }
 0x6fd   :  { %2582 = vrot.lane.b32.xlu0 %v2578_v0, %s5015_s12  ;;  %2584 = vrot.lane.b32.xlu1 %v2579_v36, %s5015_s12  ;;  %v6885_v4 = vsel %vm1833_vm4, %v2537_v60, %v2534_v40  ;;  %v6889_v43 = vsel %vm1833_vm4, %v2536_v45, %v2537_v60  ;;  %v2556_v52 = vmul.f32 %v6832_v54, %v6464_v44  ;;  %v4906_v40 = vld [vmem:[%s6790_s4 + $0x30] sm:$0xff]  }
 0x6fe   :  { %4398 = vmatpush3.bf16.msra.mxu0 %v4898_v28  ;;  %v6900_v30 = vmul.f32 %v2574_v1, %v6617_v29  ;;  %v6903_v13 = vmul.f32 %v2577_v59, %v6620_v8  ;;  %v2638_v37 = vmul.f32 %v2636_v56, %v6438_v51  ;;  %v2639_v35 = vmul.f32 %v2635_v42, %v6472_v21  ;;  %v4902_v29 = vld [vmem:[%s6790_s4 + $0x20] sm:$0xff]   ;;  %v4903_v8 = vld [vmem:[%s6790_s4 + $0x68] sm:$0xff]   ;;  %v4905_v51 = vld [vmem:[%s6790_s4 + $0x70] sm:$0xff]  }
 0x6ff   :  { %4399 = vmatprep.subr.bf16.mxu0 %v4899_v25  ;;  %v2580_v59 = vmul.f32 %v6798_v7, %v6445_v17  ;;  %v2581_v0 = vmul.f32 %v2574_v1, %v6449_v2  ;;  %v2655_v21 = vmul.f32 %v6861_v61, %v6455_v26  ;;  %v2654_v45 = vmul.f32 %v6865_v9, %v6486_v48  ;;  %v4907_v17 = vld [vmem:[%s6790_s4 + $0x78] sm:$0xff]  }
 0x700   :  { %v2693_v44 = vpack.c.bf16 %v6903_v13, %v6900_v30  ;;  %v2605_v2 = vmul.f32 %v2598_v58, %v6468_v23  ;;  %v2604_v7 = vmul.f32 %v2599_v16, %v6462_v6  ;;  %v4908_v1 = vld [vmem:[%s6790_s4 + $0x38] sm:$0xff]   ;;  %v2671_v26 = vmul.f32 %v6832_v54, %v6470_v24  ;;  %v7525_v24 = vld [vmem:[#allocation14_spill] sm:$0xff]  ;;  %v4910_v13 = vld [vmem:[%s4101_s8 + $0x8] sm:$0xff]   ;;  %s7061_s4 = sld [smem:[%s7240_s0 + %s5042_s25]]  }
 0x701   :  { %2606 = vrot.lane.b32.xlu0 %v2602_v47, %s5021_s30  ;;  %2608 = vrot.lane.b32.xlu1 %v2603_v62, %s5021_s30  ;;  %v2670_v48 = vmul.f32 %v6813_v31, %v6466_v20  ;;  %v2641_v6 = vmul.f32 %v2637_v33, %v6474_v38  ;;  %v2640_v23 = vmul.f32 %v2634_v63, %v6479_v50  ;;  %v7526_v20 = vld [vmem:[#allocation40_spill] sm:$0xff]  ;;  %v7527_v38 = vld [vmem:[#allocation53_spill] sm:$0xff]  ;;  %v4909_v30 = vld [vmem:[%s4101_s8] sm:$0xff]  }
 0x702   :  { %4400 = vmatpush3.bf16.msra.mxu0 %v4900_v27  ;;  %v2657_v10 = vmul.f32 %v6885_v4, %v7524_v19  ;;  %v2656_v54 = vmul.f32 %v6889_v43, %v7525_v24  ;;  %v2673_v31 = vmul.f32 %v6809_v14, %v7526_v20  ;;  %v2672_v50 = vmul.f32 %v6836_v22, %v7527_v38 }
 0x703   :  { %4401 = vmatprep.subr.bf16.mxu0 %v4901_v12  ;;  %v2542_v22 = vmul.f32 %v6885_v4, %v6500_v18  ;;  %v2543_v63 = vmul.f32 %v6865_v9, %v6502_v41  ;;  %v2544_v18 = vmul.f32 %v6861_v61, %v6529_v11  ;;  %v7528_v4 = vld [vmem:[#allocation17_spill] sm:$0xff]  ;;  %4567 = vmatprep.subr.bf16.mxu1 %v4909_v30 }
 0x704   :  { %v2545_v41 = vmul.f32 %v6889_v43, %v7528_v4  ;;  %4568 = vmatpush3.bf16.msra.mxu1 %v4909_v30 }
 0x705   :  { %2562 = vrot.lane.b32.xlu0 %v2556_v52, %s5020_s29  ;;  %2564 = vrot.lane.b32.xlu1 %v2557_v32, %s5020_s29 }
 0x706   :  { %4402 = vmatpush3.bf16.msra.mxu0 %v4902_v29  ;;  %4569 = vmatprep.subr.bf16.mxu1 %v4910_v13 }
 0x707   :  { %4403 = vmatprep.subr.bf16.mxu0 %v4903_v8 }
 0x708   :  { %4570 = vmatpush3.bf16.msra.mxu1 %v4910_v13 }
 0x709   :  { %2642 = vrot.lane.b32.xlu0 %v2638_v37, %s5022_s1  ;;  %2644 = vrot.lane.b32.xlu1 %v2639_v35, %s5022_s1 }
 0x70a   :  { %4404 = vmatpush3.bf16.msra.mxu0 %v4904_v49 }
 0x70b   :  { %4405 = vmatprep.subr.bf16.mxu0 %v4905_v51 }
 0x70d   :  { %2586 = vrot.lane.b32.xlu0 %v2580_v59, %s5015_s12  ;;  %2588 = vrot.lane.b32.xlu1 %v2581_v0, %s5015_s12 }
 0x70e   :  { %4406 = vmatpush3.bf16.msra.mxu0 %v4906_v40 }
 0x70f   :  { %4407 = vmatprep.subr.bf16.mxu0 %v4907_v17 }
 0x711   :  { %2660 = vrot.lane.b32.xlu1 %v2655_v21, %s5023_s2  ;;  %2658 = vrot.lane.b32.xlu0 %v2654_v45, %s5023_s2 }
 0x712   :  { %4408 = vmatpush3.bf16.msra.mxu0 %v4908_v1 }
 0x715   :  { %2612 = vrot.lane.b32.xlu1 %v2605_v2, %s5021_s30  ;;  %2610 = vrot.lane.b32.xlu0 %v2604_v7, %s5021_s30 }
 0x719   :  { %2676 = vrot.lane.b32.xlu1 %v2671_v26, %s5024_s3  ;;  %2674 = vrot.lane.b32.xlu0 %v2670_v48, %s5024_s3 }
 0x71d   :  { %2648 = vrot.lane.b32.xlu1 %v2641_v6, %s5022_s1  ;;  %2646 = vrot.lane.b32.xlu0 %v2640_v23, %s5022_s1 }
 0x721   :  { %2664 = vrot.lane.b32.xlu1 %v2657_v10, %s5023_s2  ;;  %2662 = vrot.lane.b32.xlu0 %v2656_v54, %s5023_s2 }
 0x725   :  { %2680 = vrot.lane.b32.xlu1 %v2673_v31, %s5024_s3  ;;  %2678 = vrot.lane.b32.xlu0 %v2672_v50, %s5024_s3 }
 0x763   :  { %v2621_v36 = vpop.permute.xlu1 %2620  ;;  %v2619_v56 = vpop.permute.xlu0 %2618 }
 0x767   :  { %v2625_v42 = vpop.permute.xlu1 %2624  ;;  %v2623_v53 = vpop.permute.xlu0 %2622 }
 0x76b   :  { %v2559_v39 = vpop.permute.xlu0 %2558  ;;  %v2561_v57 = vpop.permute.xlu1 %2560 }
 0x76c   :  { %v2566_v28 = vadd.f32 %v2559_v39, %v2542_v22  ;;  %v2567_v25 = vadd.f32 %v2561_v57, %v2543_v63 }
 0x76f   :  { %v2583_v58 = vpop.permute.xlu0 %2582  ;;  %v2585_v34 = vpop.permute.xlu1 %2584 }
 0x770   :  { %v2590_v32 = vadd.f32 %v2583_v58, %v2566_v28  ;;  %v2591_v12 = vadd.f32 %v2585_v34, %v2567_v25 }
 0x773   :  { %v2607_v16 = vpop.permute.xlu0 %2606  ;;  %v2609_v60 = vpop.permute.xlu1 %2608 }
 0x774   :  { %v2614_v37 = vadd.f32 %v2607_v16, %v2590_v32  ;;  %v2615_v35 = vadd.f32 %v2609_v60, %v2591_v12  ;;  %v4914_v60 = vld [vmem:[%s4101_s8 + $0x28] sm:$0xff]  }
 0x776   :  { %v2626_v59 = vadd.f32 %v2619_v56, %v2614_v37  ;;  %v2627_v0 = vadd.f32 %v2621_v36, %v2615_v35 }
 0x777   :  { %v2563_v47 = vpop.permute.xlu0 %2562  ;;  %v2565_v62 = vpop.permute.xlu1 %2564 }
 0x778   :  { %v2568_v45 = vadd.f32 %v2563_v47, %v2544_v18  ;;  %v2569_v40 = vadd.f32 %v2565_v62, %v2545_v41  ;;  %v4915_v47 = vld [vmem:[%s4101_s8 + $0x30] sm:$0xff]   ;;  %v4916_v62 = vld [vmem:[%s4101_s8 + $0x38] sm:$0xff]  }
 0x77b   :  { %v2643_v14 = vpop.permute.xlu0 %2642  ;;  %v2645_v33 = vpop.permute.xlu1 %2644 }
 0x77c   :  { %v2650_v9 = vadd.f32 %v2643_v14, %v2626_v59  ;;  %v2651_v21 = vadd.f32 %v2645_v33, %v2627_v0 }
 0x77f   :  { %v2587_v27 = vpop.permute.xlu0 %2586  ;;  %v2589_v52 = vpop.permute.xlu1 %2588 }
 0x780   :  { %v2592_v26 = vadd.f32 %v2587_v27, %v2568_v45  ;;  %v2593_v48 = vadd.f32 %v2589_v52, %v2569_v40 }
 0x783   :  { %v2661_v29 = vpop.permute.xlu1 %2660  ;;  %v2659_v8 = vpop.permute.xlu0 %2658 }
 0x784   :  { %v2667_v17 = vadd.f32 %v2661_v29, %v2651_v21  ;;  %v2666_v2 = vadd.f32 %v2659_v8, %v2650_v9 }
 0x787   :  { %v2613_v49 = vpop.permute.xlu1 %2612  ;;  %v2611_v51 = vpop.permute.xlu0 %2610 }
 0x788   :  { %v2617_v19 = vadd.f32 %v2613_v49, %v2593_v48  ;;  %v2616_v10 = vadd.f32 %v2611_v51, %v2592_v26 }
 0x78a   :  { %v2629_v61 = vadd.f32 %v2625_v42, %v2617_v19  ;;  %v2628_v43 = vadd.f32 %v2623_v53, %v2616_v10  ;;  %v4912_v42 = vld [vmem:[%s4101_s8 + $0x18] sm:$0xff]   ;;  %v4913_v53 = vld [vmem:[%s4101_s8 + $0x20] sm:$0xff]  }
 0x78b   :  { %v2677_v7 = vpop.permute.xlu1 %2676  ;;  %v2675_v1 = vpop.permute.xlu0 %2674 }
 0x78c   :  { %v2683_v6 = vadd.f32 %v2677_v7, %v2667_v17  ;;  %v2682_v23 = vadd.f32 %v2675_v1, %v2666_v2 }
 0x78e   :  { %v2690_v24 = vpack.c.bf16 %v2683_v6, %v2682_v23 }
 0x78f   :  { %v2649_v54 = vpop.permute.xlu1 %2648  ;;  %v2647_v11 = vpop.permute.xlu0 %2646 }
 0x790   :  { %2823 = vmatmul.mubr.bf16.vlgmr.msra.gmra.mrb[40].mxu0 %v2690_v24  ;;  %v2653_v38 = vadd.f32 %v2649_v54, %v2629_v61  ;;  %v2652_v50 = vadd.f32 %v2647_v11, %v2628_v43  ;;  %v2843_v43 = vld [vmem:[%s4099_s13] sm:$0x1]  ;;  %s5045_s13 = smov 35  }
 0x791   :  { %2830 = vmatprep.mubr.bf16.mxu0 %v2693_v44  ;;  %v4911_v44 = vld [vmem:[%s4101_s8 + $0x10] sm:$0xff]   ;;  %s5044_s8 = smov 31   ;;  %s7158_s17 = sld [smem:[%s7240_s0 + %s5045_s13]]  }
 0x792   :  { %4571 = vmatprep.subr.bf16.mxu1 %v4911_v44  ;;  %s4111_s11 = sld [smem:[%s7240_s0 + %s5044_s8]]  }
 0x793   :  { %v2665_v20 = vpop.permute.xlu1 %2664  ;;  %v2663_v31 = vpop.permute.xlu0 %2662  ;;  %4572 = vmatpush3.bf16.msra.mxu1 %v4911_v44 }
 0x794   :  { %v2669_v36 = vadd.f32 %v2665_v20, %v2653_v38  ;;  %v2668_v56 = vadd.f32 %v2663_v31, %v2652_v50  ;;  %4573 = vmatprep.subr.bf16.mxu1 %v4912_v42  ;;  %v2844_v38 = vld [vmem:[%s4100_s18] sm:$0x1]  ;;  %s5046_s18 = smov 33  }
 0x795   :  { %s4113_s21 = sld [smem:[%s7240_s0 + %s5046_s18]]  }
 0x797   :  { %v2681_v39 = vpop.permute.xlu1 %2680  ;;  %v2679_v57 = vpop.permute.xlu0 %2678  ;;  %4574 = vmatpush3.bf16.msra.mxu1 %v4912_v42 }
 0x798   :  { %v2685_v58 = vadd.f32 %v2681_v39, %v2669_v36  ;;  %v2684_v34 = vadd.f32 %v2679_v57, %v2668_v56  ;;  %4575 = vmatprep.subr.bf16.mxu1 %v4913_v53 }
 0x79a   :  { %v2692_v16 = vpack.c.bf16 %v2685_v58, %v2684_v34 }
 0x79b   :  { %4576 = vmatpush3.bf16.msra.mxu1 %v4913_v53 }
 0x79c   :  { %2831 = vmatmul.mubr.bf16.gmra.mrb[44].mxu0 %v2692_v16  ;;  %4577 = vmatprep.subr.bf16.mxu1 %v4914_v60 }
 0x79f   :  { %4578 = vmatpush3.bf16.msra.mxu1 %v4914_v60 }
 0x7a0   :  { %4579 = vmatprep.subr.bf16.mxu1 %v4915_v47 }
 0x7a3   :  { %4580 = vmatpush3.bf16.msra.mxu1 %v4915_v47 }
 0x7a4   :  { %4581 = vmatprep.subr.bf16.mxu1 %v4916_v62 }
 0x7a7   :  { %4582 = vmatpush3.bf16.msra.mxu1 %v4916_v62 }
 0x863   :  { %v4409_v14 = vpop.f32.mrb[40].mxu0 }
 0x864   :  { %v4410_v33 = vpop.f32.mrb[41].mxu0 }
 0x865   :  { %v4411_v22 = vadd.f32 %v4410_v33, %v4409_v14  ;;  %v4412_v63 = vpop.f32.mrb[42].mxu0 }
 0x866   :  { %v4413_v28 = vpop.f32.mrb[43].mxu0 }
 0x867   :  { %v2839_v25 = vadd.f32 %v4411_v22, %v6727_v3  ;;  %v4414_v27 = vadd.f32 %v4413_v28, %v4412_v63  ;;  %v5033_v22 = vmov 0.0  }
 0x868   :  { %4587 = vmatprep.subr.bf16.mxu1 %v5033_v22  ;;  %4595 = vmatprep.subr.bf16.mxu0 %v5033_v22 }
 0x869   :  { %v2840_v52 = vadd.f32 %v4414_v27, %v6730_v55  ;;  %v2855_v32 = vmul.f32 %v2839_v25, %v2839_v25  ;;  %4611 = vmatprep.mubr.msk.bf16.mxu0 %vm5034_vm5, %v5033_v22 }
 0x86b   :  { %v2845_v12 = vadd.f32 %v2840_v52, %v2839_v25  ;;  %v2856_v37 = vmul.f32 %v2840_v52, %v2840_v52 }
 0x86d   :  { %v2859_v35 = vadd.f32 %v2856_v37, %v2855_v32  ;;  %v4917_v37 = vld [vmem:[%s6997_s26] sm:$0xff]  }
 0x86e   :  { %4596 = vmatpush3.bf16.msra.mxu0 %v4917_v37 }
 0x86f   :  { %v4415_v29 = vpop.f32.mrb[44].mxu0  ;;  %4597 = vmatprep.subr.bf16.mxu0 %v5033_v22 }
 0x870   :  { %v4416_v8 = vpop.f32.mrb[45].mxu0 }
 0x871   :  { %v4417_v59 = vadd.f32 %v4416_v8, %v4415_v29  ;;  %v4418_v0 = vpop.f32.mrb[46].mxu0  ;;  %v4919_v29 = vld [vmem:[%s6997_s26 + $0x10] sm:$0xff]   ;;  %v7007_v8 = vld [vmem:[%s4103_s6] sm:$0xff]  ;;  %s5051_s6 = smov 38  }
 0x872   :  { %v4419_v49 = vpop.f32.mrb[47].mxu0  ;;  %3297 = vperm.xlu1 %4811, %v7007_v8   ;;  %3288 = vperm.xlu0 %4810, %v7007_v8   ;;  %s4118_s9 = sld [smem:[%s7240_s0 + %s5051_s6]]  }
 0x873   :  { %v2841_v51 = vadd.f32 %v4417_v59, %v6739_v46  ;;  %v4420_v18 = vadd.f32 %v4419_v49, %v4418_v0  ;;  %v4920_v59 = vld [vmem:[%s6997_s26 + $0x18] sm:$0xff]   ;;  %v7529_v0 = vmov 3   ;;  %v7530_v49 = vmov 5  }
 0x875   :  { %v2846_v4 = vadd.f32 %v2845_v12, %v2841_v51  ;;  %v2857_v41 = vmul.f32 %v2841_v51, %v2841_v51  ;;  %v2842_v9 = vadd.f32 %v4420_v18, %v6745_v5  ;;  %v3015_v12 = vld [vmem:[%s4102_s22] sm:$0xf]  ;;  %v4922_v18 = vld [vmem:[%s6997_s26 + $0x28] sm:$0xff]   ;;  %s5047_s22 = smov 34  }
 0x876   :  { %4812 = vset.pattern.permute.xlu1 %v7529_v0  ;;  %4813 = vset.pattern.permute.xlu0 %v7530_v49  ;;  %s4114_s25 = sld [smem:[%s7240_s0 + %s5047_s22]]  }
 0x877   :  { %v2860_v3 = vadd.f32 %v2859_v35, %v2857_v41  ;;  %v2847_v21 = vadd.f32 %v2846_v4, %v2842_v9  ;;  %v2858_v45 = vmul.f32 %v2842_v9, %v2842_v9  ;;  %v4918_v35 = vld [vmem:[%s6997_s26 + $0x8] sm:$0xff]   ;;  %3305 = vperm.xlu1 %4812, %v7007_v8   ;;  %3317 = vperm.xlu0 %4813, %v7007_v8   ;;  %v7531_v4 = vmov 6  }
 0x878   :  { %4598 = vmatpush3.bf16.msra.mxu0 %v4918_v35  ;;  %v7532_v41 = vmov 0  }
 0x879   :  { %v2848_v55 = vrot.slane %v2847_v21, 4  ;;  %v2861_v40 = vadd.f32 %v2860_v3, %v2858_v45  ;;  %4599 = vmatprep.subr.bf16.mxu0 %v5033_v22  ;;  %v7533_v3 = vmov 7   ;;  %v4924_v45 = vld [vmem:[%s6997_s26 + $0x38] sm:$0xff]  }
 0x87b   :  { %v2849_v17 = vadd.f32 %v2848_v55, %v2847_v21  ;;  %v2862_v2 = vrot.slane %v2861_v40, 4  ;;  %4814 = vset.pattern.permute.xlu1 %v7531_v4  ;;  %4816 = vset.pattern.permute.xlu0 %v7532_v41  ;;  %v7534_v21 = vmov 8   ;;  %v3081_v41 = vld [vmem:[%s4107_s20] sm:$0x1] }
 0x87c   :  { %4600 = vmatpush3.bf16.msra.mxu0 %v4919_v29  ;;  %3325 = vperm.xlu1 %4814, %v7007_v8  }
 0x87d   :  { %v2850_v7 = vrot.slane %v2849_v17, 2  ;;  %v2863_v1 = vadd.f32 %v2862_v2, %v2861_v40  ;;  %4601 = vmatprep.subr.bf16.mxu0 %v5033_v22  ;;  %3282 = vperm.xlu0 %4816, %v7007_v8  }
 0x87f   :  { %v2851_v26 = vadd.f32 %v2850_v7, %v2849_v17  ;;  %v2864_v48 = vrot.slane %v2863_v1, 2 }
 0x880   :  { %4602 = vmatpush3.bf16.msra.mxu0 %v4920_v59  ;;  %4815 = vset.pattern.permute.xlu1 %v7533_v3 }
 0x881   :  { %v2852_v6 = vrot.slane %v2851_v26, 1  ;;  %v2865_v23 = vadd.f32 %v2864_v48, %v2863_v1  ;;  %4603 = vmatprep.subr.bf16.mxu0 %v5033_v22  ;;  %3334 = vperm.xlu1 %4815, %v7007_v8  }
 0x882   :  { %4818 = vset.pattern.permute.xlu0 %v7534_v21 }
 0x883   :  { %v2853_v19 = vadd.f32 %v2852_v6, %v2851_v26  ;;  %v2866_v46 = vrot.slane %v2865_v23, 1 }
 0x885   :  { %v2854_v10 = vmul.f32 0.03125, %v2853_v19  ;;  %v2867_v24 = vadd.f32 %v2866_v46, %v2865_v23  ;;  %4817 = vset.pattern.permute.xlu1 %v7534_v21  ;;  %v3082_v21 = vld [vmem:[%s4108_s24] sm:$0x1] }
 0x887   :  { %v2868_v54 = vmul.f32 0.03125, %v2867_v24  ;;  %v2869_v11 = vmul.f32 %v2854_v10, %v2854_v10 }
 0x889   :  { %v2870_v5 = vsub.f32 %v2868_v54, %v2869_v11 }
 0x88b   :  { %v2871_v61 = vadd.f32 1e-05, %v2870_v5 }
 0x88d   :  { %4983 = vrsqrt.f32 %v2871_v61 }
 0x897   :  { %v4984_v20 = vpop.eup %4983 }
 0x898   :  { %v2873_v31 = vmul.f32 %v4984_v20, %v2843_v43 }
 0x89a   :  { %v2874_v50 = vmul.f32 %v2873_v31, %v2854_v10  ;;  %v2880_v36 = vrot.slane %v2873_v31, %v7519_v15 }
 0x89c   :  { %v2875_v56 = vsub.f32 %v2844_v38, %v2874_v50  ;;  %v2885_v39 = vmul.f32 %v2880_v36, %v2842_v9  ;;  %v2882_v57 = vmul.f32 %v2880_v36, %v2839_v25  ;;  %v2883_v58 = vmul.f32 %v2880_v36, %v2840_v52  ;;  %v4923_v9 = vld [vmem:[%s6997_s26 + $0x30] sm:$0xff]   ;;  %v3063_v50 = vld [vmem:[%s4104_s10] sm:$0x1]  ;;  %s5052_s10 = smov 40  }
 0x89d   :  { %v2884_v34 = vmul.f32 %v2880_v36, %v2841_v51  ;;  %v4921_v51 = vld [vmem:[%s6997_s26 + $0x20] sm:$0xff]   ;;  %s4120_s14 = sld [smem:[%s7240_s0 + %s5052_s10]]  }
 0x89e   :  { %v2890_v16 = vrot.slane %v2875_v56, %v7519_v15  ;;  %4604 = vmatpush3.bf16.msra.mxu0 %v4921_v51 }
 0x89f   :  { %4605 = vmatprep.subr.bf16.mxu0 %v5033_v22 }
 0x8a0   :  { %v2895_v30 = vadd.f32 %v2890_v16, %v2885_v39  ;;  %v2892_v13 = vadd.f32 %v2890_v16, %v2882_v57  ;;  %v2893_v44 = vadd.f32 %v2890_v16, %v2883_v58  ;;  %v2894_v42 = vadd.f32 %v2890_v16, %v2884_v34  ;;  %v3064_v39 = vld [vmem:[%s4105_s16] sm:$0x1]  ;;  %s5053_s16 = smov 41  }
 0x8a1   :  { %s4121_s19 = sld [smem:[%s7240_s0 + %s5053_s16]]  }
 0x8a2   :  { %v2896_v53 = vmax.f32 %v2892_v13, 0.0  ;;  %v2897_v60 = vmax.f32 %v2893_v44, 0.0  ;;  %v2898_v47 = vmax.f32 %v2894_v42, 0.0  ;;  %v2899_v62 = vmax.f32 %v2895_v30, 0.0  ;;  %4606 = vmatpush3.bf16.msra.mxu0 %v4922_v18 }
 0x8a3   :  { %4607 = vmatprep.subr.bf16.mxu0 %v5033_v22 }
 0x8a4   :  { %v2916_v14 = vpack.c.bf16 %v2897_v60, %v2896_v53  ;;  %v2917_v33 = vpack.c.bf16 %v2899_v62, %v2898_v47 }
 0x8a6   :  { %4583 = vmatprep.mubr.bf16.mxu1 %v2916_v14  ;;  %4608 = vmatpush3.bf16.msra.mxu0 %v4923_v9 }
 0x8a7   :  { %4584 = vmatmul.mubr.bf16.vlgmr.msra.gmra.mrb[12].mxu1 %v2917_v33  ;;  %4609 = vmatprep.subr.bf16.mxu0 %v5033_v22 }
 0x8a8   :  { %4591 = vmatprep.mubr.msk.bf16.mxu1 %vm5034_vm5, %v5033_v22 }
 0x8aa   :  { %4610 = vmatpush3.bf16.msra.mxu0 %v4924_v45 }
 0x8ab   :  { %4615 = vmatprep.subr.bf16.mxu0 %v5033_v22 }
 0x97a   :  { %v4585_v63 = vpop.f32.mrb[12].mxu1 }
 0x97b   :  { %v3000_v28 = vpop.f32.mrb[13].mxu1 }
 0x97c   :  { %v4586_v25 = vpop.f32.mrb[14].mxu1 }
 0x97d   :  { %v3017_v27 = vpack.c.bf16 %v4586_v25, %v4585_v63  ;;  %v3003_v52 = vpop.f32.mrb[15].mxu1 }
 0x97e   :  { %v3016_v32 = vpack.c.bf16 %v3003_v52, %v3000_v28 }
 0x980   :  { %4588 = vmatpush3.bf16.msra.mxu1 %v3016_v32 }
 0x981   :  { %4589 = vmatprep.subr.bf16.mxu1 %v5033_v22 }
 0x984   :  { %4590 = vmatpush3.bf16.msra.mxu1 %v3017_v27 }
 0x987   :  { %4592 = vmatmul.mubr.msk.bf16.vlgmr.msra.gmra.mrb[16].mxu1 %vm3018_vm6, %v3015_v12 }
 0xa5a   :  { %v7034_v55 = vpop.f32.mrb[16].mxu1 }
 0xa5b   :  { %v3115_v40 = vrot.slane %v7034_v55, 4  ;;  %v3123_v17 = vmul.f32 %v7034_v55, %v7034_v55  ;;  %v4593_v2 = vpop.f32.mrb[17].mxu1 }
 0xa5c   :  { %v3059_v7 = vpop.f32.mrb[18].mxu1 }
 0xa5d   :  { %v3116_v1 = vadd.f32 %v3115_v40, %v7034_v55  ;;  %v3124_v26 = vrot.slane %v3123_v17, 4  ;;  %v4594_v48 = vpop.f32.mrb[19].mxu1 }
 0xa5f   :  { %v3117_v6 = vrot.slane %v3116_v1, 2  ;;  %v3125_v23 = vadd.f32 %v3124_v26, %v3123_v17 }
 0xa61   :  { %v3118_v19 = vadd.f32 %v3117_v6, %v3116_v1  ;;  %v3126_v46 = vrot.slane %v3125_v23, 2  ;;  %v7064_v1 = vpop.permute.xlu1 %3297  ;;  %v4925_v6 = vld [vmem:[%s7061_s4 + $0x40] sm:$0xff]  }
 0xa62   :  { %4443 = vmatprep.subr.bf16.mxu1 %v4925_v6  ;;  %v4948_v6 = vld [vmem:[%s6426_s15 + $0x38] sm:$0xff]  }
 0xa63   :  { %v3119_v10 = vrot.slane %v3118_v19, 1  ;;  %v3127_v24 = vadd.f32 %v3126_v46, %v3125_v23  ;;  %v4926_v23 = vld [vmem:[%s7061_s4] sm:$0xff]  }
 0xa64   :  { %4444 = vmatpush3.bf16.msra.mxu1 %v4926_v23 }
 0xa65   :  { %v3120_v54 = vadd.f32 %v3119_v10, %v3118_v19  ;;  %v3128_v11 = vrot.slane %v3127_v24, 1  ;;  %v7072_v10 = vpop.permute.xlu1 %3305 }
 0xa67   :  { %v3122_v5 = vmul.f32 0.125, %v3120_v54  ;;  %v3129_v61 = vadd.f32 %v3128_v11, %v3127_v24  ;;  %v7074_v24 = vpop.permute.xlu0 %3288  ;;  %v4927_v54 = vld [vmem:[%s7061_s4 + $0x48] sm:$0xff]  }
 0xa68   :  { %4445 = vmatprep.subr.bf16.mxu1 %v4927_v54 }
 0xa69   :  { %v3130_v43 = vmul.f32 0.125, %v3129_v61  ;;  %v3131_v20 = vmul.f32 %v3122_v5, %v3122_v5  ;;  %v4928_v61 = vld [vmem:[%s7061_s4 + $0x8] sm:$0xff]  }
 0xa6a   :  { %4446 = vmatpush3.bf16.msra.mxu1 %v4928_v61 }
 0xa6b   :  { %v3132_v31 = vsub.f32 %v3130_v43, %v3131_v20  ;;  %v4929_v43 = vld [vmem:[%s7061_s4 + $0x50] sm:$0xff]  }
 0xa6c   :  { %v4930_v20 = vld [vmem:[%s7061_s4 + $0x10] sm:$0xff]   ;;  %4447 = vmatprep.subr.bf16.mxu1 %v4929_v43 }
 0xa6d   :  { %v3133_v38 = vadd.f32 1e-05, %v3132_v31 }
 0xa6e   :  { %4448 = vmatpush3.bf16.msra.mxu1 %v4930_v20 }
 0xa6f   :  { %4985 = vrsqrt.f32 %v3133_v38 }
 0xa79   :  { %v4986_v36 = vpop.eup %4985 }
 0xa7a   :  { %v3135_v56 = vmul.f32 %v4986_v36, %v3063_v50  ;;  %v4931_v50 = vld [vmem:[%s7061_s4 + $0x58] sm:$0xff]  }
 0xa7b   :  { %v4932_v36 = vld [vmem:[%s7061_s4 + $0x18] sm:$0xff]   ;;  %4449 = vmatprep.subr.bf16.mxu1 %v4931_v50 }
 0xa7c   :  { %v3136_v57 = vmul.f32 %v3135_v56, %v3122_v5  ;;  %v3142_v58 = vrot.slane %v3135_v56, %v7519_v15  ;;  %v7091_v56 = vpop.permute.xlu1 %3325  ;;  %4450 = vmatpush3.bf16.msra.mxu1 %v4932_v36 }
 0xa7e   :  { %v3137_v34 = vsub.f32 %v3064_v39, %v3136_v57  ;;  %v3144_v16 = vmul.f32 %v3142_v58, %v7034_v55  ;;  %v4933_v39 = vld [vmem:[%s7061_s4 + $0x60] sm:$0xff]   ;;  %v7097_v58 = vpop.permute.xlu0 %3317 }
 0xa7f   :  { %4451 = vmatprep.subr.bf16.mxu1 %v4933_v39 }
 0xa80   :  { %v3149_v30 = vrot.slane %v3137_v34, %v7519_v15  ;;  %v4934_v34 = vld [vmem:[%s7061_s4 + $0x20] sm:$0xff]  }
 0xa81   :  { %4452 = vmatpush3.bf16.msra.mxu1 %v4934_v34 }
 0xa82   :  { %v3151_v13 = vadd.f32 %v3149_v30, %v3144_v16 }
 0xa84   :  { %v3152_v44 = vmax.f32 %v3151_v13, 0.0  ;;  %v4935_v13 = vld [vmem:[%s7061_s4 + $0x68] sm:$0xff]  }
 0xa85   :  { %4453 = vmatprep.subr.bf16.mxu1 %v4935_v13 }
 0xa86   :  { %v3153_v42 = vpack.c.bf16 %v3152_v44, %v3152_v44  ;;  %v7103_v44 = vpop.permute.xlu1 %3334 }
 0xa88   :  { %4612 = vmatmul.mubr.bf16.vlgmr.msra.gmra.mrb[48].mxu0 %v3153_v42  ;;  %v4936_v42 = vld [vmem:[%s7061_s4 + $0x28] sm:$0xff]  }
 0xa89   :  { %4631 = vmatprep.mubr.msk.bf16.mxu0 %vm5034_vm5, %v5033_v22  ;;  %4454 = vmatpush3.bf16.msra.mxu1 %v4936_v42 }
 0xb5b   :  { %v3236_v53 = vpop.f32.mrb[48].mxu0 }
 0xb5c   :  { %v3242_v60 = vrot.slane %v3236_v53, 4  ;;  %v3249_v47 = vmul.f32 %v3236_v53, %v3236_v53  ;;  %v4613_v62 = vpop.f32.mrb[49].mxu0 }
 0xb5d   :  { %v3239_v14 = vpop.f32.mrb[50].mxu0  ;;  %v4940_v62 = vld [vmem:[%s7061_s4 + $0x38] sm:$0xff]  }
 0xb5e   :  { %v3243_v33 = vadd.f32 %v3242_v60, %v3236_v53  ;;  %v3250_v63 = vrot.slane %v3249_v47, 4  ;;  %v4614_v28 = vpop.f32.mrb[51].mxu0  ;;  %v4938_v60 = vld [vmem:[%s7061_s4 + $0x30] sm:$0xff]  }
 0xb60   :  { %v3244_v25 = vrot.slane %v3243_v33, 2  ;;  %v3251_v27 = vadd.f32 %v3250_v63, %v3249_v47  ;;  %v4939_v47 = vld [vmem:[%s7061_s4 + $0x78] sm:$0xff]   ;;  %v7114_v63 = vpop.permute.xlu0 %3282 }
 0xb62   :  { %v3245_v52 = vadd.f32 %v3244_v25, %v3243_v33  ;;  %v3252_v32 = vrot.slane %v3251_v27, 2 }
 0xb64   :  { %v3246_v12 = vrot.slane %v3245_v52, 1  ;;  %v3253_v37 = vadd.f32 %v3252_v32, %v3251_v27 }
 0xb66   :  { %v3247_v35 = vadd.f32 %v3246_v12, %v3245_v52  ;;  %v3254_v29 = vrot.slane %v3253_v37, 1 }
 0xb68   :  { %v3248_v59 = vmul.f32 0.125, %v3247_v35  ;;  %v3255_v0 = vadd.f32 %v3254_v29, %v3253_v37 }
 0xb6a   :  { %v3256_v49 = vmul.f32 0.125, %v3255_v0  ;;  %v3257_v51 = vmul.f32 %v3248_v59, %v3248_v59 }
 0xb6c   :  { %v3258_v18 = vsub.f32 %v3256_v49, %v3257_v51 }
 0xb6e   :  { %v3259_v4 = vadd.f32 1e-05, %v3258_v18 }
 0xb70   :  { %4987 = vrsqrt.f32 %v3259_v4 }
 0xb7a   :  { %v4988_v9 = vpop.eup %4987 }
 0xb7b   :  { %v3261_v3 = vmul.f32 %v4988_v9, %v3081_v41 }
 0xb7d   :  { %v3262_v45 = vmul.f32 %v3261_v3, %v3248_v59  ;;  %v3268_v40 = vrot.slane %v3261_v3, %v7519_v15 }
 0xb7f   :  { %v3263_v17 = vsub.f32 %v3082_v21, %v3262_v45  ;;  %v3270_v2 = vmul.f32 %v3268_v40, %v3236_v53  ;;  %v4937_v53 = vld [vmem:[%s7061_s4 + $0x70] sm:$0xff]   ;;  %v4941_v45 = vld [vmem:[%s6426_s15] sm:$0xff]   ;;  %v4942_v40 = vld [vmem:[%s6426_s15 + $0x8] sm:$0xff]  }
 0xb80   :  { %4455 = vmatprep.subr.bf16.mxu1 %v4937_v53  ;;  %4616 = vmatpush3.bf16.msra.mxu0 %v4941_v45 }
 0xb81   :  { %v3275_v7 = vrot.slane %v3263_v17, %v7519_v15  ;;  %4456 = vmatpush3.bf16.msra.mxu1 %v4938_v60  ;;  %4617 = vmatprep.subr.bf16.mxu0 %v5033_v22  ;;  %v4943_v17 = vld [vmem:[%s6426_s15 + $0x10] sm:$0xff]  }
 0xb82   :  { %4457 = vmatprep.subr.bf16.mxu1 %v4939_v47 }
 0xb83   :  { %v3277_v26 = vadd.f32 %v3275_v7, %v3270_v2  ;;  %v4944_v2 = vld [vmem:[%s6426_s15 + $0x18] sm:$0xff]   ;;  %v4945_v7 = vld [vmem:[%s6426_s15 + $0x20] sm:$0xff]  }
 0xb84   :  { %4618 = vmatpush3.bf16.msra.mxu0 %v4942_v40 }
 0xb85   :  { %v7066_v48 = vmax.f32 %v3277_v26, 0.0  ;;  %4458 = vmatpush3.bf16.msra.mxu1 %v4940_v62  ;;  %4619 = vmatprep.subr.bf16.mxu0 %v5033_v22  ;;  %v4946_v26 = vld [vmem:[%s6426_s15 + $0x28] sm:$0xff]  }
 0xb87   :  { %v3295_v19 = vrot.slane %v7066_v48, 7  ;;  %v3286_v46 = vrot.slane %v7066_v48, 6  ;;  %v3315_v38 = vrot.slane %v7066_v48, 1  ;;  %v3332_v30 = vrot.slane %v7066_v48, 2 }
 0xb88   :  { %v3279_v33 = vrot.slane %v7066_v48, 5  ;;  %v3341_v37 = vrot.slane %v7066_v48, 3  ;;  %4620 = vmatpush3.bf16.msra.mxu0 %v4943_v17 }
 0xb89   :  { %v3308_v11 = vmul.f32 %v7072_v10, %v3295_v19  ;;  %v3291_v5 = vmul.f32 %v7074_v24, %v3286_v46  ;;  %v3300_v31 = vmul.f32 %v7064_v1, %v3295_v19  ;;  %v3328_v57 = vmul.f32 %v7091_v56, %v3315_v38  ;;  %4621 = vmatprep.subr.bf16.mxu0 %v5033_v22 }
 0xb8a   :  { %v3320_v16 = vmul.f32 %v7097_v58, %v3315_v38  ;;  %v3285_v28 = vmul.f32 %v7114_v63, %v3279_v33  ;;  %v3487_v33 = vld [vmem:[%s4111_s11] sm:$0x1] }
 0xb8b   :  { %3309 = vrot.lane.b32.xlu0 %v3308_v11, %s5021_s30  ;;  %3292 = vrot.lane.b32.xlu1 %v3291_v5, %s5020_s29 }
 0xb8c   :  { %4622 = vmatpush3.bf16.msra.mxu0 %v4944_v2 }
 0xb8d   :  { %4623 = vmatprep.subr.bf16.mxu0 %v5033_v22 }
 0xb8f   :  { %3312 = vrot.lane.b32.xlu0 %v7066_v48, %s5019_s28  ;;  %3301 = vrot.lane.b32.xlu1 %v3300_v31, %s5015_s12  ;;  %v4947_v48 = vld [vmem:[%s6426_s15 + $0x30] sm:$0xff]   ;;  %s5043_s15 = smov 30  }
 0xb90   :  { %4624 = vmatpush3.bf16.msra.mxu0 %v4945_v7  ;;  %s4110_s7 = sld [smem:[%s7240_s0 + %s5043_s15]]  }
 0xb91   :  { %4625 = vmatprep.subr.bf16.mxu0 %v5033_v22 }
 0xb93   :  { %3329 = vrot.lane.b32.xlu0 %v3328_v57, %s5023_s2  ;;  %3343 = vperm.xlu1 %4817, %v7007_v8   ;;  %v3337_v8 = vmul.f32 %v7103_v44, %v3332_v30 }
 0xb94   :  { %4626 = vmatpush3.bf16.msra.mxu0 %v4946_v26 }
 0xb95   :  { %4627 = vmatprep.subr.bf16.mxu0 %v5033_v22 }
 0xb96   :  { %v3486_v47 = vld [vmem:[%s4110_s7] sm:$0x1] }
 0xb97   :  { %3321 = vrot.lane.b32.xlu1 %v3320_v16, %s5022_s1 }
 0xb98   :  { %4628 = vmatpush3.bf16.msra.mxu0 %v4947_v48 }
 0xb99   :  { %4629 = vmatprep.subr.bf16.mxu0 %v5033_v22 }
 0xb9b   :  { %3338 = vrot.lane.b32.xlu1 %v3337_v8, %s5024_s3 }
 0xb9c   :  { %4630 = vmatpush3.bf16.msra.mxu0 %v4948_v6 }
 0xb9d   :  { %4641 = vmatprep.subr.bf16.mxu0 %v5033_v22 }
 0xbfd   :  { %v3293_v14 = vpop.permute.xlu1 %3292  ;;  %v3310_v52 = vpop.permute.xlu0 %3309 }
 0xbfe   :  { %v3294_v27 = vadd.f32 %v3293_v14, %v3285_v28 }
 0xc01   :  { %v3302_v25 = vpop.permute.xlu1 %3301  ;;  %v3313_v35 = vpop.permute.xlu0 %3312 }
 0xc02   :  { %v3303_v32 = vadd.f32 %v3302_v25, %v3294_v27 }
 0xc04   :  { %v3311_v12 = vadd.f32 %v3310_v52, %v3303_v32 }
 0xc05   :  { %v3330_v4 = vpop.permute.xlu0 %3329 }
 0xc06   :  { %v3314_v49 = vadd.f32 %v3313_v35, %v3311_v12 }
 0xc12   :  { %v7118_v29 = vpop.permute.xlu1 %3343 }
 0xc13   :  { %v3346_v59 = vmul.f32 %v7118_v29, %v3341_v37 }
 0xc15   :  { %v3348_v0 = vpack.c.bf16 %v3346_v59, %v3346_v59  ;;  %v4949_v59 = vld [vmem:[%s7158_s17 + $0x40] sm:$0xff]  }
 0xc16   :  { %v3322_v51 = vpop.permute.xlu1 %3321  ;;  %4474 = vmatprep.subr.bf16.mxu1 %v4949_v59 }
 0xc17   :  { %v3323_v18 = vadd.f32 %v3322_v51, %v3314_v49  ;;  %3477 = vmatprep.mubr.bf16.mxu1 %v3348_v0  ;;  %v4950_v0 = vld [vmem:[%s7158_s17] sm:$0xff]   ;;  %v4951_v49 = vld [vmem:[%s7158_s17 + $0x48] sm:$0xff]  }
 0xc18   :  { %v4952_v51 = vld [vmem:[%s7158_s17 + $0x8] sm:$0xff]  }
 0xc19   :  { %v3331_v41 = vadd.f32 %v3330_v4, %v3323_v18  ;;  %v4953_v18 = vld [vmem:[%s7158_s17 + $0x50] sm:$0xff]  }
 0xc1a   :  { %v3339_v9 = vpop.permute.xlu1 %3338  ;;  %v4954_v4 = vld [vmem:[%s7158_s17 + $0x10] sm:$0xff]  }
 0xc1b   :  { %v3340_v3 = vadd.f32 %v3339_v9, %v3331_v41  ;;  %v4955_v41 = vld [vmem:[%s7158_s17 + $0x58] sm:$0xff]  }
 0xc1c   :  { %v4956_v9 = vld [vmem:[%s7158_s17 + $0x18] sm:$0xff]  }
 0xc1d   :  { %v3347_v21 = vpack.c.bf16 %v3340_v3, %v3340_v3 }
 0xc1f   :  { %3478 = vmatmul.mubr.bf16.vlgmr.msra.gmra.mrb[20].mxu1 %v3347_v21 }
 0xc20   :  { %4475 = vmatpush3.bf16.msra.mxu1 %v4950_v0  ;;  %v4963_v0 = vld [vmem:[%s7158_s17 + $0x78] sm:$0xff]  }
 0xc21   :  { %4476 = vmatprep.subr.bf16.mxu1 %v4951_v49  ;;  %v4964_v49 = vld [vmem:[%s7158_s17 + $0x38] sm:$0xff]  }
 0xc24   :  { %4477 = vmatpush3.bf16.msra.mxu1 %v4952_v51 }
 0xc25   :  { %4478 = vmatprep.subr.bf16.mxu1 %v4953_v18 }
 0xc28   :  { %4479 = vmatpush3.bf16.msra.mxu1 %v4954_v4 }
 0xc29   :  { %4480 = vmatprep.subr.bf16.mxu1 %v4955_v41 }
 0xc2c   :  { %4481 = vmatpush3.bf16.msra.mxu1 %v4956_v9 }
 0xcf2   :  { %v4459_v23 = vpop.f32.mrb[20].mxu1 }
 0xcf3   :  { %v4460_v19 = vpop.f32.mrb[21].mxu1 }
 0xcf4   :  { %v4461_v46 = vadd.f32 %v4460_v19, %v4459_v23  ;;  %v4462_v54 = vpop.f32.mrb[22].mxu1 }
 0xcf5   :  { %v4463_v11 = vpop.f32.mrb[23].mxu1 }
 0xcf6   :  { %v7138_v5 = vadd.f32 %v4461_v46, %v7034_v55 }
 0xcf8   :  { %v3538_v61 = vrot.slane %v7138_v5, 4  ;;  %v3545_v43 = vmul.f32 %v7138_v5, %v7138_v5 }
 0xcfa   :  { %v3539_v20 = vadd.f32 %v3538_v61, %v7138_v5  ;;  %v3546_v31 = vrot.slane %v3545_v43, 4 }
 0xcfc   :  { %v3540_v38 = vrot.slane %v3539_v20, 2  ;;  %v3547_v50 = vadd.f32 %v3546_v31, %v3545_v43 }
 0xcfe   :  { %v3541_v36 = vadd.f32 %v3540_v38, %v3539_v20  ;;  %v3548_v39 = vrot.slane %v3547_v50, 2 }
 0xd00   :  { %v3549_v57 = vadd.f32 %v3548_v39, %v3547_v50  ;;  %v3542_v34 = vrot.slane %v3541_v36, 1  ;;  %v3504_v39 = vld [vmem:[%s4113_s21] sm:$0x1] }
 0xd02   :  { %v3550_v16 = vrot.slane %v3549_v57, 1  ;;  %v3543_v30 = vadd.f32 %v3542_v34, %v3541_v36 }
 0xd04   :  { %v3551_v13 = vadd.f32 %v3550_v16, %v3549_v57  ;;  %v3544_v42 = vmul.f32 0.125, %v3543_v30  ;;  %v3505_v16 = vld [vmem:[%s4114_s25] sm:$0x1] }
 0xd06   :  { %v3552_v55 = vmul.f32 0.125, %v3551_v13  ;;  %v3553_v8 = vmul.f32 %v3544_v42, %v3544_v42 }
 0xd08   :  { %v3554_v53 = vsub.f32 %v3552_v55, %v3553_v8  ;;  %v4958_v55 = vld [vmem:[%s7158_s17 + $0x20] sm:$0xff]  }
 0xd0a   :  { %v3555_v60 = vadd.f32 1e-05, %v3554_v53 }
 0xd0c   :  { %4989 = vrsqrt.f32 %v3555_v60 }
 0xd16   :  { %v4990_v62 = vpop.eup %4989 }
 0xd17   :  { %v3557_v14 = vmul.f32 %v4990_v62, %v3486_v47  ;;  %v4959_v47 = vld [vmem:[%s7158_s17 + $0x68] sm:$0xff]  }
 0xd18   :  { %v4960_v62 = vld [vmem:[%s7158_s17 + $0x28] sm:$0xff]  }
 0xd19   :  { %v3558_v28 = vmul.f32 %v3557_v14, %v3544_v42  ;;  %v3564_v25 = vrot.slane %v3557_v14, %v7519_v15  ;;  %v4957_v42 = vld [vmem:[%s7158_s17 + $0x60] sm:$0xff]  }
 0xd1a   :  { %4482 = vmatprep.subr.bf16.mxu1 %v4957_v42 }
 0xd1b   :  { %v3559_v27 = vsub.f32 %v3487_v33, %v3558_v28  ;;  %v3566_v52 = vmul.f32 %v3564_v25, %v7138_v5  ;;  %4483 = vmatpush3.bf16.msra.mxu1 %v4958_v55  ;;  %v4961_v28 = vld [vmem:[%s7158_s17 + $0x70] sm:$0xff]  }
 0xd1c   :  { %4484 = vmatprep.subr.bf16.mxu1 %v4959_v47  ;;  %v4962_v25 = vld [vmem:[%s7158_s17 + $0x30] sm:$0xff]  }
 0xd1d   :  { %v3571_v32 = vrot.slane %v3559_v27, %v7519_v15 }
 0xd1f   :  { %v3573_v12 = vadd.f32 %v3571_v32, %v3566_v52  ;;  %4485 = vmatpush3.bf16.msra.mxu1 %v4960_v62 }
 0xd20   :  { %4486 = vmatprep.subr.bf16.mxu1 %v4961_v28 }
 0xd21   :  { %v3574_v37 = vmax.f32 %v3573_v12, 0.0 }
 0xd23   :  { %v3575_v35 = vpack.c.bf16 %v3574_v37, %v3574_v37  ;;  %4487 = vmatpush3.bf16.msra.mxu1 %v4962_v25 }
 0xd24   :  { %4488 = vmatprep.subr.bf16.mxu1 %v4963_v0 }
 0xd25   :  { %4632 = vmatmul.mubr.bf16.vlgmr.msra.gmra.mrb[52].mxu0 %v3575_v35 }
 0xd26   :  { %4657 = vmatprep.mubr.msk.bf16.mxu0 %vm5034_vm5, %v5033_v22 }
 0xd27   :  { %4489 = vmatpush3.bf16.msra.mxu1 %v4964_v49 }
 0xd28   :  { %4635 = vmatprep.subr.bf16.mxu1 %v5033_v22 }
 0xdf8   :  { %v3658_v3 = vpop.f32.mrb[52].mxu0 }
 0xdf9   :  { %v3664_v21 = vrot.slane %v3658_v3, 4  ;;  %v3671_v45 = vmul.f32 %v3658_v3, %v3658_v3  ;;  %v4633_v40 = vpop.f32.mrb[53].mxu0 }
 0xdfa   :  { %v3661_v17 = vpop.f32.mrb[54].mxu0 }
 0xdfb   :  { %v3665_v2 = vadd.f32 %v3664_v21, %v3658_v3  ;;  %v3672_v7 = vrot.slane %v3671_v45, 4  ;;  %v4634_v26 = vpop.f32.mrb[55].mxu0 }
 0xdfd   :  { %v3666_v48 = vrot.slane %v3665_v2, 2  ;;  %v3673_v6 = vadd.f32 %v3672_v7, %v3671_v45 }
 0xdff   :  { %v3667_v23 = vadd.f32 %v3666_v48, %v3665_v2  ;;  %v3674_v19 = vrot.slane %v3673_v6, 2 }
 0xe01   :  { %v3668_v46 = vrot.slane %v3667_v23, 1  ;;  %v3675_v54 = vadd.f32 %v3674_v19, %v3673_v6 }
 0xe03   :  { %v3669_v11 = vadd.f32 %v3668_v46, %v3667_v23  ;;  %v3676_v61 = vrot.slane %v3675_v54, 1 }
 0xe05   :  { %v3670_v43 = vmul.f32 0.125, %v3669_v11  ;;  %v3677_v20 = vadd.f32 %v3676_v61, %v3675_v54 }
 0xe07   :  { %v3678_v31 = vmul.f32 0.125, %v3677_v20  ;;  %v3679_v38 = vmul.f32 %v3670_v43, %v3670_v43 }
 0xe09   :  { %v3680_v50 = vsub.f32 %v3678_v31, %v3679_v38 }
 0xe0b   :  { %v3681_v36 = vadd.f32 1e-05, %v3680_v50 }
 0xe0d   :  { %4991 = vrsqrt.f32 %v3681_v36 }
 0xe17   :  { %v4992_v57 = vpop.eup %4991 }
 0xe18   :  { %v3683_v34 = vmul.f32 %v4992_v57, %v3504_v39 }
 0xe1a   :  { %v3684_v30 = vmul.f32 %v3683_v34, %v3670_v43  ;;  %v3690_v13 = vrot.slane %v3683_v34, %v7519_v15 }
 0xe1c   :  { %v3685_v8 = vsub.f32 %v3505_v16, %v3684_v30  ;;  %v3692_v53 = vmul.f32 %v3690_v13, %v3658_v3 }
 0xe1e   :  { %v3697_v60 = vrot.slane %v3685_v8, %v7519_v15 }
 0xe20   :  { %v3699_v14 = vadd.f32 %v3697_v60, %v3692_v53 }
 0xe22   :  { %v3700_v33 = vmax.f32 %v3699_v14, 0.0 }
 0xe24   :  { %v3708_v27 = vrot.slane %v3700_v33, 7  ;;  %v3703_v52 = vrot.slane %v3700_v33, 6  ;;  %v3734_v32 = vrot.slane %v3700_v33, 3  ;;  %v3720_v18 = vrot.slane %v3700_v33, 1 }
 0xe25   :  { %v3701_v4 = vrot.slane %v3700_v33, 5 }
 0xe26   :  { %v3709_v12 = vmul.f32 %v3708_v27, %v7064_v1  ;;  %v3704_v37 = vmul.f32 %v3703_v52, %v7074_v24  ;;  %v3735_v35 = vmul.f32 %v3734_v32, %v7118_v29  ;;  %v3713_v51 = vmul.f32 %v3708_v27, %v7072_v10 }
 0xe27   :  { %v3725_v1 = vmul.f32 %v3720_v18, %v7091_v56  ;;  %v3721_v24 = vmul.f32 %v3720_v18, %v7097_v58  ;;  %v3729_v29 = vrot.slane %v3700_v33, 2  ;;  %v3702_v41 = vmul.f32 %v3701_v4, %v7114_v63 }
 0xe28   :  { %3710 = vrot.lane.b32.xlu1 %v3709_v12, %s5015_s12  ;;  %3705 = vrot.lane.b32.xlu0 %v3704_v37, %s5020_s29  ;;  %v3737_v59 = vpack.c.bf16 %v3735_v35, %v3735_v35  ;;  %s5048_s12 = smov 39   ;;  %v3876_v12 = vld [vmem:[%s4117_s5] sm:$0x1] }
 0xe29   :  { %v3730_v10 = vmul.f32 %v3729_v29, %v7103_v44  ;;  %v3914_v29 = vld [vmem:[%s4118_s9] sm:$0xf] }
 0xe2a   :  { %3866 = vmatprep.mubr.bf16.mxu1 %v3737_v59 }
 0xe2c   :  { %3717 = vrot.lane.b32.xlu1 %v3700_v33, %s5019_s28  ;;  %3714 = vrot.lane.b32.xlu0 %v3713_v51, %s5021_s30  ;;  %s7205_s30 = sld [smem:[%s7240_s0 + %s5048_s12]]  }
 0xe30   :  { %3726 = vrot.lane.b32.xlu1 %v3725_v1, %s5023_s2  ;;  %3722 = vrot.lane.b32.xlu0 %v3721_v24, %s5022_s1  ;;  %s5049_s1 = smov 36  }
 0xe31   :  { %s4116_s26 = sld [smem:[%s7240_s0 + %s5049_s1]]  }
 0xe32   :  { %v4965_v63 = vld [vmem:[%s7205_s30] sm:$0xff]   ;;  %v4966_v19 = vld [vmem:[%s7205_s30 + $0x8] sm:$0xff]   ;;  %v4967_v46 = vld [vmem:[%s7205_s30 + $0x10] sm:$0xff]  }
 0xe33   :  { %4642 = vmatpush3.bf16.msra.mxu0 %v4965_v63  ;;  %v4968_v54 = vld [vmem:[%s7205_s30 + $0x18] sm:$0xff]   ;;  %v4969_v11 = vld [vmem:[%s7205_s30 + $0x20] sm:$0xff]   ;;  %v4970_v61 = vld [vmem:[%s7205_s30 + $0x28] sm:$0xff]  }
 0xe34   :  { %3731 = vrot.lane.b32.xlu0 %v3730_v10, %s5024_s3  ;;  %4643 = vmatprep.subr.bf16.mxu0 %v5033_v22  ;;  %v4971_v43 = vld [vmem:[%s7205_s30 + $0x30] sm:$0xff]   ;;  %v4972_v10 = vld [vmem:[%s7205_s30 + $0x38] sm:$0xff]  }
 0xe37   :  { %4644 = vmatpush3.bf16.msra.mxu0 %v4966_v19 }
 0xe38   :  { %4645 = vmatprep.subr.bf16.mxu0 %v5033_v22 }
 0xe3b   :  { %4646 = vmatpush3.bf16.msra.mxu0 %v4967_v46 }
 0xe3c   :  { %4647 = vmatprep.subr.bf16.mxu0 %v5033_v22 }
 0xe3f   :  { %4648 = vmatpush3.bf16.msra.mxu0 %v4968_v54 }
 0xe40   :  { %4649 = vmatprep.subr.bf16.mxu0 %v5033_v22 }
 0xe43   :  { %4650 = vmatpush3.bf16.msra.mxu0 %v4969_v11 }
 0xe44   :  { %4651 = vmatprep.subr.bf16.mxu0 %v5033_v22 }
 0xe47   :  { %4652 = vmatpush3.bf16.msra.mxu0 %v4970_v61 }
 0xe48   :  { %4653 = vmatprep.subr.bf16.mxu0 %v5033_v22 }
 0xe4b   :  { %4654 = vmatpush3.bf16.msra.mxu0 %v4971_v43 }
 0xe4c   :  { %4655 = vmatprep.subr.bf16.mxu0 %v5033_v22 }
 0xe4f   :  { %4656 = vmatpush3.bf16.msra.mxu0 %v4972_v10 }
 0xe9a   :  { %v3711_v9 = vpop.permute.xlu1 %3710  ;;  %v3706_v3 = vpop.permute.xlu0 %3705 }
 0xe9b   :  { %v3707_v21 = vadd.f32 %v3706_v3, %v3702_v41 }
 0xe9d   :  { %v3712_v56 = vadd.f32 %v3711_v9, %v3707_v21  ;;  %v4262_v21 = vld [vmem:[%s4120_s14] ss:$0 sm:$0xff] }
 0xe9e   :  { %v3718_v45 = vpop.permute.xlu1 %3717  ;;  %v3715_v58 = vpop.permute.xlu0 %3714 }
 0xe9f   :  { %v3716_v40 = vadd.f32 %v3715_v58, %v3712_v56 }
 0xea1   :  { %v3719_v17 = vadd.f32 %v3718_v45, %v3716_v40 }
 0xea2   :  { %v3723_v2 = vpop.permute.xlu0 %3722  ;;  %v3727_v26 = vpop.permute.xlu1 %3726 }
 0xea3   :  { %v3724_v7 = vadd.f32 %v3723_v2, %v3719_v17 }
 0xea5   :  { %v3728_v48 = vadd.f32 %v3727_v26, %v3724_v7 }
 0xea6   :  { %v3732_v6 = vpop.permute.xlu0 %3731 }
 0xea7   :  { %v3733_v23 = vadd.f32 %v3732_v6, %v3728_v48 }
 0xea9   :  { %v3736_v44 = vpack.c.bf16 %v3733_v23, %v3733_v23 }
 0xeab   :  { %3867 = vmatmul.mubr.bf16.vlgmr.msra.gmra.mrb[24].mxu1 %v3736_v44 }
 0xeac   :  { %4637 = vmatprep.mubr.msk.bf16.mxu1 %vm5034_vm5, %v5033_v22 }
 0xf7e   :  { %v4490_v20 = vpop.f32.mrb[24].mxu1 }
 0xf7f   :  { %v4491_v31 = vpop.f32.mrb[25].mxu1 }
 0xf80   :  { %v4492_v38 = vadd.f32 %v4491_v31, %v4490_v20  ;;  %v4493_v50 = vpop.f32.mrb[26].mxu1 }
 0xf81   :  { %v4494_v36 = vpop.f32.mrb[27].mxu1 }
 0xf82   :  { %v3874_v39 = vadd.f32 %v4492_v38, %v7138_v5  ;;  %v3875_v5 = vld [vmem:[%s4116_s26] sm:$0x1] }
 0xf84   :  { %v3877_v57 = vrot.slane %v3874_v39, 4  ;;  %v3884_v34 = vmul.f32 %v3874_v39, %v3874_v39 }
 0xf86   :  { %v3878_v16 = vadd.f32 %v3877_v57, %v3874_v39  ;;  %v3885_v30 = vrot.slane %v3884_v34, 4 }
 0xf88   :  { %v3879_v13 = vrot.slane %v3878_v16, 2  ;;  %v3886_v42 = vadd.f32 %v3885_v30, %v3884_v34 }
 0xf8a   :  { %v3880_v55 = vadd.f32 %v3879_v13, %v3878_v16  ;;  %v3887_v8 = vrot.slane %v3886_v42, 2 }
 0xf8c   :  { %v3881_v53 = vrot.slane %v3880_v55, 1  ;;  %v3888_v60 = vadd.f32 %v3887_v8, %v3886_v42 }
 0xf8e   :  { %v3882_v47 = vadd.f32 %v3881_v53, %v3880_v55  ;;  %v3889_v62 = vrot.slane %v3888_v60, 1 }
 0xf90   :  { %v3890_v22 = vadd.f32 %v3889_v62, %v3888_v60  ;;  %v3883_v14 = vmul.f32 0.125, %v3882_v47 }
 0xf92   :  { %v3891_v33 = vmul.f32 0.125, %v3890_v22  ;;  %v3892_v28 = vmul.f32 %v3883_v14, %v3883_v14 }
 0xf94   :  { %v3893_v25 = vsub.f32 %v3891_v33, %v3892_v28 }
 0xf96   :  { %v3894_v27 = vadd.f32 1e-05, %v3893_v25 }
 0xf98   :  { %4993 = vrsqrt.f32 %v3894_v27 }
 0xfa2   :  { %v4994_v52 = vpop.eup %4993 }
 0xfa3   :  { %v3896_v32 = vmul.f32 %v4994_v52, %v3875_v5 }
 0xfa5   :  { %v3897_v37 = vmul.f32 %v3896_v32, %v3883_v14  ;;  %v3903_v35 = vrot.slane %v3896_v32, %v7519_v15 }
 0xfa7   :  { %v3898_v59 = vsub.f32 %v3876_v12, %v3897_v37  ;;  %v3905_v0 = vmul.f32 %v3903_v35, %v3874_v39 }
 0xfa9   :  { %v3910_v49 = vrot.slane %v3898_v59, %v7519_v15 }
 0xfab   :  { %v3912_v51 = vadd.f32 %v3910_v49, %v3905_v0 }
 0xfad   :  { %v3913_v18 = vmax.f32 %v3912_v51, 0.0 }
 0xfaf   :  { %v3915_v1 = vpack.c.bf16 %v3913_v18, %v3913_v18 }
 0xfb1   :  { %v3922_v24 = vsel %vm3920_vm7, %v3915_v1, 0 }
 0xfb2   :  { %4636 = vmatpush3.bf16.msra.mxu1 %v3922_v24 }
 0xfb5   :  { %4638 = vmatmul.mubr.msk.bf16.vlgmr.msra.gmra.mrb[28].mxu1 %vm3916_vm8, %v3914_v29 }
0x1088   :  { %v3958_v4 = vpop.f32.mrb[28].mxu1 }
0x1089   :  { %v3980_v41 = vpack.c.bf16 %v3958_v4, %v3958_v4  ;;  %v4639_v9 = vpop.f32.mrb[29].mxu1 }
0x108a   :  { %v3961_v15 = vpop.f32.mrb[30].mxu1 }
0x108b   :  { %v4640_v3 = vpop.f32.mrb[31].mxu1  ;;  %4658 = vmatmul.mubr.bf16.vlgmr.msra.gmra.mrb[56].mxu0 %v3980_v41 }
0x115e   :  { %v4070_v56 = vpop.f32.mrb[56].mxu0 }
0x115f   :  { %v4071_v45 = vadd.f32 %v4262_v21, %v4070_v56  ;;  %v4659_v58 = vpop.f32.mrb[57].mxu0 }
0x1160   :  { %v4073_v40 = vpop.f32.mrb[58].mxu0 }
0x1161   :  { %4076 = vst [vmem:[%s4121_s19] sm:$0xff] %v4071_v45  ;;  %v4660_v17 = vpop.f32.mrb[59].mxu0 }

</bundles_post_ra>
